<compile_context>
chip_gen: v5e
topology: v5e:2x2
jax: 0.10.0
libtpu: 0.0.40
codegen_flags: <defaults>
</compile_context>

<pallas_src>
import functools

import jax
import jax.numpy as jnp
from jax import lax
from jax.experimental import pallas as pl
from jax.experimental.pallas import tpu as pltpu


def _round_up(x, m):
    return (x + m - 1) // m * m


# ----------------------------------------------------------------------------
# XLA glue: corner-grouped, transposed im2col for conv+pool fusion.
# ----------------------------------------------------------------------------
def _pooled_patches(x_cnhw, kh, kw, *, sample_minor):
    """Corner-grouped transposed im2col (pure data movement, stays in XLA).

    Returns P of shape [4, kh*kw*C, M] where M = Hp*Wp*N (sample_minor) or
    N*Hp*Wp, and P[2*di+dj, (i*kw+j)*C+ci, m] is the input pixel feeding conv
    tap (i, j), input channel ci, pooling corner (di, dj) of pooled pixel m.
    """
    c, n, h, w = x_cnhw.shape
    ho, wo = h - kh + 1, w - kw + 1
    assert ho % 2 == 0 and wo % 2 == 0, "2x2/2 pooling would drop rows/cols"
    hp, wp = ho // 2, wo // 2
    corners = []
    for di in (0, 1):
        for dj in (0, 1):
            taps = []
            for i in range(kh):
                for j in range(kw):
                    win = x_cnhw[:, :,
                                 di + i: di + i + 2 * hp - 1: 2,
                                 dj + j: dj + j + 2 * wp - 1: 2]
                    taps.append(win)                        # [C, N, Hp, Wp]
            pt = jnp.stack(taps, axis=0)                    # [kh*kw, C, N, Hp, Wp]
            if sample_minor:                                # lanes = (hp, wp, n)
                pt = jnp.transpose(pt, (0, 1, 3, 4, 2))
            corners.append(pt.reshape(kh * kw * c, hp * wp * n))
    return jnp.stack(corners, axis=0), (n, hp, wp)          # [4, K, M]


# ----------------------------------------------------------------------------
# Kernel 1: fused conv1 (corner-grouped im2col matmul) + bias + ReLU + maxpool.
# ----------------------------------------------------------------------------
def _conv_relu_pool_kernel(p_ref, w_ref, b_ref, o_ref):
    # p_ref: [4, K, TN] bf16, w_ref: [Cout, K] bf16, b_ref: [Cout, 1] f32.
    w = w_ref[...]
    acc = jnp.dot(w, p_ref[0], preferred_element_type=jnp.float32)
    for c in range(1, 4):
        acc = jnp.maximum(
            acc, jnp.dot(w, p_ref[c], preferred_element_type=jnp.float32))
    # relu(max_c(conv_c) + b) == max_c relu(conv_c + b): shared bias.
    o_ref[...] = jnp.maximum(acc + b_ref[...], 0.0)


def conv_relu_pool(x_cnhw, w_mat, b_col, *, kh, kw, block_lanes=512):
    """conv2d(valid, stride 1) + bias + ReLU + maxpool(2,2).

    x_cnhw: [Cin, N, H, W].  Returns ([Cout, N*Hp*Wp] f32, (N, Hp, Wp)).
    """
    cout, k = w_mat.shape
    patches, (n, hp, wp) = _pooled_patches(x_cnhw, kh, kw, sample_minor=False)
    patches = patches.astype(w_mat.dtype)                   # bf16 streamed path
    m = n * hp * wp
    if m <= block_lanes:
        tn, m_pad = m, m                                    # single block, no pad
    else:
        tn = block_lanes
        m_pad = _round_up(m, tn)
        # TODO(synk): large-batch path — pick tn | m (or mask the ragged block)
        # instead of materializing this pad over the biggest streamed tensor.
        patches = jnp.pad(patches, ((0, 0), (0, 0), (0, m_pad - m)))

    out = pl.pallas_call(
        _conv_relu_pool_kernel,
        out_shape=jax.ShapeDtypeStruct((cout, m_pad), jnp.float32),
        grid=(m_pad // tn,),
        in_specs=[
            pl.BlockSpec((4, k, tn), lambda t: (0, 0, t)),
            pl.BlockSpec((cout, k), lambda t: (0, 0)),
            pl.BlockSpec((cout, 1), lambda t: (0, 0)),
        ],
        out_specs=pl.BlockSpec((cout, tn), lambda t: (0, t)),
        compiler_params=pltpu.CompilerParams(
            dimension_semantics=("parallel",)),
    )(patches, w_mat, b_col)
    return out[:, :m], (n, hp, wp)


# ----------------------------------------------------------------------------
# Kernel 2: fused conv2 + bias + ReLU + pool + flatten + fc1/ReLU + fc2/ReLU + fc3.
# Everything after conv1 stays in VMEM; one launch.
# ----------------------------------------------------------------------------
def _conv2_mlp_kernel(p_ref, sel_ref, w2_ref, b2_ref, w1_ref, b1_ref,
                      wf2_ref, bf2_ref, wf3_ref, bf3_ref, o_ref, xt_ref,
                      *, n_pos, cout):
    # conv2 + bias + ReLU + 2x2 maxpool: 4 corner matmuls + elementwise max.
    w2 = w2_ref[...]
    acc = jnp.dot(w2, p_ref[0], preferred_element_type=jnp.float32)
    for c in range(1, 4):
        acc = jnp.maximum(
            acc, jnp.dot(w2, p_ref[c], preferred_element_type=jnp.float32))
    o2 = jnp.maximum(acc + b2_ref[...], 0.0)        # [cout, n_pos*nb] f32

    # (c, hw) -> fc1-input-row merge.  Each nb-wide lane group of o2 is
    # compacted to lane offset 0 with a tiny one-hot matmul (sel_ref[hw] is
    # [n_pos*nb, nb]) and stored into rows [hw*cout, (hw+1)*cout) of the
    # fc1-input scratch.  Only full-width, tile-aligned ops are used.
    nb = xt_ref.shape[1]
    del nb  # (documented above; sel columns already encode the group width)
    for hw in range(n_pos):
        chunk = jnp.dot(o2, sel_ref[hw], preferred_element_type=jnp.float32)
        xt_ref[hw * cout:(hw + 1) * cout, :] = chunk

    # fc1 -> ReLU -> fc2 -> ReLU -> fc3, all transposed ([D, N]); PyTorch
    # [out, in] weights are used as-is; intermediates never leave VMEM/vregs.
    x = xt_ref[...]
    h = jnp.dot(w1_ref[...], x, preferred_element_type=jnp.float32) + b1_ref[...]
    h = jnp.maximum(h, 0.0)
    h = jnp.dot(wf2_ref[...], h, preferred_element_type=jnp.float32) + bf2_ref[...]
    h = jnp.maximum(h, 0.0)
    o_ref[...] = (jnp.dot(wf3_ref[...], h, preferred_element_type=jnp.float32)
                  + bf3_ref[...])


def _lane_gather_onehots(n_pos, nb):
    """sel[hw, m, n] = 1 iff m == hw*nb + n (one-hot lane-group gather)."""
    m = jnp.arange(n_pos * nb, dtype=jnp.int32)[None, :, None]
    hw = jnp.arange(n_pos, dtype=jnp.int32)[:, None, None]
    nn = jnp.arange(nb, dtype=jnp.int32)[None, None, :]
    return (m == hw * nb + nn).astype(jnp.float32)          # [n_pos, n_pos*nb, nb]


def conv2_mlp_fused(p2, sel, pp, n):
    w2m, b2 = pp["w2m"], pp["b2"]
    wfc1p, bfc1 = pp["wfc1p"], pp["bfc1"]
    wfc2, bfc2 = pp["wfc2"], pp["bfc2"]
    wfc3, bfc3 = pp["wfc3"], pp["bfc3"]
    cout2, k2 = w2m.shape
    n_pos = p2.shape[2] // n
    d1, d2, d3 = wfc1p.shape[0], wfc2.shape[0], wfc3.shape[0]
    kern = functools.partial(_conv2_mlp_kernel, n_pos=n_pos, cout=cout2)
    # TODO(synk): for very large batch, grid over 128-sample blocks (keeps the
    # per-block patch lanes 128-aligned); a single block is used here.
    return pl.pallas_call(
        kern,
        out_shape=jax.ShapeDtypeStruct((d3, n), jnp.float32),
        grid=(1,),
        in_specs=[
            pl.BlockSpec((4, k2, n_pos * n), lambda i: (0, 0, 0)),
            pl.BlockSpec((n_pos, n_pos * n, n), lambda i: (0, 0, 0)),
            pl.BlockSpec((cout2, k2), lambda i: (0, 0)),
            pl.BlockSpec((cout2, 1), lambda i: (0, 0)),
            pl.BlockSpec((d1, cout2 * n_pos), lambda i: (0, 0)),
            pl.BlockSpec((d1, 1), lambda i: (0, 0)),
            pl.BlockSpec((d2, d1), lambda i: (0, 0)),
            pl.BlockSpec((d2, 1), lambda i: (0, 0)),
            pl.BlockSpec((d3, d2), lambda i: (0, 0)),
            pl.BlockSpec((d3, 1), lambda i: (0, 0)),
        ],
        out_specs=pl.BlockSpec((d3, n), lambda i: (0, 0)),
        scratch_shapes=[pltpu.VMEM((cout2 * n_pos, n), jnp.float32)],
        compiler_params=pltpu.CompilerParams(
            dimension_semantics=("arbitrary",)),
    )(p2, sel, w2m, b2, wfc1p, bfc1, wfc2, bfc2, wfc3, bfc3)


# ----------------------------------------------------------------------------
# One-time weight preparation (hoisted out of the per-forward path).
# ----------------------------------------------------------------------------
def prepare_params(p):
    cout1, cin1, kh1, kw1 = p["w1"].shape
    cout2, cin2, kh2, kw2 = p["w2"].shape
    # [Cout,Cin,kh,kw] -> [Cout, (i,j,ci)] to match the patch fast axis.
    w1m = jnp.transpose(p["w1"], (0, 2, 3, 1)).reshape(cout1, kh1 * kw1 * cin1)
    w2m = jnp.transpose(p["w2"], (0, 2, 3, 1)).reshape(cout2, kh2 * kw2 * cin2)
    # fc1 columns: torch flatten order is (c, hw); the fused kernel produces
    # fc1-input rows in (hw, c) order -> permute the weight once here.
    d1 = p["wfc1"].shape[0]
    n_pos = p["wfc1"].shape[1] // cout2
    wfc1p = (p["wfc1"].reshape(d1, cout2, n_pos)
             .transpose(0, 2, 1).reshape(d1, cout2 * n_pos))
    return {
        "w1m": w1m.astype(jnp.bfloat16), "b1": p["b1"].reshape(-1, 1),
        "w2m": w2m.astype(jnp.bfloat16), "b2": p["b2"].reshape(-1, 1),
        "wfc1p": wfc1p, "bfc1": p["bfc1"].reshape(-1, 1),
        "wfc2": p["wfc2"], "bfc2": p["bfc2"].reshape(-1, 1),
        "wfc3": p["wfc3"], "bfc3": p["bfc3"].reshape(-1, 1),
    }


# ----------------------------------------------------------------------------
# Full forward pass (matches ImgClfNet.forward)
# ----------------------------------------------------------------------------
@jax.jit
def img_clf_net_forward(x_nchw, pp):
    # NCHW -> CNHW so channels lead and batch*spatial flattens onto lanes.
    x = jnp.transpose(x_nchw, (1, 0, 2, 3))                       # [3, N, 32, 32]
    a1, (n, hp, wp) = conv_relu_pool(x, pp["w1m"], pp["b1"], kh=5, kw=5)
    a1 = a1.reshape(pp["w1m"].shape[0], n, hp, wp)                # [6, N, 14, 14]
    # conv2 im2col with sample-minor lanes (lane = hw*N + n) so the fused
    # kernel's output rows map straight onto fc1's (pre-permuted) columns.
    p2, _ = _pooled_patches(a1, 5, 5, sample_minor=True)          # [4, 150, 25N]
    p2 = p2.astype(pp["w2m"].dtype)
    n_pos = p2.shape[2] // n
    sel = _lane_gather_onehots(n_pos, n)                          # constant-folded
    logits_t = conv2_mlp_fused(p2, sel, pp, n)                    # [10, N]
    return logits_t.T                                             # [N, 10]


# ----------------------------------------------------------------------------
# Deterministic parameter init (PyTorch default: U(-1/sqrt(fan_in), +))
# ----------------------------------------------------------------------------
def init_params(key):
    ks = jax.random.split(key, 10)

    def u(k, shape, fan_in):
        bound = 1.0 / float(fan_in) ** 0.5
        return jax.random.uniform(k, shape, jnp.float32, -bound, bound)

    return {
        "w1": u(ks[0], (6, 3, 5, 5), 3 * 25),
        "b1": u(ks[1], (6,), 3 * 25),
        "w2": u(ks[2], (16, 6, 5, 5), 6 * 25),
        "b2": u(ks[3], (16,), 6 * 25),
        "wfc1": u(ks[4], (120, 400), 400),
        "bfc1": u(ks[5], (120,), 400),
        "wfc2": u(ks[6], (84, 120), 120),
        "bfc2": u(ks[7], (84,), 120),
        "wfc3": u(ks[8], (10, 84), 84),
        "bfc3": u(ks[9], (10,), 84),
    }


# ----------------------------------------------------------------------------
# Pure-JAX reference (for correctness check)
# ----------------------------------------------------------------------------
def reference_forward(x_nchw, p):
    def conv(x, w, b):
        y = lax.conv_general_dilated(
            x, w, window_strides=(1, 1), padding="VALID",
            dimension_numbers=("NCHW", "OIHW", "NCHW"),
            precision=lax.Precision.HIGHEST)
        return y + b[None, :, None, None]

    def pool(x):
        n, c, h, w = x.shape
        return x.reshape(n, c, h // 2, 2, w // 2, 2).max(axis=(3, 5))

    x = pool(jax.nn.relu(conv(x_nchw, p["w1"], p["b1"])))
    x = pool(jax.nn.relu(conv(x, p["w2"], p["b2"])))
    x = x.reshape(x.shape[0], -1)
    x = jax.nn.relu(x @ p["wfc1"].T + p["bfc1"])
    x = jax.nn.relu(x @ p["wfc2"].T + p["bfc2"])
    return x @ p["wfc3"].T + p["bfc3"]


if __name__ == "__main__":
    key = jax.random.PRNGKey(0)
    kx, kp = jax.random.split(key)
    # 32x32 input is required by the architecture (16*5*5 flatten). Batch=2.
    x = jax.random.normal(kx, (2, 3, 32, 32), jnp.float32)
    params = init_params(kp)
    prepared = prepare_params(params)      # one-time weight prep, outside jit

    out = jax.block_until_ready(img_clf_net_forward(x, prepared))
    assert out.shape == (2, 10), out.shape

    ref = reference_forward(x, params)
    max_err = float(jnp.max(jnp.abs(out - ref)))
    # The matmul path is effectively bf16-input / f32-accumulate (TPU default
    # precision + bf16 patch storage), so it will not bit-match the HIGHEST-
    # precision reference.
    assert jnp.allclose(out, ref, atol=3e-2, rtol=3e-2), f"max_err={max_err}"

    print("KERNEL_OK")
</pallas_src>

<mosaic_0001>
module attributes {stable_mosaic.version = 11 : i64} {
  func.func @_conv_relu_pool_kernel(%arg0: i32, %arg1: memref<4x75x392xbf16, #tpu.memory_space<vmem>>, %arg2: memref<6x75xbf16, #tpu.memory_space<vmem>>, %arg3: memref<6x1xf32, #tpu.memory_space<vmem>>, %arg4: memref<6x392xf32, #tpu.memory_space<vmem>>) attributes {dimension_semantics = [#tpu.dimension_semantics<parallel>], iteration_bounds = array<i64: 1>, scalar_prefetch = 0 : i64, scratch_operands = 0 : i64, tpu.core_type = #tpu.core_type<tc>, window_params = [{transform_indices = @transform_0, window_bounds = array<i64: 4, 75, 392>}, {pipeline_mode = #tpu.pipeline_mode<synchronous>, transform_indices = @transform_1, window_bounds = array<i64: 6, 75>}, {pipeline_mode = #tpu.pipeline_mode<synchronous>, transform_indices = @transform_2, window_bounds = array<i64: 6, 1>}, {transform_indices = @transform_3, window_bounds = array<i64: 6, 392>}]} {
    %c0 = arith.constant 0 : index
    %c0_0 = arith.constant 0 : index
    %0 = vector.load %arg2[%c0, %c0_0] : memref<6x75xbf16, #tpu.memory_space<vmem>>, vector<6x75xbf16>
    %c0_1 = arith.constant 0 : index
    %c0_2 = arith.constant 0 : index
    %c0_3 = arith.constant 0 : index
    %1 = vector.load %arg1[%c0_1, %c0_2, %c0_3] : memref<4x75x392xbf16, #tpu.memory_space<vmem>>, vector<1x75x392xbf16>
    %2 = vector.shape_cast %1 : vector<1x75x392xbf16> to vector<75x392xbf16>
    %cst = arith.constant dense<0.000000e+00> : vector<6x392xf32>
    %3 = tpu.matmul %0, %2, %cst {dimension_numbers = #tpu.dot_dimension_numbers<[1], [0], [0], [1], [0, 0, 1, 1], [], []>} : vector<6x75xbf16>, vector<75x392xbf16>, vector<6x392xf32> -> vector<6x392xf32>
    %c1 = arith.constant 1 : index
    %c0_4 = arith.constant 0 : index
    %c0_5 = arith.constant 0 : index
    %4 = vector.load %arg1[%c1, %c0_4, %c0_5] : memref<4x75x392xbf16, #tpu.memory_space<vmem>>, vector<1x75x392xbf16>
    %5 = vector.shape_cast %4 : vector<1x75x392xbf16> to vector<75x392xbf16>
    %cst_6 = arith.constant dense<0.000000e+00> : vector<6x392xf32>
    %6 = tpu.matmul %0, %5, %cst_6 {dimension_numbers = #tpu.dot_dimension_numbers<[1], [0], [0], [1], [0, 0, 1, 1], [], []>} : vector<6x75xbf16>, vector<75x392xbf16>, vector<6x392xf32> -> vector<6x392xf32>
    %7 = arith.maximumf %3, %6 : vector<6x392xf32>
    %c2 = arith.constant 2 : index
    %c0_7 = arith.constant 0 : index
    %c0_8 = arith.constant 0 : index
    %8 = vector.load %arg1[%c2, %c0_7, %c0_8] : memref<4x75x392xbf16, #tpu.memory_space<vmem>>, vector<1x75x392xbf16>
    %9 = vector.shape_cast %8 : vector<1x75x392xbf16> to vector<75x392xbf16>
    %cst_9 = arith.constant dense<0.000000e+00> : vector<6x392xf32>
    %10 = tpu.matmul %0, %9, %cst_9 {dimension_numbers = #tpu.dot_dimension_numbers<[1], [0], [0], [1], [0, 0, 1, 1], [], []>} : vector<6x75xbf16>, vector<75x392xbf16>, vector<6x392xf32> -> vector<6x392xf32>
    %11 = arith.maximumf %7, %10 : vector<6x392xf32>
    %c3 = arith.constant 3 : index
    %c0_10 = arith.constant 0 : index
    %c0_11 = arith.constant 0 : index
    %12 = vector.load %arg1[%c3, %c0_10, %c0_11] : memref<4x75x392xbf16, #tpu.memory_space<vmem>>, vector<1x75x392xbf16>
    %13 = vector.shape_cast %12 : vector<1x75x392xbf16> to vector<75x392xbf16>
    %cst_12 = arith.constant dense<0.000000e+00> : vector<6x392xf32>
    %14 = tpu.matmul %0, %13, %cst_12 {dimension_numbers = #tpu.dot_dimension_numbers<[1], [0], [0], [1], [0, 0, 1, 1], [], []>} : vector<6x75xbf16>, vector<75x392xbf16>, vector<6x392xf32> -> vector<6x392xf32>
    %15 = arith.maximumf %11, %14 : vector<6x392xf32>
    %c0_13 = arith.constant 0 : index
    %c0_14 = arith.constant 0 : index
    %16 = vector.load %arg3[%c0_13, %c0_14] : memref<6x1xf32, #tpu.memory_space<vmem>>, vector<6x1xf32>
    %17 = vector.broadcast %16 : vector<6x1xf32> to vector<6x392xf32>
    %18 = arith.addf %15, %17 : vector<6x392xf32>
    %cst_15 = arith.constant 0.000000e+00 : f32
    %19 = vector.broadcast %cst_15 : f32 to vector<6x392xf32>
    %20 = arith.maximumf %18, %19 : vector<6x392xf32>
    %c0_16 = arith.constant 0 : index
    %c0_17 = arith.constant 0 : index
    %21 = vector.load %arg4[%c0_16, %c0_17] : memref<6x392xf32, #tpu.memory_space<vmem>>, vector<6x392xf32>
    tpu.vector_store %arg4[%c0_16, %c0_17], %20 {strides = array<i32>} : memref<6x392xf32, #tpu.memory_space<vmem>>, vector<6x392xf32>,
    return
  }
  func.func @transform_0(%arg0: i32) -> (i32, i32, i32) {
    %c0_i32 = arith.constant 0 : i32
    %c0_i32_0 = arith.constant 0 : i32
    %c0_i32_1 = arith.constant 0 : i32
    return %c0_i32, %c0_i32_0, %arg0 : i32, i32, i32
  }
  func.func @transform_1(%arg0: i32) -> (i32, i32) {
    %c0_i32 = arith.constant 0 : i32
    %c0_i32_0 = arith.constant 0 : i32
    %c0_i32_1 = arith.constant 0 : i32
    return %c0_i32, %c0_i32_0 : i32, i32
  }
  func.func @transform_2(%arg0: i32) -> (i32, i32) {
    %c0_i32 = arith.constant 0 : i32
    %c0_i32_0 = arith.constant 0 : i32
    %c0_i32_1 = arith.constant 0 : i32
    return %c0_i32, %c0_i32_0 : i32, i32
  }
  func.func @transform_3(%arg0: i32) -> (i32, i32) {
    %c0_i32 = arith.constant 0 : i32
    %c0_i32_0 = arith.constant 0 : i32
    return %c0_i32, %arg0 : i32, i32
  }
}

module attributes {stable_mosaic.version = 11 : i64} {
  func.func @_conv2_mlp_kernel(%arg0: i32, %arg1: memref<4x150x50xbf16, #tpu.memory_space<vmem>>, %arg2: memref<25x50x2xf32, #tpu.memory_space<vmem>>, %arg3: memref<16x150xbf16, #tpu.memory_space<vmem>>, %arg4: memref<16x1xf32, #tpu.memory_space<vmem>>, %arg5: memref<120x400xf32, #tpu.memory_space<vmem>>, %arg6: memref<120x1xf32, #tpu.memory_space<vmem>>, %arg7: memref<84x120xf32, #tpu.memory_space<vmem>>, %arg8: memref<84x1xf32, #tpu.memory_space<vmem>>, %arg9: memref<10x84xf32, #tpu.memory_space<vmem>>, %arg10: memref<10x1xf32, #tpu.memory_space<vmem>>, %arg11: memref<10x2xf32, #tpu.memory_space<vmem>>, %arg12: memref<400x2xf32, #tpu.memory_space<vmem>>) attributes {dimension_semantics = [#tpu.dimension_semantics<arbitrary>], iteration_bounds = array<i64: 1>, scalar_prefetch = 0 : i64, scratch_operands = 1 : i64, tpu.core_type = #tpu.core_type<tc>, window_params = [{pipeline_mode = #tpu.pipeline_mode<synchronous>, transform_indices = @transform_0, window_bounds = array<i64: 4, 150, 50>}, {pipeline_mode = #tpu.pipeline_mode<synchronous>, transform_indices = @transform_1, window_bounds = array<i64: 25, 50, 2>}, {pipeline_mode = #tpu.pipeline_mode<synchronous>, transform_indices = @transform_2, window_bounds = array<i64: 16, 150>}, {pipeline_mode = #tpu.pipeline_mode<synchronous>, transform_indices = @transform_3, window_bounds = array<i64: 16, 1>}, {pipeline_mode = #tpu.pipeline_mode<synchronous>, transform_indices = @transform_4, window_bounds = array<i64: 120, 400>}, {pipeline_mode = #tpu.pipeline_mode<synchronous>, transform_indices = @transform_5, window_bounds = array<i64: 120, 1>}, {pipeline_mode = #tpu.pipeline_mode<synchronous>, transform_indices = @transform_6, window_bounds = array<i64: 84, 120>}, {pipeline_mode = #tpu.pipeline_mode<synchronous>, transform_indices = @transform_7, window_bounds = array<i64: 84, 1>}, {pipeline_mode = #tpu.pipeline_mode<synchronous>, transform_indices = @transform_8, window_bounds = array<i64: 10, 84>}, {pipeline_mode = #tpu.pipeline_mode<synchronous>, transform_indices = @transform_9, window_bounds = array<i64: 10, 1>}, {pipeline_mode = #tpu.pipeline_mode<synchronous>, transform_indices = @transform_10, window_bounds = array<i64: 10, 2>}]} {
    %c0 = arith.constant 0 : index
    %c0_0 = arith.constant 0 : index
    %0 = vector.load %arg3[%c0, %c0_0] : memref<16x150xbf16, #tpu.memory_space<vmem>>, vector<16x150xbf16>
    %c0_1 = arith.constant 0 : index
    %c0_2 = arith.constant 0 : index
    %c0_3 = arith.constant 0 : index
    %1 = vector.load %arg1[%c0_1, %c0_2, %c0_3] : memref<4x150x50xbf16, #tpu.memory_space<vmem>>, vector<1x150x50xbf16>
    %2 = vector.shape_cast %1 : vector<1x150x50xbf16> to vector<150x50xbf16>
    %cst = arith.constant dense<0.000000e+00> : vector<16x50xf32>
    %3 = tpu.matmul %0, %2, %cst {dimension_numbers = #tpu.dot_dimension_numbers<[1], [0], [0], [1], [0, 0, 1, 1], [], []>} : vector<16x150xbf16>, vector<150x50xbf16>, vector<16x50xf32> -> vector<16x50xf32>
    %c1 = arith.constant 1 : index
    %c0_4 = arith.constant 0 : index
    %c0_5 = arith.constant 0 : index
    %4 = vector.load %arg1[%c1, %c0_4, %c0_5] : memref<4x150x50xbf16, #tpu.memory_space<vmem>>, vector<1x150x50xbf16>
    %5 = vector.shape_cast %4 : vector<1x150x50xbf16> to vector<150x50xbf16>
    %cst_6 = arith.constant dense<0.000000e+00> : vector<16x50xf32>
    %6 = tpu.matmul %0, %5, %cst_6 {dimension_numbers = #tpu.dot_dimension_numbers<[1], [0], [0], [1], [0, 0, 1, 1], [], []>} : vector<16x150xbf16>, vector<150x50xbf16>, vector<16x50xf32> -> vector<16x50xf32>
    %7 = arith.maximumf %3, %6 : vector<16x50xf32>
    %c2 = arith.constant 2 : index
    %c0_7 = arith.constant 0 : index
    %c0_8 = arith.constant 0 : index
    %8 = vector.load %arg1[%c2, %c0_7, %c0_8] : memref<4x150x50xbf16, #tpu.memory_space<vmem>>, vector<1x150x50xbf16>
    %9 = vector.shape_cast %8 : vector<1x150x50xbf16> to vector<150x50xbf16>
    %cst_9 = arith.constant dense<0.000000e+00> : vector<16x50xf32>
    %10 = tpu.matmul %0, %9, %cst_9 {dimension_numbers = #tpu.dot_dimension_numbers<[1], [0], [0], [1], [0, 0, 1, 1], [], []>} : vector<16x150xbf16>, vector<150x50xbf16>, vector<16x50xf32> -> vector<16x50xf32>
    %11 = arith.maximumf %7, %10 : vector<16x50xf32>
    %c3 = arith.constant 3 : index
    %c0_10 = arith.constant 0 : index
    %c0_11 = arith.constant 0 : index
    %12 = vector.load %arg1[%c3, %c0_10, %c0_11] : memref<4x150x50xbf16, #tpu.memory_space<vmem>>, vector<1x150x50xbf16>
    %13 = vector.shape_cast %12 : vector<1x150x50xbf16> to vector<150x50xbf16>
    %cst_12 = arith.constant dense<0.000000e+00> : vector<16x50xf32>
    %14 = tpu.matmul %0, %13, %cst_12 {dimension_numbers = #tpu.dot_dimension_numbers<[1], [0], [0], [1], [0, 0, 1, 1], [], []>} : vector<16x150xbf16>, vector<150x50xbf16>, vector<16x50xf32> -> vector<16x50xf32>
    %15 = arith.maximumf %11, %14 : vector<16x50xf32>
    %c0_13 = arith.constant 0 : index
    %c0_14 = arith.constant 0 : index
    %16 = vector.load %arg4[%c0_13, %c0_14] : memref<16x1xf32, #tpu.memory_space<vmem>>, vector<16x1xf32>
    %17 = vector.broadcast %16 : vector<16x1xf32> to vector<16x50xf32>
    %18 = arith.addf %15, %17 : vector<16x50xf32>
    %cst_15 = arith.constant 0.000000e+00 : f32
    %19 = vector.broadcast %cst_15 : f32 to vector<16x50xf32>
    %20 = arith.maximumf %18, %19 : vector<16x50xf32>
    %c0_16 = arith.constant 0 : index
    %c0_17 = arith.constant 0 : index
    %c0_18 = arith.constant 0 : index
    %21 = vector.load %arg2[%c0_16, %c0_17, %c0_18] : memref<25x50x2xf32, #tpu.memory_space<vmem>>, vector<1x50x2xf32>
    %22 = vector.shape_cast %21 : vector<1x50x2xf32> to vector<50x2xf32>
    %cst_19 = arith.constant dense<0.000000e+00> : vector<16x2xf32>
    %23 = tpu.matmul %20, %22, %cst_19 {dimension_numbers = #tpu.dot_dimension_numbers<[1], [0], [0], [1], [0, 0, 1, 1], [], []>} : vector<16x50xf32>, vector<50x2xf32>, vector<16x2xf32> -> vector<16x2xf32>
    %c0_20 = arith.constant 0 : index
    %c0_21 = arith.constant 0 : index
    %24 = vector.load %arg12[%c0_20, %c0_21] : memref<400x2xf32, #tpu.memory_space<vmem>>, vector<16x2xf32>
    tpu.vector_store %arg12[%c0_20, %c0_21], %23 {strides = array<i32>} : memref<400x2xf32, #tpu.memory_space<vmem>>, vector<16x2xf32>,
    %c1_22 = arith.constant 1 : index
    %c0_23 = arith.constant 0 : index
    %c0_24 = arith.constant 0 : index
    %25 = vector.load %arg2[%c1_22, %c0_23, %c0_24] : memref<25x50x2xf32, #tpu.memory_space<vmem>>, vector<1x50x2xf32>
    %26 = vector.shape_cast %25 : vector<1x50x2xf32> to vector<50x2xf32>
    %cst_25 = arith.constant dense<0.000000e+00> : vector<16x2xf32>
    %27 = tpu.matmul %20, %26, %cst_25 {dimension_numbers = #tpu.dot_dimension_numbers<[1], [0], [0], [1], [0, 0, 1, 1], [], []>} : vector<16x50xf32>, vector<50x2xf32>, vector<16x2xf32> -> vector<16x2xf32>
    %c16 = arith.constant 16 : index
    %c0_26 = arith.constant 0 : index
    %28 = vector.load %arg12[%c16, %c0_26] : memref<400x2xf32, #tpu.memory_space<vmem>>, vector<16x2xf32>
    tpu.vector_store %arg12[%c16, %c0_26], %27 {strides = array<i32>} : memref<400x2xf32, #tpu.memory_space<vmem>>, vector<16x2xf32>,
    %c2_27 = arith.constant 2 : index
    %c0_28 = arith.constant 0 : index
    %c0_29 = arith.constant 0 : index
    %29 = vector.load %arg2[%c2_27, %c0_28, %c0_29] : memref<25x50x2xf32, #tpu.memory_space<vmem>>, vector<1x50x2xf32>
    %30 = vector.shape_cast %29 : vector<1x50x2xf32> to vector<50x2xf32>
    %cst_30 = arith.constant dense<0.000000e+00> : vector<16x2xf32>
    %31 = tpu.matmul %20, %30, %cst_30 {dimension_numbers = #tpu.dot_dimension_numbers<[1], [0], [0], [1], [0, 0, 1, 1], [], []>} : vector<16x50xf32>, vector<50x2xf32>, vector<16x2xf32> -> vector<16x2xf32>
    %c32 = arith.constant 32 : index
    %c0_31 = arith.constant 0 : index
    %32 = vector.load %arg12[%c32, %c0_31] : memref<400x2xf32, #tpu.memory_space<vmem>>, vector<16x2xf32>
    tpu.vector_store %arg12[%c32, %c0_31], %31 {strides = array<i32>} : memref<400x2xf32, #tpu.memory_space<vmem>>, vector<16x2xf32>,
    %c3_32 = arith.constant 3 : index
    %c0_33 = arith.constant 0 : index
    %c0_34 = arith.constant 0 : index
    %33 = vector.load %arg2[%c3_32, %c0_33, %c0_34] : memref<25x50x2xf32, #tpu.memory_space<vmem>>, vector<1x50x2xf32>
    %34 = vector.shape_cast %33 : vector<1x50x2xf32> to vector<50x2xf32>
    %cst_35 = arith.constant dense<0.000000e+00> : vector<16x2xf32>
    %35 = tpu.matmul %20, %34, %cst_35 {dimension_numbers = #tpu.dot_dimension_numbers<[1], [0], [0], [1], [0, 0, 1, 1], [], []>} : vector<16x50xf32>, vector<50x2xf32>, vector<16x2xf32> -> vector<16x2xf32>
    %c48 = arith.constant 48 : index
    %c0_36 = arith.constant 0 : index
    %36 = vector.load %arg12[%c48, %c0_36] : memref<400x2xf32, #tpu.memory_space<vmem>>, vector<16x2xf32>
    tpu.vector_store %arg12[%c48, %c0_36], %35 {strides = array<i32>} : memref<400x2xf32, #tpu.memory_space<vmem>>, vector<16x2xf32>,
    %c4 = arith.constant 4 : index
    %c0_37 = arith.constant 0 : index
    %c0_38 = arith.constant 0 : index
    %37 = vector.load %arg2[%c4, %c0_37, %c0_38] : memref<25x50x2xf32, #tpu.memory_space<vmem>>, vector<1x50x2xf32>
    %38 = vector.shape_cast %37 : vector<1x50x2xf32> to vector<50x2xf32>
    %cst_39 = arith.constant dense<0.000000e+00> : vector<16x2xf32>
    %39 = tpu.matmul %20, %38, %cst_39 {dimension_numbers = #tpu.dot_dimension_numbers<[1], [0], [0], [1], [0, 0, 1, 1], [], []>} : vector<16x50xf32>, vector<50x2xf32>, vector<16x2xf32> -> vector<16x2xf32>
    %c64 = arith.constant 64 : index
    %c0_40 = arith.constant 0 : index
    %40 = vector.load %arg12[%c64, %c0_40] : memref<400x2xf32, #tpu.memory_space<vmem>>, vector<16x2xf32>
    tpu.vector_store %arg12[%c64, %c0_40], %39 {strides = array<i32>} : memref<400x2xf32, #tpu.memory_space<vmem>>, vector<16x2xf32>,
    %c5 = arith.constant 5 : index
    %c0_41 = arith.constant 0 : index
    %c0_42 = arith.constant 0 : index
    %41 = vector.load %arg2[%c5, %c0_41, %c0_42] : memref<25x50x2xf32, #tpu.memory_space<vmem>>, vector<1x50x2xf32>
    %42 = vector.shape_cast %41 : vector<1x50x2xf32> to vector<50x2xf32>
    %cst_43 = arith.constant dense<0.000000e+00> : vector<16x2xf32>
    %43 = tpu.matmul %20, %42, %cst_43 {dimension_numbers = #tpu.dot_dimension_numbers<[1], [0], [0], [1], [0, 0, 1, 1], [], []>} : vector<16x50xf32>, vector<50x2xf32>, vector<16x2xf32> -> vector<16x2xf32>
    %c80 = arith.constant 80 : index
    %c0_44 = arith.constant 0 : index
    %44 = vector.load %arg12[%c80, %c0_44] : memref<400x2xf32, #tpu.memory_space<vmem>>, vector<16x2xf32>
    tpu.vector_store %arg12[%c80, %c0_44], %43 {strides = array<i32>} : memref<400x2xf32, #tpu.memory_space<vmem>>, vector<16x2xf32>,
    %c6 = arith.constant 6 : index
    %c0_45 = arith.constant 0 : index
    %c0_46 = arith.constant 0 : index
    %45 = vector.load %arg2[%c6, %c0_45, %c0_46] : memref<25x50x2xf32, #tpu.memory_space<vmem>>, vector<1x50x2xf32>
    %46 = vector.shape_cast %45 : vector<1x50x2xf32> to vector<50x2xf32>
    %cst_47 = arith.constant dense<0.000000e+00> : vector<16x2xf32>
    %47 = tpu.matmul %20, %46, %cst_47 {dimension_numbers = #tpu.dot_dimension_numbers<[1], [0], [0], [1], [0, 0, 1, 1], [], []>} : vector<16x50xf32>, vector<50x2xf32>, vector<16x2xf32> -> vector<16x2xf32>
    %c96 = arith.constant 96 : index
    %c0_48 = arith.constant 0 : index
    %48 = vector.load %arg12[%c96, %c0_48] : memref<400x2xf32, #tpu.memory_space<vmem>>, vector<16x2xf32>
    tpu.vector_store %arg12[%c96, %c0_48], %47 {strides = array<i32>} : memref<400x2xf32, #tpu.memory_space<vmem>>, vector<16x2xf32>,
    %c7 = arith.constant 7 : index
    %c0_49 = arith.constant 0 : index
    %c0_50 = arith.constant 0 : index
    %49 = vector.load %arg2[%c7, %c0_49, %c0_50] : memref<25x50x2xf32, #tpu.memory_space<vmem>>, vector<1x50x2xf32>
    %50 = vector.shape_cast %49 : vector<1x50x2xf32> to vector<50x2xf32>
    %cst_51 = arith.constant dense<0.000000e+00> : vector<16x2xf32>
    %51 = tpu.matmul %20, %50, %cst_51 {dimension_numbers = #tpu.dot_dimension_numbers<[1], [0], [0], [1], [0, 0, 1, 1], [], []>} : vector<16x50xf32>, vector<50x2xf32>, vector<16x2xf32> -> vector<16x2xf32>
    %c112 = arith.constant 112 : index
    %c0_52 = arith.constant 0 : index
    %52 = vector.load %arg12[%c112, %c0_52] : memref<400x2xf32, #tpu.memory_space<vmem>>, vector<16x2xf32>
    tpu.vector_store %arg12[%c112, %c0_52], %51 {strides = array<i32>} : memref<400x2xf32, #tpu.memory_space<vmem>>, vector<16x2xf32>,
    %c8 = arith.constant 8 : index
    %c0_53 = arith.constant 0 : index
    %c0_54 = arith.constant 0 : index
    %53 = vector.load %arg2[%c8, %c0_53, %c0_54] : memref<25x50x2xf32, #tpu.memory_space<vmem>>, vector<1x50x2xf32>
    %54 = vector.shape_cast %53 : vector<1x50x2xf32> to vector<50x2xf32>
    %cst_55 = arith.constant dense<0.000000e+00> : vector<16x2xf32>
    %55 = tpu.matmul %20, %54, %cst_55 {dimension_numbers = #tpu.dot_dimension_numbers<[1], [0], [0], [1], [0, 0, 1, 1], [], []>} : vector<16x50xf32>, vector<50x2xf32>, vector<16x2xf32> -> vector<16x2xf32>
    %c128 = arith.constant 128 : index
    %c0_56 = arith.constant 0 : index
    %56 = vector.load %arg12[%c128, %c0_56] : memref<400x2xf32, #tpu.memory_space<vmem>>, vector<16x2xf32>
    tpu.vector_store %arg12[%c128, %c0_56], %55 {strides = array<i32>} : memref<400x2xf32, #tpu.memory_space<vmem>>, vector<16x2xf32>,
    %c9 = arith.constant 9 : index
    %c0_57 = arith.constant 0 : index
    %c0_58 = arith.constant 0 : index
    %57 = vector.load %arg2[%c9, %c0_57, %c0_58] : memref<25x50x2xf32, #tpu.memory_space<vmem>>, vector<1x50x2xf32>
    %58 = vector.shape_cast %57 : vector<1x50x2xf32> to vector<50x2xf32>
    %cst_59 = arith.constant dense<0.000000e+00> : vector<16x2xf32>
    %59 = tpu.matmul %20, %58, %cst_59 {dimension_numbers = #tpu.dot_dimension_numbers<[1], [0], [0], [1], [0, 0, 1, 1], [], []>} : vector<16x50xf32>, vector<50x2xf32>, vector<16x2xf32> -> vector<16x2xf32>
    %c144 = arith.constant 144 : index
    %c0_60 = arith.constant 0 : index
    %60 = vector.load %arg12[%c144, %c0_60] : memref<400x2xf32, #tpu.memory_space<vmem>>, vector<16x2xf32>
    tpu.vector_store %arg12[%c144, %c0_60], %59 {strides = array<i32>} : memref<400x2xf32, #tpu.memory_space<vmem>>, vector<16x2xf32>,
    %c10 = arith.constant 10 : index
    %c0_61 = arith.constant 0 : index
    %c0_62 = arith.constant 0 : index
    %61 = vector.load %arg2[%c10, %c0_61, %c0_62] : memref<25x50x2xf32, #tpu.memory_space<vmem>>, vector<1x50x2xf32>
    %62 = vector.shape_cast %61 : vector<1x50x2xf32> to vector<50x2xf32>
    %cst_63 = arith.constant dense<0.000000e+00> : vector<16x2xf32>
    %63 = tpu.matmul %20, %62, %cst_63 {dimension_numbers = #tpu.dot_dimension_numbers<[1], [0], [0], [1], [0, 0, 1, 1], [], []>} : vector<16x50xf32>, vector<50x2xf32>, vector<16x2xf32> -> vector<16x2xf32>
    %c160 = arith.constant 160 : index
    %c0_64 = arith.constant 0 : index
    %64 = vector.load %arg12[%c160, %c0_64] : memref<400x2xf32, #tpu.memory_space<vmem>>, vector<16x2xf32>
    tpu.vector_store %arg12[%c160, %c0_64], %63 {strides = array<i32>} : memref<400x2xf32, #tpu.memory_space<vmem>>, vector<16x2xf32>,
    %c11 = arith.constant 11 : index
    %c0_65 = arith.constant 0 : index
    %c0_66 = arith.constant 0 : index
    %65 = vector.load %arg2[%c11, %c0_65, %c0_66] : memref<25x50x2xf32, #tpu.memory_space<vmem>>, vector<1x50x2xf32>
    %66 = vector.shape_cast %65 : vector<1x50x2xf32> to vector<50x2xf32>
    %cst_67 = arith.constant dense<0.000000e+00> : vector<16x2xf32>
    %67 = tpu.matmul %20, %66, %cst_67 {dimension_numbers = #tpu.dot_dimension_numbers<[1], [0], [0], [1], [0, 0, 1, 1], [], []>} : vector<16x50xf32>, vector<50x2xf32>, vector<16x2xf32> -> vector<16x2xf32>
    %c176 = arith.constant 176 : index
    %c0_68 = arith.constant 0 : index
    %68 = vector.load %arg12[%c176, %c0_68] : memref<400x2xf32, #tpu.memory_space<vmem>>, vector<16x2xf32>
    tpu.vector_store %arg12[%c176, %c0_68], %67 {strides = array<i32>} : memref<400x2xf32, #tpu.memory_space<vmem>>, vector<16x2xf32>,
    %c12 = arith.constant 12 : index
    %c0_69 = arith.constant 0 : index
    %c0_70 = arith.constant 0 : index
    %69 = vector.load %arg2[%c12, %c0_69, %c0_70] : memref<25x50x2xf32, #tpu.memory_space<vmem>>, vector<1x50x2xf32>
    %70 = vector.shape_cast %69 : vector<1x50x2xf32> to vector<50x2xf32>
    %cst_71 = arith.constant dense<0.000000e+00> : vector<16x2xf32>
    %71 = tpu.matmul %20, %70, %cst_71 {dimension_numbers = #tpu.dot_dimension_numbers<[1], [0], [0], [1], [0, 0, 1, 1], [], []>} : vector<16x50xf32>, vector<50x2xf32>, vector<16x2xf32> -> vector<16x2xf32>
    %c192 = arith.constant 192 : index
    %c0_72 = arith.constant 0 : index
    %72 = vector.load %arg12[%c192, %c0_72] : memref<400x2xf32, #tpu.memory_space<vmem>>, vector<16x2xf32>
    tpu.vector_store %arg12[%c192, %c0_72], %71 {strides = array<i32>} : memref<400x2xf32, #tpu.memory_space<vmem>>, vector<16x2xf32>,
    %c13 = arith.constant 13 : index
    %c0_73 = arith.constant 0 : index
    %c0_74 = arith.constant 0 : index
    %73 = vector.load %arg2[%c13, %c0_73, %c0_74] : memref<25x50x2xf32, #tpu.memory_space<vmem>>, vector<1x50x2xf32>
    %74 = vector.shape_cast %73 : vector<1x50x2xf32> to vector<50x2xf32>
    %cst_75 = arith.constant dense<0.000000e+00> : vector<16x2xf32>
    %75 = tpu.matmul %20, %74, %cst_75 {dimension_numbers = #tpu.dot_dimension_numbers<[1], [0], [0], [1], [0, 0, 1, 1], [], []>} : vector<16x50xf32>, vector<50x2xf32>, vector<16x2xf32> -> vector<16x2xf32>
    %c208 = arith.constant 208 : index
    %c0_76 = arith.constant 0 : index
    %76 = vector.load %arg12[%c208, %c0_76] : memref<400x2xf32, #tpu.memory_space<vmem>>, vector<16x2xf32>
    tpu.vector_store %arg12[%c208, %c0_76], %75 {strides = array<i32>} : memref<400x2xf32, #tpu.memory_space<vmem>>, vector<16x2xf32>,
    %c14 = arith.constant 14 : index
    %c0_77 = arith.constant 0 : index
    %c0_78 = arith.constant 0 : index
    %77 = vector.load %arg2[%c14, %c0_77, %c0_78] : memref<25x50x2xf32, #tpu.memory_space<vmem>>, vector<1x50x2xf32>
    %78 = vector.shape_cast %77 : vector<1x50x2xf32> to vector<50x2xf32>
    %cst_79 = arith.constant dense<0.000000e+00> : vector<16x2xf32>
    %79 = tpu.matmul %20, %78, %cst_79 {dimension_numbers = #tpu.dot_dimension_numbers<[1], [0], [0], [1], [0, 0, 1, 1], [], []>} : vector<16x50xf32>, vector<50x2xf32>, vector<16x2xf32> -> vector<16x2xf32>
    %c224 = arith.constant 224 : index
    %c0_80 = arith.constant 0 : index
    %80 = vector.load %arg12[%c224, %c0_80] : memref<400x2xf32, #tpu.memory_space<vmem>>, vector<16x2xf32>
    tpu.vector_store %arg12[%c224, %c0_80], %79 {strides = array<i32>} : memref<400x2xf32, #tpu.memory_space<vmem>>, vector<16x2xf32>,
    %c15 = arith.constant 15 : index
    %c0_81 = arith.constant 0 : index
    %c0_82 = arith.constant 0 : index
    %81 = vector.load %arg2[%c15, %c0_81, %c0_82] : memref<25x50x2xf32, #tpu.memory_space<vmem>>, vector<1x50x2xf32>
    %82 = vector.shape_cast %81 : vector<1x50x2xf32> to vector<50x2xf32>
    %cst_83 = arith.constant dense<0.000000e+00> : vector<16x2xf32>
    %83 = tpu.matmul %20, %82, %cst_83 {dimension_numbers = #tpu.dot_dimension_numbers<[1], [0], [0], [1], [0, 0, 1, 1], [], []>} : vector<16x50xf32>, vector<50x2xf32>, vector<16x2xf32> -> vector<16x2xf32>
    %c240 = arith.constant 240 : index
    %c0_84 = arith.constant 0 : index
    %84 = vector.load %arg12[%c240, %c0_84] : memref<400x2xf32, #tpu.memory_space<vmem>>, vector<16x2xf32>
    tpu.vector_store %arg12[%c240, %c0_84], %83 {strides = array<i32>} : memref<400x2xf32, #tpu.memory_space<vmem>>, vector<16x2xf32>,
    %c16_85 = arith.constant 16 : index
    %c0_86 = arith.constant 0 : index
    %c0_87 = arith.constant 0 : index
    %85 = vector.load %arg2[%c16_85, %c0_86, %c0_87] : memref<25x50x2xf32, #tpu.memory_space<vmem>>, vector<1x50x2xf32>
    %86 = vector.shape_cast %85 : vector<1x50x2xf32> to vector<50x2xf32>
    %cst_88 = arith.constant dense<0.000000e+00> : vector<16x2xf32>
    %87 = tpu.matmul %20, %86, %cst_88 {dimension_numbers = #tpu.dot_dimension_numbers<[1], [0], [0], [1], [0, 0, 1, 1], [], []>} : vector<16x50xf32>, vector<50x2xf32>, vector<16x2xf32> -> vector<16x2xf32>
    %c256 = arith.constant 256 : index
    %c0_89 = arith.constant 0 : index
    %88 = vector.load %arg12[%c256, %c0_89] : memref<400x2xf32, #tpu.memory_space<vmem>>, vector<16x2xf32>
    tpu.vector_store %arg12[%c256, %c0_89], %87 {strides = array<i32>} : memref<400x2xf32, #tpu.memory_space<vmem>>, vector<16x2xf32>,
    %c17 = arith.constant 17 : index
    %c0_90 = arith.constant 0 : index
    %c0_91 = arith.constant 0 : index
    %89 = vector.load %arg2[%c17, %c0_90, %c0_91] : memref<25x50x2xf32, #tpu.memory_space<vmem>>, vector<1x50x2xf32>
    %90 = vector.shape_cast %89 : vector<1x50x2xf32> to vector<50x2xf32>
    %cst_92 = arith.constant dense<0.000000e+00> : vector<16x2xf32>
    %91 = tpu.matmul %20, %90, %cst_92 {dimension_numbers = #tpu.dot_dimension_numbers<[1], [0], [0], [1], [0, 0, 1, 1], [], []>} : vector<16x50xf32>, vector<50x2xf32>, vector<16x2xf32> -> vector<16x2xf32>
    %c272 = arith.constant 272 : index
    %c0_93 = arith.constant 0 : index
    %92 = vector.load %arg12[%c272, %c0_93] : memref<400x2xf32, #tpu.memory_space<vmem>>, vector<16x2xf32>
    tpu.vector_store %arg12[%c272, %c0_93], %91 {strides = array<i32>} : memref<400x2xf32, #tpu.memory_space<vmem>>, vector<16x2xf32>,
    %c18 = arith.constant 18 : index
    %c0_94 = arith.constant 0 : index
    %c0_95 = arith.constant 0 : index
    %93 = vector.load %arg2[%c18, %c0_94, %c0_95] : memref<25x50x2xf32, #tpu.memory_space<vmem>>, vector<1x50x2xf32>
    %94 = vector.shape_cast %93 : vector<1x50x2xf32> to vector<50x2xf32>
    %cst_96 = arith.constant dense<0.000000e+00> : vector<16x2xf32>
    %95 = tpu.matmul %20, %94, %cst_96 {dimension_numbers = #tpu.dot_dimension_numbers<[1], [0], [0], [1], [0, 0, 1, 1], [], []>} : vector<16x50xf32>, vector<50x2xf32>, vector<16x2xf32> -> vector<16x2xf32>
    %c288 = arith.constant 288 : index
    %c0_97 = arith.constant 0 : index
    %96 = vector.load %arg12[%c288, %c0_97] : memref<400x2xf32, #tpu.memory_space<vmem>>, vector<16x2xf32>
    tpu.vector_store %arg12[%c288, %c0_97], %95 {strides = array<i32>} : memref<400x2xf32, #tpu.memory_space<vmem>>, vector<16x2xf32>,
    %c19 = arith.constant 19 : index
    %c0_98 = arith.constant 0 : index
    %c0_99 = arith.constant 0 : index
    %97 = vector.load %arg2[%c19, %c0_98, %c0_99] : memref<25x50x2xf32, #tpu.memory_space<vmem>>, vector<1x50x2xf32>
    %98 = vector.shape_cast %97 : vector<1x50x2xf32> to vector<50x2xf32>
    %cst_100 = arith.constant dense<0.000000e+00> : vector<16x2xf32>
    %99 = tpu.matmul %20, %98, %cst_100 {dimension_numbers = #tpu.dot_dimension_numbers<[1], [0], [0], [1], [0, 0, 1, 1], [], []>} : vector<16x50xf32>, vector<50x2xf32>, vector<16x2xf32> -> vector<16x2xf32>
    %c304 = arith.constant 304 : index
    %c0_101 = arith.constant 0 : index
    %100 = vector.load %arg12[%c304, %c0_101] : memref<400x2xf32, #tpu.memory_space<vmem>>, vector<16x2xf32>
    tpu.vector_store %arg12[%c304, %c0_101], %99 {strides = array<i32>} : memref<400x2xf32, #tpu.memory_space<vmem>>, vector<16x2xf32>,
    %c20 = arith.constant 20 : index
    %c0_102 = arith.constant 0 : index
    %c0_103 = arith.constant 0 : index
    %101 = vector.load %arg2[%c20, %c0_102, %c0_103] : memref<25x50x2xf32, #tpu.memory_space<vmem>>, vector<1x50x2xf32>
    %102 = vector.shape_cast %101 : vector<1x50x2xf32> to vector<50x2xf32>
    %cst_104 = arith.constant dense<0.000000e+00> : vector<16x2xf32>
    %103 = tpu.matmul %20, %102, %cst_104 {dimension_numbers = #tpu.dot_dimension_numbers<[1], [0], [0], [1], [0, 0, 1, 1], [], []>} : vector<16x50xf32>, vector<50x2xf32>, vector<16x2xf32> -> vector<16x2xf32>
    %c320 = arith.constant 320 : index
    %c0_105 = arith.constant 0 : index
    %104 = vector.load %arg12[%c320, %c0_105] : memref<400x2xf32, #tpu.memory_space<vmem>>, vector<16x2xf32>
    tpu.vector_store %arg12[%c320, %c0_105], %103 {strides = array<i32>} : memref<400x2xf32, #tpu.memory_space<vmem>>, vector<16x2xf32>,
    %c21 = arith.constant 21 : index
    %c0_106 = arith.constant 0 : index
    %c0_107 = arith.constant 0 : index
    %105 = vector.load %arg2[%c21, %c0_106, %c0_107] : memref<25x50x2xf32, #tpu.memory_space<vmem>>, vector<1x50x2xf32>
    %106 = vector.shape_cast %105 : vector<1x50x2xf32> to vector<50x2xf32>
    %cst_108 = arith.constant dense<0.000000e+00> : vector<16x2xf32>
    %107 = tpu.matmul %20, %106, %cst_108 {dimension_numbers = #tpu.dot_dimension_numbers<[1], [0], [0], [1], [0, 0, 1, 1], [], []>} : vector<16x50xf32>, vector<50x2xf32>, vector<16x2xf32> -> vector<16x2xf32>
    %c336 = arith.constant 336 : index
    %c0_109 = arith.constant 0 : index
    %108 = vector.load %arg12[%c336, %c0_109] : memref<400x2xf32, #tpu.memory_space<vmem>>, vector<16x2xf32>
    tpu.vector_store %arg12[%c336, %c0_109], %107 {strides = array<i32>} : memref<400x2xf32, #tpu.memory_space<vmem>>, vector<16x2xf32>,
    %c22 = arith.constant 22 : index
    %c0_110 = arith.constant 0 : index
    %c0_111 = arith.constant 0 : index
    %109 = vector.load %arg2[%c22, %c0_110, %c0_111] : memref<25x50x2xf32, #tpu.memory_space<vmem>>, vector<1x50x2xf32>
    %110 = vector.shape_cast %109 : vector<1x50x2xf32> to vector<50x2xf32>
    %cst_112 = arith.constant dense<0.000000e+00> : vector<16x2xf32>
    %111 = tpu.matmul %20, %110, %cst_112 {dimension_numbers = #tpu.dot_dimension_numbers<[1], [0], [0], [1], [0, 0, 1, 1], [], []>} : vector<16x50xf32>, vector<50x2xf32>, vector<16x2xf32> -> vector<16x2xf32>
    %c352 = arith.constant 352 : index
    %c0_113 = arith.constant 0 : index
    %112 = vector.load %arg12[%c352, %c0_113] : memref<400x2xf32, #tpu.memory_space<vmem>>, vector<16x2xf32>
    tpu.vector_store %arg12[%c352, %c0_113], %111 {strides = array<i32>} : memref<400x2xf32, #tpu.memory_space<vmem>>, vector<16x2xf32>,
    %c23 = arith.constant 23 : index
    %c0_114 = arith.constant 0 : index
    %c0_115 = arith.constant 0 : index
    %113 = vector.load %arg2[%c23, %c0_114, %c0_115] : memref<25x50x2xf32, #tpu.memory_space<vmem>>, vector<1x50x2xf32>
    %114 = vector.shape_cast %113 : vector<1x50x2xf32> to vector<50x2xf32>
    %cst_116 = arith.constant dense<0.000000e+00> : vector<16x2xf32>
    %115 = tpu.matmul %20, %114, %cst_116 {dimension_numbers = #tpu.dot_dimension_numbers<[1], [0], [0], [1], [0, 0, 1, 1], [], []>} : vector<16x50xf32>, vector<50x2xf32>, vector<16x2xf32> -> vector<16x2xf32>
    %c368 = arith.constant 368 : index
    %c0_117 = arith.constant 0 : index
    %116 = vector.load %arg12[%c368, %c0_117] : memref<400x2xf32, #tpu.memory_space<vmem>>, vector<16x2xf32>
    tpu.vector_store %arg12[%c368, %c0_117], %115 {strides = array<i32>} : memref<400x2xf32, #tpu.memory_space<vmem>>, vector<16x2xf32>,
    %c24 = arith.constant 24 : index
    %c0_118 = arith.constant 0 : index
    %c0_119 = arith.constant 0 : index
    %117 = vector.load %arg2[%c24, %c0_118, %c0_119] : memref<25x50x2xf32, #tpu.memory_space<vmem>>, vector<1x50x2xf32>
    %118 = vector.shape_cast %117 : vector<1x50x2xf32> to vector<50x2xf32>
    %cst_120 = arith.constant dense<0.000000e+00> : vector<16x2xf32>
    %119 = tpu.matmul %20, %118, %cst_120 {dimension_numbers = #tpu.dot_dimension_numbers<[1], [0], [0], [1], [0, 0, 1, 1], [], []>} : vector<16x50xf32>, vector<50x2xf32>, vector<16x2xf32> -> vector<16x2xf32>
    %c384 = arith.constant 384 : index
    %c0_121 = arith.constant 0 : index
    %120 = vector.load %arg12[%c384, %c0_121] : memref<400x2xf32, #tpu.memory_space<vmem>>, vector<16x2xf32>
    tpu.vector_store %arg12[%c384, %c0_121], %119 {strides = array<i32>} : memref<400x2xf32, #tpu.memory_space<vmem>>, vector<16x2xf32>,
    %c0_122 = arith.constant 0 : index
    %c0_123 = arith.constant 0 : index
    %121 = vector.load %arg12[%c0_122, %c0_123] : memref<400x2xf32, #tpu.memory_space<vmem>>, vector<400x2xf32>
    %c0_124 = arith.constant 0 : index
    %c0_125 = arith.constant 0 : index
    %122 = vector.load %arg5[%c0_124, %c0_125] : memref<120x400xf32, #tpu.memory_space<vmem>>, vector<120x400xf32>
    %cst_126 = arith.constant dense<0.000000e+00> : vector<120x2xf32>
    %123 = tpu.matmul %122, %121, %cst_126 {dimension_numbers = #tpu.dot_dimension_numbers<[1], [0], [0], [1], [0, 0, 1, 1], [], []>} : vector<120x400xf32>, vector<400x2xf32>, vector<120x2xf32> -> vector<120x2xf32>
    %c0_127 = arith.constant 0 : index
    %c0_128 = arith.constant 0 : index
    %124 = vector.load %arg6[%c0_127, %c0_128] : memref<120x1xf32, #tpu.memory_space<vmem>>, vector<120x1xf32>
    %125 = vector.broadcast %124 : vector<120x1xf32> to vector<120x2xf32>
    %126 = arith.addf %123, %125 : vector<120x2xf32>
    %cst_129 = arith.constant 0.000000e+00 : f32
    %127 = vector.broadcast %cst_129 : f32 to vector<120x2xf32>
    %128 = arith.maximumf %126, %127 : vector<120x2xf32>
    %c0_130 = arith.constant 0 : index
    %c0_131 = arith.constant 0 : index
    %129 = vector.load %arg7[%c0_130, %c0_131] : memref<84x120xf32, #tpu.memory_space<vmem>>, vector<84x120xf32>
    %cst_132 = arith.constant dense<0.000000e+00> : vector<84x2xf32>
    %130 = tpu.matmul %129, %128, %cst_132 {dimension_numbers = #tpu.dot_dimension_numbers<[1], [0], [0], [1], [0, 0, 1, 1], [], []>} : vector<84x120xf32>, vector<120x2xf32>, vector<84x2xf32> -> vector<84x2xf32>
    %c0_133 = arith.constant 0 : index
    %c0_134 = arith.constant 0 : index
    %131 = vector.load %arg8[%c0_133, %c0_134] : memref<84x1xf32, #tpu.memory_space<vmem>>, vector<84x1xf32>
    %132 = vector.broadcast %131 : vector<84x1xf32> to vector<84x2xf32>
    %133 = arith.addf %130, %132 : vector<84x2xf32>
    %cst_135 = arith.constant 0.000000e+00 : f32
    %134 = vector.broadcast %cst_135 : f32 to vector<84x2xf32>
    %135 = arith.maximumf %133, %134 : vector<84x2xf32>
    %c0_136 = arith.constant 0 : index
    %c0_137 = arith.constant 0 : index
    %136 = vector.load %arg9[%c0_136, %c0_137] : memref<10x84xf32, #tpu.memory_space<vmem>>, vector<10x84xf32>
    %cst_138 = arith.constant dense<0.000000e+00> : vector<10x2xf32>
    %137 = tpu.matmul %136, %135, %cst_138 {dimension_numbers = #tpu.dot_dimension_numbers<[1], [0], [0], [1], [0, 0, 1, 1], [], []>} : vector<10x84xf32>, vector<84x2xf32>, vector<10x2xf32> -> vector<10x2xf32>
    %c0_139 = arith.constant 0 : index
    %c0_140 = arith.constant 0 : index
    %138 = vector.load %arg10[%c0_139, %c0_140] : memref<10x1xf32, #tpu.memory_space<vmem>>, vector<10x1xf32>
    %139 = vector.broadcast %138 : vector<10x1xf32> to vector<10x2xf32>
    %140 = arith.addf %137, %139 : vector<10x2xf32>
    %c0_141 = arith.constant 0 : index
    %c0_142 = arith.constant 0 : index
    %141 = vector.load %arg11[%c0_141, %c0_142] : memref<10x2xf32, #tpu.memory_space<vmem>>, vector<10x2xf32>
    tpu.vector_store %arg11[%c0_141, %c0_142], %140 {strides = array<i32>} : memref<10x2xf32, #tpu.memory_space<vmem>>, vector<10x2xf32>,
    return
  }
  func.func @transform_0(%arg0: i32) -> (i32, i32, i32) {
    %c0_i32 = arith.constant 0 : i32
    %c0_i32_0 = arith.constant 0 : i32
    %c0_i32_1 = arith.constant 0 : i32
    %c0_i32_2 = arith.constant 0 : i32
    return %c0_i32, %c0_i32_0, %c0_i32_1 : i32, i32, i32
  }
  func.func @transform_1(%arg0: i32) -> (i32, i32, i32) {
    %c0_i32 = arith.constant 0 : i32
    %c0_i32_0 = arith.constant 0 : i32
    %c0_i32_1 = arith.constant 0 : i32
    %c0_i32_2 = arith.constant 0 : i32
    return %c0_i32, %c0_i32_0, %c0_i32_1 : i32, i32, i32
  }
  func.func @transform_2(%arg0: i32) -> (i32, i32) {
    %c0_i32 = arith.constant 0 : i32
    %c0_i32_0 = arith.constant 0 : i32
    %c0_i32_1 = arith.constant 0 : i32
    return %c0_i32, %c0_i32_0 : i32, i32
  }
  func.func @transform_3(%arg0: i32) -> (i32, i32) {
    %c0_i32 = arith.constant 0 : i32
    %c0_i32_0 = arith.constant 0 : i32
    %c0_i32_1 = arith.constant 0 : i32
    return %c0_i32, %c0_i32_0 : i32, i32
  }
  func.func @transform_4(%arg0: i32) -> (i32, i32) {
    %c0_i32 = arith.constant 0 : i32
    %c0_i32_0 = arith.constant 0 : i32
    %c0_i32_1 = arith.constant 0 : i32
    return %c0_i32, %c0_i32_0 : i32, i32
  }
  func.func @transform_5(%arg0: i32) -> (i32, i32) {
    %c0_i32 = arith.constant 0 : i32
    %c0_i32_0 = arith.constant 0 : i32
    %c0_i32_1 = arith.constant 0 : i32
    return %c0_i32, %c0_i32_0 : i32, i32
  }
  func.func @transform_6(%arg0: i32) -> (i32, i32) {
    %c0_i32 = arith.constant 0 : i32
    %c0_i32_0 = arith.constant 0 : i32
    %c0_i32_1 = arith.constant 0 : i32
    return %c0_i32, %c0_i32_0 : i32, i32
  }
  func.func @transform_7(%arg0: i32) -> (i32, i32) {
    %c0_i32 = arith.constant 0 : i32
    %c0_i32_0 = arith.constant 0 : i32
    %c0_i32_1 = arith.constant 0 : i32
    return %c0_i32, %c0_i32_0 : i32, i32
  }
  func.func @transform_8(%arg0: i32) -> (i32, i32) {
    %c0_i32 = arith.constant 0 : i32
    %c0_i32_0 = arith.constant 0 : i32
    %c0_i32_1 = arith.constant 0 : i32
    return %c0_i32, %c0_i32_0 : i32, i32
  }
  func.func @transform_9(%arg0: i32) -> (i32, i32) {
    %c0_i32 = arith.constant 0 : i32
    %c0_i32_0 = arith.constant 0 : i32
    %c0_i32_1 = arith.constant 0 : i32
    return %c0_i32, %c0_i32_0 : i32, i32
  }
  func.func @transform_10(%arg0: i32) -> (i32, i32) {
    %c0_i32 = arith.constant 0 : i32
    %c0_i32_0 = arith.constant 0 : i32
    %c0_i32_1 = arith.constant 0 : i32
    return %c0_i32, %c0_i32_0 : i32, i32
  }
}

</mosaic_0001>

<bundles_post_ra>
// kernel: img_clf_net_forward.2
= control target key start
LH: loop header
LB: loop body
LE: loop exit
PB: predicated region body
PF: predicated region fallthrough
CT: control target
= control target key end

     0   :  { %vm136_vm0 = vcmask 1044480   ;;  %vm137_vm1 = vcmask 1045504   ;;  %v1261_v2 = vmov 65535   ;;  %vm132_vm2 = vcmask 613376   ;;  %s1833_s0 = inlined_call_operand.vmem [shape: bf16[4,75,392], index: 0, kind: input, shape index: {}]   ;;  %s1834_s1 = inlined_call_operand.vmem [shape: bf16[6,75], index: 1, kind: input, shape index: {}]   ;;  %s1835_s2 = inlined_call_operand.vmem [shape: f32[6,1], index: 2, kind: input, shape index: {}]   ;;  %s1836_s3 = inlined_call_operand.vmem [shape: f32[6,392], index: 3, kind: output, shape index: {}]  }
   0x1   :  { %v848_v0 = vld [vmem:[%s1833_s0 + $0x80] sm:$0xf]  ;;  %v1196_v1 = vld [vmem:[%s1833_s0 + $0x8c] sm:$0x30]  ;;  %v138_v3 = vsel %vm136_vm0, 4294967295, %v1261_v2  ;;  %vm776_vm3 = vcmask 62464  }
   0x2   :  { %v849_v4 = vor.u32 %v1196_v1, %v848_v0  ;;  %v1289_v5 = vsel %vm137_vm1, %v138_v3, 0  ;;  %v1194_v6 = vld [vmem:[%s1833_s0 + $0x84] sm:$0xf]  ;;  %v850_v7 = vld [vmem:[%s1833_s0 + $0x90] sm:$0x30] }
   0x3   :  { %v853_v8 = vor.u32 %v1194_v6, %v850_v7  ;;  %v856_v9 = vld [vmem:[%s1833_s0 + $0x88] sm:$0xf]  ;;  %v1197_v10 = vld [vmem:[%s1833_s0 + $0x94] sm:$0x30]  ;;  %v1195_v11 = vld [vmem:[%s1833_s0 + $0x8c] sm:$0xf] }
   0x4   :  { %v141_v12 = vand.u32 %v849_v4, %v1289_v5  ;;  %v857_v13 = vor.u32 %v1197_v10, %v856_v9  ;;  %v858_v14 = vld [vmem:[%s1833_s0 + $0x98] sm:$0x30]  ;;  %v832_v15 = vld [vmem:[%s1833_s0 + $0x60] sm:$0xf]  ;;  %v1192_v16 = vld [vmem:[%s1833_s0 + $0x6c] sm:$0xf0] }
   0x5   :  { %v144_v17 = vand.u32 %v853_v8, %v1289_v5  ;;  %v861_v18 = vor.u32 %v1195_v11, %v858_v14  ;;  %v1190_v19 = vld [vmem:[%s1833_s0 + $0x64] sm:$0xf]  ;;  %v834_v20 = vld [vmem:[%s1833_s0 + $0x70] sm:$0xf0]  ;;  %v840_v21 = vld [vmem:[%s1833_s0 + $0x68] sm:$0xf]  ;;  %v833_v23 = vor.u32 %v1192_v16, %v832_v15 }
   0x6   :  { %155 = vmatpush.bf16.msra.mxu0 %v141_v12  ;;  %v147_v22 = vand.u32 %v857_v13, %v1289_v5  ;;  %v1193_v24 = vld [vmem:[%s1833_s0 + $0x74] sm:$0xf0]  ;;  %v1191_v25 = vld [vmem:[%s1833_s0 + $0x6c] sm:$0xf]  ;;  %v842_v26 = vld [vmem:[%s1833_s0 + $0x78] sm:$0xf0]  ;;  %v837_v28 = vor.u32 %v1190_v19, %v834_v20 }
   0x7   :  { %168 = vmatpush.bf16.msra.mxu1 %v144_v17  ;;  %v150_v27 = vand.u32 %v861_v18, %v1289_v5  ;;  %v816_v29 = vld [vmem:[%s1833_s0 + $0x40] sm:$0xf]  ;;  %v1188_v30 = vld [vmem:[%s1833_s0 + $0x4c] sm:$0xf0]  ;;  %v841_v31 = vor.u32 %v1193_v24, %v840_v21  ;;  %v1186_v32 = vld [vmem:[%s1833_s0 + $0x44] sm:$0xf]  ;;  %v845_v34 = vor.u32 %v1191_v25, %v842_v26 }
   0x8   :  { %181 = vmatpush.bf16.msra.mxu2 %v147_v22  ;;  %v818_v33 = vld [vmem:[%s1833_s0 + $0x50] sm:$0xf0]  ;;  %v824_v35 = vld [vmem:[%s1833_s0 + $0x48] sm:$0xf]  ;;  %v1189_v36 = vld [vmem:[%s1833_s0 + $0x54] sm:$0xf0]  ;;  %v817_v37 = vor.u32 %v1188_v30, %v816_v29 }
   0x9   :  { %194 = vmatpush.bf16.msra.mxu3 %v150_v27  ;;  %v1187_v38 = vld [vmem:[%s1833_s0 + $0x4c] sm:$0xf]  ;;  %v826_v39 = vld [vmem:[%s1833_s0 + $0x58] sm:$0xf0]  ;;  %v821_v40 = vor.u32 %v1186_v32, %v818_v33  ;;  %v800_v41 = vld [vmem:[%s1833_s0 + $0x20] sm:$0xf]  ;;  %v825_v44 = vor.u32 %v1189_v36, %v824_v35 }
   0xa   :  { %156 = vmatpush.bf16.msra.mxu0 %v833_v23  ;;  %v1184_v42 = vld [vmem:[%s1833_s0 + $0x2c] sm:$0xf0]  ;;  %v1182_v43 = vld [vmem:[%s1833_s0 + $0x24] sm:$0xf]  ;;  %v802_v45 = vld [vmem:[%s1833_s0 + $0x30] sm:$0xf0]  ;;  %v829_v48 = vor.u32 %v1187_v38, %v826_v39 }
   0xb   :  { %169 = vmatpush.bf16.msra.mxu1 %v837_v28  ;;  %v808_v46 = vld [vmem:[%s1833_s0 + $0x28] sm:$0xf]  ;;  %v1185_v47 = vld [vmem:[%s1833_s0 + $0x34] sm:$0xf0]  ;;  %v1183_v49 = vld [vmem:[%s1833_s0 + $0x2c] sm:$0xf]  ;;  %v801_v52 = vor.u32 %v1184_v42, %v800_v41  ;;  %v805_v56 = vor.u32 %v1182_v43, %v802_v45 }
   0xc   :  { %182 = vmatpush.bf16.msra.mxu2 %v841_v31  ;;  %v810_v50 = vld [vmem:[%s1833_s0 + $0x38] sm:$0xf0]  ;;  %v784_v51 = vld [vmem:[%s1833_s0] sm:$0xf]  ;;  %v1180_v53 = vld [vmem:[%s1833_s0 + $0xc] sm:$0xf0]  ;;  %v809_v61 = vor.u32 %v1185_v47, %v808_v46 }
   0xd   :  { %195 = vmatpush.bf16.msra.mxu3 %v845_v34  ;;  %v1178_v54 = vld [vmem:[%s1833_s0 + $0x4] sm:$0xf]  ;;  %v786_v55 = vld [vmem:[%s1833_s0 + $0x10] sm:$0xf0]  ;;  %v792_v57 = vld [vmem:[%s1833_s0 + $0x8] sm:$0xf]  ;;  %v813_v2 = vor.u32 %v1183_v49, %v810_v50  ;;  %v785_v9 = vor.u32 %v1180_v53, %v784_v51 }
   0xe   :  { %157 = vmatpush.bf16.msra.mxu0 %v817_v37  ;;  %v952_v58 = vld [vmem:[%s1833_s0 + $0x120] sm:$0xf]  ;;  %v1216_v59 = vld [vmem:[%s1833_s0 + $0x12c] sm:$0x30]  ;;  %v1214_v60 = vld [vmem:[%s1833_s0 + $0x124] sm:$0xf]  ;;  %v789_v13 = vor.u32 %v1178_v54, %v786_v55 }
   0xf   :  { %170 = vmatpush.bf16.msra.mxu1 %v821_v40  ;;  %v953_v62 = vor.u32 %v1216_v59, %v952_v58  ;;  %v954_v63 = vld [vmem:[%s1833_s0 + $0x130] sm:$0x30]  ;;  %v960_v0 = vld [vmem:[%s1833_s0 + $0x128] sm:$0xf]  ;;  %v1217_v1 = vld [vmem:[%s1833_s0 + $0x134] sm:$0x30] }
  0x10   :  { %183 = vmatpush.bf16.msra.mxu2 %v825_v44  ;;  %v1181_v3 = vld [vmem:[%s1833_s0 + $0x14] sm:$0xf0]  ;;  %v957_v4 = vor.u32 %v1214_v60, %v954_v63  ;;  %v961_v6 = vor.u32 %v1217_v1, %v960_v0  ;;  %v1215_v7 = vld [vmem:[%s1833_s0 + $0x12c] sm:$0xf]  ;;  %v962_v8 = vld [vmem:[%s1833_s0 + $0x138] sm:$0x30] }
  0x11   :  { %196 = vmatpush.bf16.msra.mxu3 %v829_v48  ;;  %v1179_v10 = vld [vmem:[%s1833_s0 + $0xc] sm:$0xf]  ;;  %v794_v11 = vld [vmem:[%s1833_s0 + $0x18] sm:$0xf0]  ;;  %v965_v12 = vor.u32 %v1215_v7, %v962_v8  ;;  %v322_v14 = vand.u32 %v953_v62, %v1289_v5  ;;  %v793_v15 = vor.u32 %v1181_v3, %v792_v57  ;;  %v936_v19 = vld [vmem:[%s1833_s0 + $0x100] sm:$0xf] }
  0x12   :  { %158 = vmatpush.bf16.msra.mxu0 %v801_v52  ;;  %v325_v16 = vand.u32 %v957_v4, %v1289_v5  ;;  %v797_v17 = vor.u32 %v1179_v10, %v794_v11  ;;  %v328_v18 = vand.u32 %v961_v6, %v1289_v5  ;;  %v1212_v20 = vld [vmem:[%s1833_s0 + $0x10c] sm:$0xf0]  ;;  %v1210_v21 = vld [vmem:[%s1833_s0 + $0x104] sm:$0xf]  ;;  %v938_v23 = vld [vmem:[%s1833_s0 + $0x110] sm:$0xf0] }
  0x13   :  { %171 = vmatpush.bf16.msra.mxu1 %v805_v56  ;;  %v331_v22 = vand.u32 %v965_v12, %v1289_v5  ;;  %v944_v24 = vld [vmem:[%s1833_s0 + $0x108] sm:$0xf]  ;;  %v1213_v25 = vld [vmem:[%s1833_s0 + $0x114] sm:$0xf0]  ;;  %v1458_v26 = vld [vmem:[%s1834_s1] sm:$0x7]  ;;  %v937_v29 = vor.u32 %v1212_v20, %v936_v19  ;;  %v941_v30 = vor.u32 %v1210_v21, %v938_v23 }
  0x14   :  { %184 = vmatpush.bf16.msra.mxu2 %v809_v61  ;;  %v1211_v27 = vld [vmem:[%s1833_s0 + $0x10c] sm:$0xf]  ;;  %v946_v28 = vld [vmem:[%s1833_s0 + $0x118] sm:$0xf0]  ;;  %v945_v31 = vor.u32 %v1213_v25, %v944_v24  ;;  %v920_v32 = vld [vmem:[%s1833_s0 + $0xe0] sm:$0xf] }
  0x15   :  { %197 = vmatpush.bf16.msra.mxu3 %v813_v2  ;;  %v1208_v33 = vld [vmem:[%s1833_s0 + $0xec] sm:$0xf0]  ;;  %v1206_v34 = vld [vmem:[%s1833_s0 + $0xe4] sm:$0xf]  ;;  %v949_v35 = vor.u32 %v1211_v27, %v946_v28  ;;  %v922_v36 = vld [vmem:[%s1833_s0 + $0xf0] sm:$0xf0] }
  0x16   :  { %159 = vmatpush.bf16.msra.mxu0 %v785_v9  ;;  %v928_v37 = vld [vmem:[%s1833_s0 + $0xe8] sm:$0xf]  ;;  %v1209_v38 = vld [vmem:[%s1833_s0 + $0xf4] sm:$0xf0]  ;;  %v1207_v39 = vld [vmem:[%s1833_s0 + $0xec] sm:$0xf]  ;;  %v921_v41 = vor.u32 %v1208_v33, %v920_v32  ;;  %v925_v44 = vor.u32 %v1206_v34, %v922_v36 }
  0x17   :  { %172 = vmatpush.bf16.msra.mxu1 %v789_v13  ;;  %v930_v40 = vld [vmem:[%s1833_s0 + $0xf8] sm:$0xf0]  ;;  %v904_v42 = vld [vmem:[%s1833_s0 + $0xc0] sm:$0xf]  ;;  %v1204_v43 = vld [vmem:[%s1833_s0 + $0xcc] sm:$0xf0]  ;;  %v929_v45 = vor.u32 %v1209_v38, %v928_v37 }
  0x18   :  { %185 = vmatpush.bf16.msra.mxu2 %v793_v15  ;;  %v1202_v46 = vld [vmem:[%s1833_s0 + $0xc4] sm:$0xf]  ;;  %v906_v47 = vld [vmem:[%s1833_s0 + $0xd0] sm:$0xf0]  ;;  %v912_v48 = vld [vmem:[%s1833_s0 + $0xc8] sm:$0xf]  ;;  %v933_v49 = vor.u32 %v1207_v39, %v930_v40  ;;  %v905_v58 = vor.u32 %v1204_v43, %v904_v42 }
  0x19   :  { %198 = vmatpush.bf16.msra.mxu3 %v797_v17  ;;  %862 = vmatmul.msk.bf16.vlgmr.msra.gmra.mxu0 %vm132_vm2, %v1458_v26  ;;  %v1205_v50 = vld [vmem:[%s1833_s0 + $0xd4] sm:$0xf0]  ;;  %v1203_v51 = vld [vmem:[%s1833_s0 + $0xcc] sm:$0xf]  ;;  %v914_v52 = vld [vmem:[%s1833_s0 + $0xd8] sm:$0xf0]  ;;  %v909_v62 = vor.u32 %v1202_v46, %v906_v47 }
  0x1a   :  { %336 = vmatpush.bf16.msrb.mxu0 %v322_v14  ;;  %863 = vmatmul.msk.bf16.vlgmr.msra.gmra.mxu1 %vm132_vm2, %v1458_v26  ;;  %v888_v53 = vld [vmem:[%s1833_s0 + $0xa0] sm:$0xf]  ;;  %v1200_v54 = vld [vmem:[%s1833_s0 + $0xac] sm:$0xf0]  ;;  %v1234_v57 = vld [vmem:[%s1833_s0 + $0x1c4] sm:$0xf]  ;;  %v913_v63 = vor.u32 %v1205_v50, %v912_v48  ;;  %v917_v3 = vor.u32 %v1203_v51, %v914_v52 }
  0x1b   :  { %349 = vmatpush.bf16.msrb.mxu1 %v325_v16  ;;  %864 = vmatmul.msk.bf16.vlgmr.msra.gmra.mxu2 %vm132_vm2, %v1458_v26  ;;  %v1056_v55 = vld [vmem:[%s1833_s0 + $0x1c0] sm:$0xf]  ;;  %v1236_v56 = vld [vmem:[%s1833_s0 + $0x1cc] sm:$0x30]  ;;  %v1058_v59 = vld [vmem:[%s1833_s0 + $0x1d0] sm:$0x30]  ;;  %v889_v13 = vor.u32 %v1200_v54, %v888_v53 }
  0x1c   :  { %362 = vmatpush.bf16.msrb.mxu2 %v328_v18  ;;  %865 = vmatmul.msk.bf16.vlgmr.msra.gmra.mxu3 %vm132_vm2, %v1458_v26  ;;  %v1064_v60 = vld [vmem:[%s1833_s0 + $0x1c8] sm:$0xf]  ;;  %v1237_v61 = vld [vmem:[%s1833_s0 + $0x1d4] sm:$0x30]  ;;  %v1198_v0 = vld [vmem:[%s1833_s0 + $0xa4] sm:$0xf]  ;;  %v1057_v8 = vor.u32 %v1236_v56, %v1056_v55  ;;  %v1061_v11 = vor.u32 %v1234_v57, %v1058_v59 }
  0x1d   :  { %375 = vmatpush.bf16.msrb.mxu3 %v331_v22  ;;  %v1235_v1 = vld [vmem:[%s1833_s0 + $0x1cc] sm:$0xf]  ;;  %v1066_v2 = vld [vmem:[%s1833_s0 + $0x1d8] sm:$0x30]  ;;  %v890_v4 = vld [vmem:[%s1833_s0 + $0xb0] sm:$0xf0]  ;;  %v1065_v12 = vor.u32 %v1237_v61, %v1064_v60 }
  0x1e   :  { %337 = vmatpush.bf16.msrb.mxu0 %v937_v29  ;;  %v896_v6 = vld [vmem:[%s1833_s0 + $0xa8] sm:$0xf]  ;;  %v1201_v7 = vld [vmem:[%s1833_s0 + $0xb4] sm:$0xf0]  ;;  %v1199_v9 = vld [vmem:[%s1833_s0 + $0xac] sm:$0xf]  ;;  %v1069_v14 = vor.u32 %v1235_v1, %v1066_v2  ;;  %v893_v15 = vor.u32 %v1198_v0, %v890_v4  ;;  %v507_v18 = vand.u32 %v1057_v8, %v1289_v5  ;;  %v510_v19 = vand.u32 %v1061_v11, %v1289_v5 }
  0x1f   :  { %350 = vmatpush.bf16.msrb.mxu1 %v941_v30  ;;  %v898_v10 = vld [vmem:[%s1833_s0 + $0xb8] sm:$0xf0]  ;;  %v897_v16 = vor.u32 %v1201_v7, %v896_v6  ;;  %v513_v20 = vand.u32 %v1065_v12, %v1289_v5  ;;  %v1040_v21 = vld [vmem:[%s1833_s0 + $0x1a0] sm:$0xf]  ;;  %v1232_v22 = vld [vmem:[%s1833_s0 + $0x1ac] sm:$0xf0] }
  0x20   :  { %363 = vmatpush.bf16.msrb.mxu2 %v945_v31  ;;  %v901_v17 = vor.u32 %v1199_v9, %v898_v10  ;;  %v1230_v23 = vld [vmem:[%s1833_s0 + $0x1a4] sm:$0xf]  ;;  %v516_v24 = vand.u32 %v1069_v14, %v1289_v5  ;;  %v1042_v25 = vld [vmem:[%s1833_s0 + $0x1b0] sm:$0xf0]  ;;  %v1048_v27 = vld [vmem:[%s1833_s0 + $0x1a8] sm:$0xf]  ;;  %v1041_v31 = vor.u32 %v1232_v22, %v1040_v21 }
  0x21   :  { %376 = vmatpush.bf16.msrb.mxu3 %v949_v35  ;;  %v1233_v28 = vld [vmem:[%s1833_s0 + $0x1b4] sm:$0xf0]  ;;  %v1231_v29 = vld [vmem:[%s1833_s0 + $0x1ac] sm:$0xf]  ;;  %v1050_v30 = vld [vmem:[%s1833_s0 + $0x1b8] sm:$0xf0]  ;;  %v1045_v32 = vor.u32 %v1230_v23, %v1042_v25 }
  0x22   :  { %338 = vmatpush.bf16.msrb.mxu0 %v921_v41  ;;  %v1049_v33 = vor.u32 %v1233_v28, %v1048_v27  ;;  %v1024_v34 = vld [vmem:[%s1833_s0 + $0x180] sm:$0xf]  ;;  %v1228_v35 = vld [vmem:[%s1833_s0 + $0x18c] sm:$0xf0]  ;;  %v1226_v36 = vld [vmem:[%s1833_s0 + $0x184] sm:$0xf]  ;;  %v1053_v37 = vor.u32 %v1231_v29, %v1050_v30 }
  0x23   :  { %351 = vmatpush.bf16.msrb.mxu1 %v925_v44  ;;  %v1026_v38 = vld [vmem:[%s1833_s0 + $0x190] sm:$0xf0]  ;;  %v1032_v39 = vld [vmem:[%s1833_s0 + $0x188] sm:$0xf]  ;;  %v1229_v40 = vld [vmem:[%s1833_s0 + $0x194] sm:$0xf0]  ;;  %v1025_v43 = vor.u32 %v1228_v35, %v1024_v34 }
  0x24   :  { %364 = vmatpush.bf16.msrb.mxu2 %v929_v45  ;;  %v1227_v41 = vld [vmem:[%s1833_s0 + $0x18c] sm:$0xf]  ;;  %v1034_v42 = vld [vmem:[%s1833_s0 + $0x198] sm:$0xf0]  ;;  %v1008_v44 = vld [vmem:[%s1833_s0 + $0x160] sm:$0xf]  ;;  %v1029_v46 = vor.u32 %v1226_v36, %v1026_v38  ;;  %v1033_v47 = vor.u32 %v1229_v40, %v1032_v39 }
  0x25   :  { %377 = vmatpush.bf16.msrb.mxu3 %v933_v49  ;;  %v1224_v45 = vld [vmem:[%s1833_s0 + $0x16c] sm:$0xf0]  ;;  %v1222_v48 = vld [vmem:[%s1833_s0 + $0x164] sm:$0xf]  ;;  %v1010_v49 = vld [vmem:[%s1833_s0 + $0x170] sm:$0xf0]  ;;  %v1037_v51 = vor.u32 %v1227_v41, %v1034_v42 }
  0x26   :  { %339 = vmatpush.bf16.msrb.mxu0 %v905_v58  ;;  %v1016_v50 = vld [vmem:[%s1833_s0 + $0x168] sm:$0xf]  ;;  %v1225_v52 = vld [vmem:[%s1833_s0 + $0x174] sm:$0xf0]  ;;  %v1223_v53 = vld [vmem:[%s1833_s0 + $0x16c] sm:$0xf]  ;;  %v1009_v60 = vor.u32 %v1224_v45, %v1008_v44  ;;  %v1013_v0 = vor.u32 %v1222_v48, %v1010_v49 }
  0x27   :  { %352 = vmatpush.bf16.msrb.mxu1 %v909_v62  ;;  %v1018_v54 = vld [vmem:[%s1833_s0 + $0x178] sm:$0xf0]  ;;  %v992_v55 = vld [vmem:[%s1833_s0 + $0x140] sm:$0xf]  ;;  %v1220_v56 = vld [vmem:[%s1833_s0 + $0x14c] sm:$0xf0]  ;;  %v1017_v1 = vor.u32 %v1225_v52, %v1016_v50 }
  0x28   :  { %365 = vmatpush.bf16.msrb.mxu2 %v913_v63  ;;  %v1160_v57 = vld [vmem:[%s1833_s0 + $0x260] sm:$0xf]  ;;  %v1256_v58 = vld [vmem:[%s1833_s0 + $0x26c] sm:$0x30]  ;;  %v1254_v59 = vld [vmem:[%s1833_s0 + $0x264] sm:$0xf]  ;;  %v1021_v6 = vor.u32 %v1223_v53, %v1018_v54 }
  0x29   :  { %378 = vmatpush.bf16.msrb.mxu3 %v917_v3  ;;  %v1162_v61 = vld [vmem:[%s1833_s0 + $0x270] sm:$0x30]  ;;  %v1168_v62 = vld [vmem:[%s1833_s0 + $0x268] sm:$0xf]  ;;  %v1257_v63 = vld [vmem:[%s1833_s0 + $0x274] sm:$0x30]  ;;  %v1161_v10 = vor.u32 %v1256_v58, %v1160_v57 }
  0x2a   :  { %340 = vmatpush.bf16.msrb.mxu0 %v889_v13  ;;  %v1218_v2 = vld [vmem:[%s1833_s0 + $0x144] sm:$0xf]  ;;  %v1255_v3 = vld [vmem:[%s1833_s0 + $0x26c] sm:$0xf]  ;;  %v1170_v4 = vld [vmem:[%s1833_s0 + $0x278] sm:$0x30]  ;;  %v1165_v13 = vor.u32 %v1254_v59, %v1162_v61  ;;  %v1169_v14 = vor.u32 %v1257_v63, %v1168_v62 }
  0x2b   :  { %353 = vmatpush.bf16.msrb.mxu1 %v893_v15  ;;  %v994_v7 = vld [vmem:[%s1833_s0 + $0x150] sm:$0xf0]  ;;  %v1000_v8 = vld [vmem:[%s1833_s0 + $0x148] sm:$0xf]  ;;  %v1221_v9 = vld [vmem:[%s1833_s0 + $0x154] sm:$0xf0]  ;;  %v993_v15 = vor.u32 %v1220_v56, %v992_v55  ;;  %v692_v21 = vand.u32 %v1161_v10, %v1289_v5 }
  0x2c   :  { %366 = vmatpush.bf16.msrb.mxu2 %v897_v16  ;;  %v1219_v11 = vld [vmem:[%s1833_s0 + $0x14c] sm:$0xf]  ;;  %v1002_v12 = vld [vmem:[%s1833_s0 + $0x158] sm:$0xf0]  ;;  %v1173_v16 = vor.u32 %v1255_v3, %v1170_v4  ;;  %v1262_v22 = vmov 0   ;;  %v695_v23 = vand.u32 %v1165_v13, %v1289_v5 }
  0x2d   :  { %379 = vmatpush.bf16.msrb.mxu3 %v901_v17  ;;  %966 = vmatmul.msk.bf16.vlgmr.msrb.gmra.mxu0 %vm132_vm2, %v1458_v26  ;;  %v997_v17 = vor.u32 %v1218_v2, %v994_v7  ;;  %v1144_v25 = vld [vmem:[%s1833_s0 + $0x240] sm:$0xf]  ;;  %v1252_v27 = vld [vmem:[%s1833_s0 + $0x24c] sm:$0xf0]  ;;  %v1250_v28 = vld [vmem:[%s1833_s0 + $0x244] sm:$0xf] }
  0x2e   :  { %521 = vmatpush.bf16.msra.mxu0 %v507_v18  ;;  %967 = vmatmul.msk.bf16.vlgmr.msrb.gmra.mxu1 %vm132_vm2, %v1458_v26  ;;  %v1001_v18 = vor.u32 %v1221_v9, %v1000_v8  ;;  %v701_v29 = vand.u32 %v1173_v16, %v1289_v5  ;;  %v1146_v30 = vld [vmem:[%s1833_s0 + $0x250] sm:$0xf0]  ;;  %v1145_v34 = vor.u32 %v1252_v27, %v1144_v25  ;;  %v1248_v38 = vld [vmem:[%s1833_s0 + $0x22c] sm:$0xf0]  ;;  %v1246_v39 = vld [vmem:[%s1833_s0 + $0x224] sm:$0xf] }
  0x2f   :  { %534 = vmatpush.bf16.msra.mxu1 %v510_v19  ;;  %968 = vmatmul.msk.bf16.vlgmr.msrb.gmra.mxu2 %vm132_vm2, %v1458_v26  ;;  %v759_v19 = vld [vmem:[%s1835_s2] sm:$0x3f]  ;;  %v1149_v35 = vor.u32 %v1250_v28, %v1146_v30  ;;  %v1130_v41 = vld [vmem:[%s1833_s0 + $0x230] sm:$0xf0]  ;;  %v1136_v42 = vld [vmem:[%s1833_s0 + $0x228] sm:$0xf] }
  0x30   :  { %547 = vmatpush.bf16.msra.mxu2 %v513_v20  ;;  %969 = vmatmul.msk.bf16.vlgmr.msrb.gmra.mxu3 %vm132_vm2, %v1458_v26  ;;  %v1005_v20 = vor.u32 %v1219_v11, %v1002_v12  ;;  %v1247_v44 = vld [vmem:[%s1833_s0 + $0x22c] sm:$0xf]  ;;  %v1138_v45 = vld [vmem:[%s1833_s0 + $0x238] sm:$0xf0]  ;;  %v1112_v49 = vld [vmem:[%s1833_s0 + $0x200] sm:$0xf] }
  0x31   :  { %560 = vmatpush.bf16.msra.mxu3 %v516_v24  ;;  %1260 = vset.pattern.permute.xlu0 %v1262_v22  ;;  %v698_v24 = vand.u32 %v1169_v14, %v1289_v5  ;;  %v1154_v5 = vld [vmem:[%s1833_s0 + $0x258] sm:$0xf0]  ;;  %v1244_v50 = vld [vmem:[%s1833_s0 + $0x20c] sm:$0xf0]  ;;  %v1141_v52 = vor.u32 %v1247_v44, %v1138_v45  ;;  %v1114_v53 = vld [vmem:[%s1833_s0 + $0x210] sm:$0xf0] }
  0x32   :  { %522 = vmatpush.bf16.msra.mxu0 %v1041_v31  ;;  %762 = vperm.xlu0 %1260, %v759_v19   ;;  %v1152_v31 = vld [vmem:[%s1833_s0 + $0x248] sm:$0xf]  ;;  %v1245_v55 = vld [vmem:[%s1833_s0 + $0x214] sm:$0xf0]  ;;  %v1243_v56 = vld [vmem:[%s1833_s0 + $0x20c] sm:$0xf]  ;;  %v1113_v58 = vor.u32 %v1244_v50, %v1112_v49 }
  0x33   :  { %535 = vmatpush.bf16.msra.mxu1 %v1045_v32  ;;  %v1253_v32 = vld [vmem:[%s1833_s0 + $0x254] sm:$0xf0]  ;;  %v1120_v54 = vld [vmem:[%s1833_s0 + $0x208] sm:$0xf]  ;;  %v1122_v57 = vld [vmem:[%s1833_s0 + $0x218] sm:$0xf0] }
  0x34   :  { %548 = vmatpush.bf16.msra.mxu2 %v1049_v33  ;;  %v1251_v33 = vld [vmem:[%s1833_s0 + $0x24c] sm:$0xf]  ;;  %v1153_v36 = vor.u32 %v1253_v32, %v1152_v31  ;;  %v1096_v61 = vld [vmem:[%s1833_s0 + $0x1e0] sm:$0xf]  ;;  %v1240_v62 = vld [vmem:[%s1833_s0 + $0x1ec] sm:$0xf0] }
  0x35   :  { %561 = vmatpush.bf16.msra.mxu3 %v1053_v37  ;;  %v1128_v37 = vld [vmem:[%s1833_s0 + $0x220] sm:$0xf]  ;;  %v1157_v40 = vor.u32 %v1251_v33, %v1154_v5  ;;  %v1238_v63 = vld [vmem:[%s1833_s0 + $0x1e4] sm:$0xf]  ;;  %v1104_v2 = vld [vmem:[%s1833_s0 + $0x1e8] sm:$0xf]  ;;  %v1097_v7 = vor.u32 %v1240_v62, %v1096_v61 }
  0x36   :  { %523 = vmatpush.bf16.msra.mxu0 %v1025_v43  ;;  %v1249_v43 = vld [vmem:[%s1833_s0 + $0x234] sm:$0xf0]  ;;  %v1239_v4 = vld [vmem:[%s1833_s0 + $0x1ec] sm:$0xf] }
  0x37   :  { %536 = vmatpush.bf16.msra.mxu1 %v1029_v46  ;;  %v1129_v46 = vor.u32 %v1248_v38, %v1128_v37  ;;  %v1137_v48 = vor.u32 %v1249_v43, %v1136_v42  ;;  %v1241_v3 = vld [vmem:[%s1833_s0 + $0x1f4] sm:$0xf0] }
  0x38   :  { %549 = vmatpush.bf16.msra.mxu2 %v1033_v47  ;;  %v1133_v47 = vor.u32 %v1246_v39, %v1130_v41  ;;  %v1105_v9 = vor.u32 %v1241_v3, %v1104_v2 }
  0x39   :  { %562 = vmatpush.bf16.msra.mxu3 %v1037_v51  ;;  %v1242_v51 = vld [vmem:[%s1833_s0 + $0x204] sm:$0xf] }
  0x3a   :  { %524 = vmatpush.bf16.msra.mxu0 %v1009_v60  ;;  %v1117_v59 = vor.u32 %v1242_v51, %v1114_v53  ;;  %v1121_v60 = vor.u32 %v1245_v55, %v1120_v54 }
  0x3b   :  { %537 = vmatpush.bf16.msra.mxu1 %v1013_v0  ;;  %v1125_v0 = vor.u32 %v1243_v56, %v1122_v57 }
  0x3c   :  { %550 = vmatpush.bf16.msra.mxu2 %v1017_v1  ;;  %v1098_v1 = vld [vmem:[%s1833_s0 + $0x1f0] sm:$0xf0] }
  0x3d   :  { %563 = vmatpush.bf16.msra.mxu3 %v1021_v6  ;;  %v1106_v6 = vld [vmem:[%s1833_s0 + $0x1f8] sm:$0xf0]  ;;  %v1101_v8 = vor.u32 %v1238_v63, %v1098_v1 }
  0x3e   :  { %525 = vmatpush.bf16.msra.mxu0 %v993_v15  ;;  %v1109_v10 = vor.u32 %v1239_v4, %v1106_v6 }
  0x3f   :  { %538 = vmatpush.bf16.msra.mxu1 %v997_v17 }
  0x40   :  { %551 = vmatpush.bf16.msra.mxu2 %v1001_v18 }
  0x41   :  { %564 = vmatpush.bf16.msra.mxu3 %v1005_v20  ;;  %1070 = vmatmul.msk.bf16.vlgmr.msra.gmra.mxu0 %vm132_vm2, %v1458_v26 }
  0x42   :  { %706 = vmatpush.bf16.msrb.mxu0 %v692_v21  ;;  %1071 = vmatmul.msk.bf16.vlgmr.msra.gmra.mxu1 %vm132_vm2, %v1458_v26 }
  0x43   :  { %719 = vmatpush.bf16.msrb.mxu1 %v695_v23  ;;  %1072 = vmatmul.msk.bf16.vlgmr.msra.gmra.mxu2 %vm132_vm2, %v1458_v26 }
  0x44   :  { %732 = vmatpush.bf16.msrb.mxu2 %v698_v24  ;;  %1073 = vmatmul.msk.bf16.vlgmr.msra.gmra.mxu3 %vm132_vm2, %v1458_v26 }
  0x45   :  { %745 = vmatpush.bf16.msrb.mxu3 %v701_v29 }
  0x46   :  { %707 = vmatpush.bf16.msrb.mxu0 %v1145_v34 }
  0x47   :  { %720 = vmatpush.bf16.msrb.mxu1 %v1149_v35 }
  0x48   :  { %733 = vmatpush.bf16.msrb.mxu2 %v1153_v36 }
  0x49   :  { %746 = vmatpush.bf16.msrb.mxu3 %v1157_v40 }
  0x4a   :  { %708 = vmatpush.bf16.msrb.mxu0 %v1129_v46 }
  0x4b   :  { %721 = vmatpush.bf16.msrb.mxu1 %v1133_v47 }
  0x4c   :  { %734 = vmatpush.bf16.msrb.mxu2 %v1137_v48 }
  0x4d   :  { %747 = vmatpush.bf16.msrb.mxu3 %v1141_v52 }
  0x4e   :  { %709 = vmatpush.bf16.msrb.mxu0 %v1113_v58 }
  0x4f   :  { %722 = vmatpush.bf16.msrb.mxu1 %v1117_v59 }
  0x50   :  { %735 = vmatpush.bf16.msrb.mxu2 %v1121_v60 }
  0x51   :  { %748 = vmatpush.bf16.msrb.mxu3 %v1125_v0 }
  0x52   :  { %710 = vmatpush.bf16.msrb.mxu0 %v1097_v7 }
  0x53   :  { %723 = vmatpush.bf16.msrb.mxu1 %v1101_v8 }
  0x54   :  { %736 = vmatpush.bf16.msrb.mxu2 %v1105_v9 }
  0x55   :  { %749 = vmatpush.bf16.msrb.mxu3 %v1109_v10  ;;  %1174 = vmatmul.msk.bf16.vlgmr.msrb.gmra.mxu0 %vm132_vm2, %v1458_v26 }
  0x56   :  { %1175 = vmatmul.msk.bf16.vlgmr.msrb.gmra.mxu1 %vm132_vm2, %v1458_v26 }
  0x57   :  { %1176 = vmatmul.msk.bf16.vlgmr.msrb.gmra.mxu2 %vm132_vm2, %v1458_v26 }
  0x58   :  { %1177 = vmatmul.msk.bf16.vlgmr.msrb.gmra.mxu3 %vm132_vm2, %v1458_v26 }
  0x96   :  { %v161_v11 = vpop.f32.mrf.mxu0 }
  0x97   :  { %v174_v12 = vpop.f32.mrf.mxu1 }
  0x9e   :  { %v187_v13 = vpop.f32.mrf.mxu2  ;;  %v163_v15 = vpop.f32.mrf.mxu0 }
  0x9f   :  { %v200_v14 = vpop.f32.mrf.mxu3  ;;  %v176_v16 = vpop.f32.mrf.mxu1 }
  0xa4   :  { %v763_v39 = vpop.permute.xlu0 %762 }
  0xa6   :  { %v189_v17 = vpop.f32.mrf.mxu2 }
  0xa7   :  { %v202_v18 = vpop.f32.mrf.mxu3 }
  0xaa   :  { %v342_v19 = vpop.f32.mrf.mxu0 }
  0xab   :  { %v355_v20 = vpop.f32.mrf.mxu1  ;;  %v385_v33 = vmax.f32 %v161_v11, %v342_v19 }
  0xac   :  { %v386_v5 = vmax.f32 %v174_v12, %v355_v20 }
  0xb2   :  { %v368_v21 = vpop.f32.mrf.mxu2  ;;  %v344_v23 = vpop.f32.mrf.mxu0 }
  0xb3   :  { %v381_v22 = vpop.f32.mrf.mxu3  ;;  %v357_v24 = vpop.f32.mrf.mxu1  ;;  %v387_v44 = vmax.f32 %v187_v13, %v368_v21 }
  0xb4   :  { %v388_v46 = vmax.f32 %v200_v14, %v381_v22 }
  0xba   :  { %v370_v25 = vpop.f32.mrf.mxu2 }
  0xbb   :  { %v383_v27 = vpop.f32.mrf.mxu3 }
  0xbe   :  { %v527_v28 = vpop.f32.mrf.mxu0 }
  0xbf   :  { %v540_v29 = vpop.f32.mrf.mxu1  ;;  %v570_v35 = vmax.f32 %v385_v33, %v527_v28 }
  0xc0   :  { %v571_v37 = vmax.f32 %v386_v5, %v540_v29 }
  0xc6   :  { %v553_v30 = vpop.f32.mrf.mxu2  ;;  %v529_v31 = vpop.f32.mrf.mxu0 }
  0xc7   :  { %v566_v26 = vpop.f32.mrf.mxu3  ;;  %v542_v32 = vpop.f32.mrf.mxu1  ;;  %v572_v48 = vmax.f32 %v387_v44, %v553_v30 }
  0xc8   :  { %v573_v50 = vmax.f32 %v388_v46, %v566_v26 }
  0xce   :  { %v555_v34 = vpop.f32.mrf.mxu2 }
  0xcf   :  { %v568_v36 = vpop.f32.mrf.mxu3 }
  0xd2   :  { %v712_v38 = vpop.f32.mrf.mxu0 }
  0xd3   :  { %v755_v40 = vmax.f32 %v570_v35, %v712_v38  ;;  %v725_v41 = vpop.f32.mrf.mxu1 }
  0xd4   :  { %v756_v42 = vmax.f32 %v571_v37, %v725_v41 }
  0xd5   :  { %v765_v43 = vadd.f32 %v763_v39, %v755_v40 }
  0xd6   :  { %v766_v45 = vadd.f32 %v763_v39, %v756_v42 }
  0xd7   :  { %v769_v47 = vmax.f32 %v765_v43, 0.0 }
  0xd8   :  { %v770_v49 = vmax.f32 %v766_v45, 0.0 }
  0xd9   :  { %773 = vst [vmem:[%s1836_s3] sm:$0x3f] %v769_v47 }
  0xda   :  { %v738_v51 = vpop.f32.mrf.mxu2  ;;  %774 = vst [vmem:[%s1836_s3 + $0x8] sm:$0x3f] %v770_v49  ;;  %v714_v54 = vpop.f32.mrf.mxu0 }
  0xdb   :  { %v757_v52 = vmax.f32 %v572_v48, %v738_v51  ;;  %v751_v53 = vpop.f32.mrf.mxu3  ;;  %v727_v56 = vpop.f32.mrf.mxu1 }
  0xdc   :  { %v758_v55 = vmax.f32 %v573_v50, %v751_v53 }
  0xdd   :  { %v767_v57 = vadd.f32 %v763_v39, %v757_v52 }
  0xde   :  { %v768_v58 = vadd.f32 %v763_v39, %v758_v55 }
  0xdf   :  { %v771_v59 = vmax.f32 %v767_v57, 0.0 }
  0xe0   :  { %v772_v60 = vmax.f32 %v768_v58, 0.0 }
  0xe1   :  { %775 = vst [vmem:[%s1836_s3 + $0x10] sm:$0x3f] %v771_v59 }
  0xe2   :  { %777 = vst.msk [vmem:[%s1836_s3 + $0x18] sm:$0x3f] %vm776_vm3, %v772_v60  ;;  %v740_v61 = vpop.f32.mrf.mxu2 }
  0xe3   :  { %v753_v62 = vpop.f32.mrf.mxu3 }

// kernel: img_clf_net_forward.3
= control target key start
LH: loop header
LB: loop body
LE: loop exit
PB: predicated region body
PF: predicated region fallthrough
CT: control target
= control target key end

     0   :  { %v2678_v3 = vmov 0   ;;  %vm127_vm0 = vcmask 1042432   ;;  %vm123_vm1 = vcmask 179200   ;;  %vm519_vm2 = vcmask 1041408   ;;  %s4003_s0 = inlined_call_operand.vmem [shape: bf16[4,150,50], index: 0, kind: input, shape index: {}]   ;;  %s4004_s3 = inlined_call_operand.vmem [shape: f32[16,1], index: 3, kind: input, shape index: {}]   ;;  %s4005_s2 = inlined_call_operand.vmem [shape: bf16[16,150], index: 2, kind: input, shape index: {}]   ;;  %s4006_s5 = inlined_call_operand.vmem [shape: f32[120,1], index: 5, kind: input, shape index: {}]   ;;  %s4007_s7 = inlined_call_operand.vmem [shape: f32[84,1], index: 7, kind: input, shape index: {}]   ;;  %s4008_s1 = inlined_call_operand.vmem [shape: f32[25,50,2], index: 1, kind: input, shape index: {}]   ;;  %s4009_s4 = inlined_call_operand.vmem [shape: f32[120,400], index: 4, kind: input, shape index: {}]   ;;  %s4010_s9 = inlined_call_operand.vmem [shape: f32[10,1], index: 9, kind: input, shape index: {}]   ;;  %s4011_s6 = inlined_call_operand.vmem [shape: f32[84,120], index: 6, kind: input, shape index: {}]   ;;  %s4012_s8 = inlined_call_operand.vmem [shape: f32[10,84], index: 8, kind: input, shape index: {}]   ;;  %s4013_s10 = inlined_call_operand.vmem [shape: f32[10,2], index: 10, kind: output, shape index: {}]  }
   0x1   :  { %v2643_v0 = vld [vmem:[%s4003_s0 + $0x38] sm:$0xff]  ;;  %v2652_v1 = vld [vmem:[%s4003_s0 + $0x84] sm:$0xff]  ;;  %v2212_v2 = vld [vmem:[%s4003_s0 + $0x94] sm:$0x7]  ;;  %2675 = vset.pattern.permute.xlu0 %v2678_v3  ;;  %2676 = vset.pattern.permute.xlu1 %v2678_v3  ;;  %vm512_vm3 = vcmask 408576   ;;  %vm546_vm4 = vcmask 15360  }
   0x2   :  { %v216_v4 = vunpack.c.l.b16 %v2212_v2  ;;  %2677 = vset.pattern.permute.xlu2 %v2678_v3  ;;  %131 = vmatpush.bf16.msra.mxu0 %v2643_v0  ;;  %v2642_v5 = vld [vmem:[%s4003_s0 + $0x30] sm:$0xff]  ;;  %v2268_v6 = vld [vmem:[%s4003_s0 + $0xe0] sm:$0x7]  ;;  %v2641_v14 = vld [vmem:[%s4003_s0 + $0x28] sm:$0xff]  ;;  %vm1613_vm5 = vcmask 130048   ;;  %vm1999_vm6 = vcmask 982016  }
   0x3   :  { %239 = vmatpush.bf16.msra.mxu2 %v2652_v1  ;;  %v2651_v8 = vld [vmem:[%s4003_s0 + $0x7c] sm:$0xff]  ;;  %v326_v9 = vunpack.c.l.b16 %v2268_v6  ;;  %v2653_v12 = vld [vmem:[%s4003_s0 + $0x8c] sm:$0xff]  ;;  %v2634_v15 = vld [vmem:[%s4005_s2 + $0x4] sm:$0xf]  ;;  %vm2115_vm7 = vcmask 1043456   ;;  %vm2108_vm8 = vcmask 687104  }
   0x4   :  { %v226_v7 = vpack.c.b16 %v216_v4, %v216_v4  ;;  %v489_v10 = vld [vmem:[%s4004_s3] sm:$0xff]  ;;  %v2153_v16 = vld [vmem:[%s4005_s2 + $0x8] sm:$0xf0]  ;;  %v2650_v17 = vld [vmem:[%s4003_s0 + $0x74] sm:$0xff]  ;;  %vm2143_vm9 = vcmask 9216  }
   0x5   :  { %493 = vperm.xlu0 %2675, %v489_v10   ;;  %v336_v13 = vpack.c.b16 %v326_v9, %v326_v9  ;;  %v2772_v19 = vor.u32 %v2634_v15, %v2153_v16  ;;  %v490_v20 = vld [vmem:[%s4004_s3 + $0x8] sm:$0xff]  ;;  %v2640_v21 = vld [vmem:[%s4003_s0 + $0x20] sm:$0xff]  ;;  %v2662_v24 = vld [vmem:[%s4003_s0 + $0xd8] sm:$0xff] }
   0x6   :  { %v237_v11 = vsel %vm127_vm0, %v226_v7, 0  ;;  %132 = vmatpush.bf16.msra.mxu0 %v2642_v5  ;;  %v56_v22 = vld [vmem:[%s4003_s0 + $0x48] sm:$0x7]  ;;  %v2649_v23 = vld [vmem:[%s4003_s0 + $0x6c] sm:$0xff]  ;;  %v2670_v26 = vld [vmem:[%s4003_s0 + $0x11c] sm:$0xff] }
   0x7   :  { %259 = vmatpush.bf16.msra.mxu3 %v237_v11  ;;  %240 = vmatpush.bf16.msra.mxu2 %v2651_v8  ;;  %v347_v18 = vsel %vm127_vm0, %v336_v13, 0  ;;  %v103_v25 = vunpack.c.l.b16 %v56_v22  ;;  %v2639_v28 = vld [vmem:[%s4003_s0 + $0x18] sm:$0xff]  ;;  %v2648_v29 = vld [vmem:[%s4003_s0 + $0x64] sm:$0xff]  ;;  %v1533_v32 = vld [vmem:[%s4006_s5 + $0x50] sm:$0xff] }
   0x8   :  { %v2669_v31 = vld [vmem:[%s4003_s0 + $0x114] sm:$0xff]  ;;  %v2644_v33 = vld [vmem:[%s4003_s0 + $0x40] sm:$0xff]  ;;  %v2668_v36 = vld [vmem:[%s4003_s0 + $0x10c] sm:$0xff] }
   0x9   :  { %v113_v27 = vpack.c.b16 %v103_v25, %v103_v25  ;;  %v2638_v34 = vld [vmem:[%s4003_s0 + $0x10] sm:$0xff]  ;;  %v2647_v35 = vld [vmem:[%s4003_s0 + $0x5c] sm:$0xff]  ;;  %v2637_v37 = vld [vmem:[%s4003_s0 + $0x8] sm:$0xff] }
   0xa   :  { %133 = vmatpush.bf16.msra.mxu0 %v2641_v14  ;;  %v2646_v38 = vld [vmem:[%s4003_s0 + $0x54] sm:$0xff]  ;;  %v2667_v39 = vld [vmem:[%s4003_s0 + $0x104] sm:$0xff]  ;;  %v2645_v42 = vld [vmem:[%s4003_s0 + $0x4c] sm:$0xff] }
   0xb   :  { %260 = vmatpush.bf16.msra.mxu3 %v2653_v12  ;;  %241 = vmatpush.bf16.msra.mxu2 %v2650_v17  ;;  %v129_v30 = vsel %vm127_vm0, %v113_v27, 0  ;;  %v1530_v40 = vld [vmem:[%s4006_s5 + $0x38] sm:$0xff]  ;;  %v2636_v41 = vld [vmem:[%s4003_s0] sm:$0xff]  ;;  %v2661_v43 = vld [vmem:[%s4003_s0 + $0xd0] sm:$0xff] }
   0xc   :  { %151 = vmatpush.bf16.msra.mxu1 %v129_v30  ;;  %v2151_v44 = vld [vmem:[%s4005_s2] sm:$0xf]  ;;  %v2635_v45 = vld [vmem:[%s4005_s2 + $0x4] sm:$0xf0]  ;;  %v2324_v49 = vld [vmem:[%s4003_s0 + $0x12c] sm:$0x7] }
   0xd   :  { %498 = vperm.xlu0 %2675, %v490_v20   ;;  %v2666_v46 = vld [vmem:[%s4003_s0 + $0xfc] sm:$0xff]  ;;  %v2152_v47 = vor.u32 %v2635_v45, %v2151_v44  ;;  %v2660_v48 = vld [vmem:[%s4003_s0 + $0xc8] sm:$0xff]  ;;  %v2665_v50 = vld [vmem:[%s4003_s0 + $0xf4] sm:$0xff]  ;;  %v436_v52 = vunpack.c.l.b16 %v2324_v49 }
   0xe   :  { %2249 = vmatmul.msk.bf16.vlgmr.msra.gmra.mxu3 %vm123_vm1, %v2772_v19  ;;  %134 = vmatpush.bf16.msra.mxu0 %v2640_v21  ;;  %v1527_v51 = vld [vmem:[%s4006_s5 + $0x20] sm:$0xff]  ;;  %v2664_v54 = vld [vmem:[%s4003_s0 + $0xec] sm:$0xff]  ;;  %v2658_v56 = vld [vmem:[%s4003_s0 + $0xb8] sm:$0xff] }
   0xf   :  { %369 = vmatpush.bf16.msrb.mxu3 %v347_v18  ;;  %242 = vmatpush.bf16.msra.mxu2 %v2649_v23  ;;  %v2659_v53 = vld [vmem:[%s4003_s0 + $0xc0] sm:$0xff]  ;;  %v446_v55 = vpack.c.b16 %v436_v52, %v436_v52  ;;  %v1524_v58 = vld [vmem:[%s4006_s5 + $0x8] sm:$0xff]  ;;  %v2657_v60 = vld [vmem:[%s4003_s0 + $0xb0] sm:$0xff] }
  0x10   :  { %152 = vmatpush.bf16.msra.mxu1 %v2644_v33  ;;  %v2663_v57 = vld [vmem:[%s4003_s0 + $0xe4] sm:$0xff]  ;;  %v2654_v1 = vld [vmem:[%s4003_s0 + $0x98] sm:$0xff]  ;;  %v1939_v2 = vld [vmem:[%s4007_s7 + $0x30] sm:$0xff] }
  0x11   :  { %v457_v59 = vsel %vm127_vm0, %v446_v55, 0  ;;  %v2671_v61 = vld [vmem:[%s4003_s0 + $0x124] sm:$0xff]  ;;  %v1936_v3 = vld [vmem:[%s4007_s7 + $0x18] sm:$0xff]  ;;  %v511_v7 = vld [vmem:[%s4008_s1 + $0x30] sm:$0x3] }
  0x12   :  { %135 = vmatpush.bf16.msra.mxu0 %v2639_v28  ;;  %v2656_v62 = vld [vmem:[%s4003_s0 + $0xa8] sm:$0xff]  ;;  %v2655_v0 = vld [vmem:[%s4003_s0 + $0xa0] sm:$0xff]  ;;  %v2380_v14 = vld [vmem:[%s4008_s1 + $0x98] sm:$0xff] }
  0x13   :  { %370 = vmatpush.bf16.msrb.mxu3 %v2662_v24  ;;  %243 = vmatpush.bf16.msra.mxu2 %v2648_v29  ;;  %v1942_v63 = vld [vmem:[%s4007_s7 + $0x48] sm:$0xff]  ;;  %v1933_v4 = vld [vmem:[%s4007_s7] sm:$0xff]  ;;  %v2369_v17 = vld [vmem:[%s4008_s1 + $0x58] sm:$0xff] }
  0x14   :  { %2193 = vmatmul.msk.bf16.vlgmr.msra.gmra.mxu1 %vm123_vm1, %v2772_v19  ;;  %v2371_v8 = vld [vmem:[%s4008_s1 + $0x68] sm:$0x3]  ;;  %v2381_v10 = vld [vmem:[%s4008_s1 + $0xa0] sm:$0x3]  ;;  %v2379_v18 = vld [vmem:[%s4008_s1 + $0x90] sm:$0xff] }
  0x15   :  { %1590 = vperm.xlu0 %2675, %v1533_v32   ;;  %v510_v9 = vld [vmem:[%s4008_s1 + $0x28] sm:$0xff]  ;;  %2372 = vmatpush.msk.msrb.mxu1 %vm519_vm2, %v2371_v8  ;;  %v2370_v12 = vld [vmem:[%s4008_s1 + $0x60] sm:$0xff]  ;;  %v508_v20 = vld [vmem:[%s4008_s1 + $0x18] sm:$0xff] }
  0x16   :  { %136 = vmatpush.bf16.msra.mxu0 %v2638_v34  ;;  %v2411_v11 = vld [vmem:[%s4008_s1 + $0x148] sm:$0x3]  ;;  %v2410_v15 = vld [vmem:[%s4008_s1 + $0x140] sm:$0xff]  ;;  %v2368_v21 = vld [vmem:[%s4008_s1 + $0x50] sm:$0xff] }
  0x17   :  { %459 = vmatpush.bf16.msra.mxu3 %v2670_v26  ;;  %244 = vmatpush.bf16.msra.mxu2 %v2647_v35  ;;  %v509_v16 = vld [vmem:[%s4008_s1 + $0x20] sm:$0xff]  ;;  %v2378_v22 = vld [vmem:[%s4008_s1 + $0x88] sm:$0xff]  ;;  %v2408_v23 = vld [vmem:[%s4008_s1 + $0x130] sm:$0xff] }
  0x18   :  { %570 = vmatpush.msrb.mxu1 %v2370_v12  ;;  %v507_v24 = vld [vmem:[%s4008_s1 + $0x10] sm:$0xff]  ;;  %v2367_v25 = vld [vmem:[%s4008_s1 + $0x48] sm:$0xff]  ;;  %v2377_v26 = vld [vmem:[%s4008_s1 + $0x80] sm:$0xff] }
  0x19   :  { %v2407_v27 = vld [vmem:[%s4008_s1 + $0x128] sm:$0xff]  ;;  %v2366_v29 = vld [vmem:[%s4008_s1 + $0x40] sm:$0xff]  ;;  %v2376_v30 = vld [vmem:[%s4008_s1 + $0x78] sm:$0xff] }
  0x1a   :  { %137 = vmatpush.bf16.msra.mxu0 %v2637_v37  ;;  %571 = vmatpush.msrb.mxu1 %v2369_v17  ;;  %v506_v28 = vld [vmem:[%s4008_s1 + $0x8] sm:$0xff]  ;;  %v2406_v32 = vld [vmem:[%s4008_s1 + $0x120] sm:$0xff]  ;;  %v2365_v35 = vld [vmem:[%s4008_s1 + $0x38] sm:$0xff] }
  0x1b   :  { %460 = vmatpush.bf16.msra.mxu3 %v2669_v31  ;;  %245 = vmatpush.bf16.msra.mxu2 %v2646_v38  ;;  %v505_v34 = vld [vmem:[%s4008_s1] sm:$0xff]  ;;  %v2405_v37 = vld [vmem:[%s4008_s1 + $0x118] sm:$0xff]  ;;  %v2419_v49 = vld [vmem:[%s4008_s1 + $0x170] sm:$0xff] }
  0x1c   :  { %572 = vmatpush.msrb.mxu1 %v2368_v21  ;;  %v2391_v38 = vld [vmem:[%s4008_s1 + $0xd8] sm:$0x3]  ;;  %v2450_v45 = vld [vmem:[%s4008_s1 + $0x220] sm:$0xff]  ;;  %v2448_v55 = vld [vmem:[%s4008_s1 + $0x210] sm:$0xff] }
  0x1d   :  { %1575 = vperm.xlu0 %2675, %v1530_v40   ;;  %v2421_v40 = vld [vmem:[%s4008_s1 + $0x180] sm:$0x3]  ;;  %v2420_v44 = vld [vmem:[%s4008_s1 + $0x178] sm:$0xff] }
  0x1e   :  { %2305 = vmatmul.msk.bf16.vlgmr.msrb.gmra.mxu3 %vm123_vm1, %v2772_v19  ;;  %138 = vmatpush.bf16.msra.mxu0 %v2636_v41  ;;  %v2451_v41 = vld [vmem:[%s4008_s1 + $0x228] sm:$0x3]  ;;  %v2388_v52 = vld [vmem:[%s4008_s1 + $0xc0] sm:$0xff] }
  0x1f   :  { %461 = vmatpush.bf16.msra.mxu3 %v2668_v36  ;;  %246 = vmatpush.bf16.msra.mxu2 %v2645_v42  ;;  %v2375_v36 = vld [vmem:[%s4008_s1 + $0x70] sm:$0xff] }
  0x20   :  { %573 = vmatpush.msrb.mxu1 %v2367_v25  ;;  %v2390_v42 = vld [vmem:[%s4008_s1 + $0xd0] sm:$0xff] }
  0x21   :  { %139 = vmatmul.bf16.vlgmr.msra.gmra.mxu0 %v2152_v47 }
  0x22   :  { %349 = vmatpush.bf16.msrb.mxu0 %v2661_v43  ;;  %247 = vmatmul.bf16.vlgmr.msra.gmra.mxu2 %v2152_v47  ;;  %v2400_v43 = vld [vmem:[%s4008_s1 + $0x108] sm:$0xff] }
  0x23   :  { %462 = vmatpush.bf16.msra.mxu3 %v2667_v39  ;;  %2362 = vmatpush.msk.msrb.mxu2 %vm519_vm2, %v511_v7  ;;  %v2401_v39 = vld [vmem:[%s4008_s1 + $0x110] sm:$0x3]  ;;  %v2445_v7 = vld [vmem:[%s4008_s1 + $0x1f8] sm:$0xff] }
  0x24   :  { %574 = vmatpush.msrb.mxu1 %v2366_v29  ;;  %v2441_v29 = vld [vmem:[%s4008_s1 + $0x1f0] sm:$0x3] }
  0x25   :  { %1560 = vperm.xlu0 %2675, %v1527_v51   ;;  %533 = vmatpush.msrb.mxu2 %v510_v9 }
  0x26   :  { %350 = vmatpush.bf16.msrb.mxu0 %v2660_v48  ;;  %575 = vmatpush.msrb.mxu1 %v2365_v35 }
  0x27   :  { %463 = vmatpush.bf16.msra.mxu3 %v2666_v46  ;;  %534 = vmatpush.msrb.mxu2 %v509_v16  ;;  %v2389_v46 = vld [vmem:[%s4008_s1 + $0xc8] sm:$0xff] }
  0x28   :  { %2402 = vmatpush.msk.msra.mxu1 %vm519_vm2, %v2401_v39  ;;  %v2429_v39 = vld [vmem:[%s4008_s1 + $0x1a8] sm:$0xff] }
  0x29   :  { %535 = vmatpush.msrb.mxu2 %v508_v20 }
  0x2a   :  { %351 = vmatpush.bf16.msrb.mxu0 %v2659_v53  ;;  %678 = vmatpush.msra.mxu1 %v2400_v43  ;;  %v2398_v53 = vld [vmem:[%s4008_s1 + $0xf8] sm:$0xff] }
  0x2b   :  { %464 = vmatpush.bf16.msra.mxu3 %v2665_v50  ;;  %536 = vmatpush.msrb.mxu2 %v507_v24  ;;  %v2449_v50 = vld [vmem:[%s4008_s1 + $0x218] sm:$0xff] }
  0x2c   :  { %v2489_v43 = vld [vmem:[%s4008_s1 + $0x2f8] sm:$0xff] }
  0x2d   :  { %1545 = vperm.xlu0 %2675, %v1524_v58   ;;  %537 = vmatpush.msrb.mxu2 %v506_v28  ;;  %v2417_v58 = vld [vmem:[%s4008_s1 + $0x160] sm:$0xff]  ;;  %v2431_v28 = vld [vmem:[%s4008_s1 + $0x1b8] sm:$0x3] }
  0x2e   :  { %352 = vmatpush.bf16.msrb.mxu0 %v2658_v56  ;;  %v2387_v56 = vld [vmem:[%s4008_s1 + $0xb8] sm:$0xff] }
  0x2f   :  { %465 = vmatpush.bf16.msra.mxu3 %v2664_v54  ;;  %538 = vmatpush.msrb.mxu2 %v505_v34  ;;  %v2418_v54 = vld [vmem:[%s4008_s1 + $0x168] sm:$0xff] }
  0x30   :  { %v2440_v34 = vld [vmem:[%s4008_s1 + $0x1e8] sm:$0xff] }
  0x31   :  { %2392 = vmatpush.msk.msra.mxu2 %vm519_vm2, %v2391_v38 }
  0x32   :  { %353 = vmatpush.bf16.msrb.mxu0 %v2657_v60  ;;  %v2386_v60 = vld [vmem:[%s4008_s1 + $0xb0] sm:$0xff] }
  0x33   :  { %466 = vmatpush.bf16.msra.mxu3 %v2663_v57  ;;  %642 = vmatpush.msra.mxu2 %v2390_v42  ;;  %v2397_v57 = vld [vmem:[%s4008_s1 + $0xf0] sm:$0xff] }
  0x34   :  { %v2459_v42 = vld [vmem:[%s4008_s1 + $0x250] sm:$0xff] }
  0x35   :  { %1991 = vperm.xlu0 %2675, %v1942_v63   ;;  %643 = vmatpush.msra.mxu2 %v2389_v46  ;;  %v2416_v63 = vld [vmem:[%s4008_s1 + $0x158] sm:$0xff] }
  0x36   :  { %467 = vmatmul.bf16.vlgmr.msra.gmra.mxu3 %v2152_v47  ;;  %354 = vmatpush.bf16.msrb.mxu0 %v2656_v62  ;;  %v2396_v62 = vld [vmem:[%s4008_s1 + $0xe8] sm:$0xff]  ;;  %v2438_v46 = vld [vmem:[%s4008_s1 + $0x1d8] sm:$0xff] }
  0x37   :  { %479 = vmatpush.bf16.msrb.mxu3 %v457_v59  ;;  %644 = vmatpush.msra.mxu2 %v2388_v52  ;;  %v2447_v59 = vld [vmem:[%s4008_s1 + $0x208] sm:$0xff] }
  0x38   :  { %v2487_v52 = vld [vmem:[%s4008_s1 + $0x2e8] sm:$0xff] }
  0x39   :  { %645 = vmatpush.msra.mxu2 %v2387_v56  ;;  %v2486_v56 = vld [vmem:[%s4008_s1 + $0x2e0] sm:$0xff] }
  0x3a   :  { %355 = vmatpush.bf16.msrb.mxu0 %v2655_v0  ;;  %v2446_v0 = vld [vmem:[%s4008_s1 + $0x200] sm:$0xff] }
  0x3b   :  { %480 = vmatpush.bf16.msrb.mxu3 %v2671_v61  ;;  %646 = vmatpush.msra.mxu2 %v2386_v60  ;;  %v2485_v60 = vld [vmem:[%s4008_s1 + $0x2d8] sm:$0xff] }
  0x3d   :  { %1976 = vperm.xlu0 %2675, %v1939_v2   ;;  %v2385_v2 = vld [vmem:[%s4008_s1 + $0xa8] sm:$0xff] }
  0x3e   :  { %356 = vmatpush.bf16.msrb.mxu0 %v2654_v1  ;;  %647 = vmatpush.msra.mxu2 %v2385_v2  ;;  %v2480_v2 = vld [vmem:[%s4008_s1 + $0x2c8] sm:$0xff] }
  0x3f   :  { %2412 = vmatpush.msk.msra.mxu3 %vm519_vm2, %v2411_v11 }
  0x41   :  { %357 = vmatmul.bf16.vlgmr.msrb.gmra.mxu0 %v2152_v47  ;;  %714 = vmatpush.msra.mxu3 %v2410_v15  ;;  %v2399_v47 = vld [vmem:[%s4008_s1 + $0x100] sm:$0xff] }
  0x42   :  { %2382 = vmatpush.msk.msra.mxu0 %vm519_vm2, %v2381_v10  ;;  %679 = vmatpush.msra.mxu1 %v2399_v47  ;;  %v2458_v47 = vld [vmem:[%s4008_s1 + $0x248] sm:$0xff] }
  0x44   :  { %606 = vmatpush.msra.mxu0 %v2380_v14  ;;  %680 = vmatpush.msra.mxu1 %v2398_v53  ;;  %v2426_v53 = vld [vmem:[%s4008_s1 + $0x190] sm:$0xff] }
  0x45   :  { %1961 = vperm.xlu0 %2675, %v1936_v3   ;;  %v2395_v3 = vld [vmem:[%s4008_s1 + $0xe0] sm:$0xff] }
  0x46   :  { %2361 = vmatmul.msk.bf16.vlgmr.msrb.gmra.mxu3 %vm123_vm1, %v2772_v19  ;;  %v2409_v19 = vld [vmem:[%s4008_s1 + $0x138] sm:$0xff]  ;;  %607 = vmatpush.msra.mxu0 %v2379_v18 }
  0x47   :  { %715 = vmatpush.msra.mxu3 %v2409_v19  ;;  %681 = vmatpush.msra.mxu1 %v2397_v57  ;;  %v2425_v57 = vld [vmem:[%s4008_s1 + $0x188] sm:$0xff] }
  0x48   :  { %608 = vmatpush.msra.mxu0 %v2378_v22 }
  0x49   :  { %716 = vmatpush.msra.mxu3 %v2408_v23  ;;  %682 = vmatpush.msra.mxu1 %v2396_v62  ;;  %v2481_v62 = vld [vmem:[%s4008_s1 + $0x2d0] sm:$0x3] }
  0x4a   :  { %609 = vmatpush.msra.mxu0 %v2377_v26 }
  0x4b   :  { %717 = vmatpush.msra.mxu3 %v2407_v27  ;;  %683 = vmatpush.msra.mxu1 %v2395_v3  ;;  %v2500_v3 = vld [vmem:[%s4008_s1 + $0x338] sm:$0xff] }
  0x4c   :  { %610 = vmatpush.msra.mxu0 %v2376_v30 }
  0x4d   :  { %1946 = vperm.xlu0 %2675, %v1933_v4   ;;  %718 = vmatpush.msra.mxu3 %v2406_v32  ;;  %v2415_v4 = vld [vmem:[%s4008_s1 + $0x150] sm:$0xff]  ;;  %v2491_v32 = vld [vmem:[%s4008_s1 + $0x308] sm:$0x3] }
  0x4e   :  { %611 = vmatpush.msra.mxu0 %v2375_v36  ;;  %v2460_v36 = vld [vmem:[%s4008_s1 + $0x258] sm:$0xff] }
  0x4f   :  { %719 = vmatpush.msra.mxu3 %v2405_v37  ;;  %v2490_v37 = vld [vmem:[%s4008_s1 + $0x300] sm:$0xff] }
  0x50   :  { %2422 = vmatpush.msk.msrb.mxu0 %vm519_vm2, %v2421_v40  ;;  %v2439_v40 = vld [vmem:[%s4008_s1 + $0x1e0] sm:$0xff] }
  0x51   :  { %2452 = vmatpush.msk.msrb.mxu3 %vm519_vm2, %v2451_v41 }
  0x52   :  { %750 = vmatpush.msrb.mxu0 %v2420_v44 }
  0x53   :  { %858 = vmatpush.msrb.mxu3 %v2450_v45  ;;  %v2428_v45 = vld [vmem:[%s4008_s1 + $0x1a0] sm:$0xff] }
  0x54   :  { %751 = vmatpush.msrb.mxu0 %v2419_v49  ;;  %v2427_v49 = vld [vmem:[%s4008_s1 + $0x198] sm:$0xff] }
  0x55   :  { %859 = vmatpush.msrb.mxu3 %v2449_v50  ;;  %v2437_v50 = vld [vmem:[%s4008_s1 + $0x1d0] sm:$0xff] }
  0x56   :  { %752 = vmatpush.msrb.mxu0 %v2418_v54  ;;  %v2436_v54 = vld [vmem:[%s4008_s1 + $0x1c8] sm:$0xff] }
  0x57   :  { %860 = vmatpush.msrb.mxu3 %v2448_v55  ;;  %v2456_v55 = vld [vmem:[%s4008_s1 + $0x238] sm:$0xff] }
  0x58   :  { %753 = vmatpush.msrb.mxu0 %v2417_v58  ;;  %v2435_v58 = vld [vmem:[%s4008_s1 + $0x1c0] sm:$0xff] }
  0x59   :  { %861 = vmatpush.msrb.mxu3 %v2447_v59  ;;  %v2455_v59 = vld [vmem:[%s4008_s1 + $0x230] sm:$0xff] }
  0x5a   :  { %754 = vmatpush.msrb.mxu0 %v2416_v63  ;;  %v2501_v63 = vld [vmem:[%s4008_s1 + $0x340] sm:$0x3] }
  0x5b   :  { %862 = vmatpush.msrb.mxu3 %v2446_v0  ;;  %v2531_v0 = vld [vmem:[%s4008_s1 + $0x3e8] sm:$0x3] }
  0x5c   :  { %755 = vmatpush.msrb.mxu0 %v2415_v4  ;;  %v2530_v4 = vld [vmem:[%s4008_s1 + $0x3e0] sm:$0xff] }
  0x5d   :  { %863 = vmatpush.msrb.mxu3 %v2445_v7  ;;  %v2469_v7 = vld [vmem:[%s4008_s1 + $0x288] sm:$0xff] }
  0x77   :  { %v494_v20 = vpop.permute.xlu0 %493 }
  0x7f   :  { %v499_v38 = vpop.permute.xlu0 %498 }
  0x91   :  { %v2910_v5 = vpop.f32.mrf.mxu3  ;;  %v154_v61 = vpop.f32.mrf.mxu1 }
  0x99   :  { %v2912_v6 = vpop.f32.mrf.mxu3  ;;  %v156_v15 = vpop.f32.mrf.mxu1 }
  0x9e   :  { %v2989_v31 = vpop.f32.mrf.mxu0 }
  0x9f   :  { %v155_v10 = vadd.f32 %v154_v61, %v2989_v31  ;;  %v2471_v61 = vld [vmem:[%s4008_s1 + $0x298] sm:$0x3] }
  0xa1   :  { %v2934_v13 = vpop.f32.mrf.mxu3 }
  0xa5   :  { %v248_v1 = vpop.f32.mrf.mxu2 }
  0xa6   :  { %v142_v51 = vpop.f32.mrf.mxu0  ;;  %v263_v11 = vadd.f32 %v2910_v5, %v248_v1  ;;  %v2470_v1 = vld [vmem:[%s4008_s1 + $0x290] sm:$0xff] }
  0xa7   :  { %v157_v22 = vadd.f32 %v156_v15, %v142_v51  ;;  %v2457_v51 = vld [vmem:[%s4008_s1 + $0x240] sm:$0xff]  ;;  %v2528_v15 = vld [vmem:[%s4008_s1 + $0x3d0] sm:$0xff] }
  0xa8   :  { %v267_v14 = vmax.f32 %v155_v10, %v263_v11  ;;  %v2529_v10 = vld [vmem:[%s4008_s1 + $0x3d8] sm:$0xff]  ;;  %v2468_v11 = vld [vmem:[%s4008_s1 + $0x280] sm:$0xff] }
  0xa9   :  { %v2994_v33 = vpop.f32.mrf.mxu3 }
  0xad   :  { %v250_v16 = vpop.f32.mrf.mxu2 }
  0xae   :  { %v265_v23 = vadd.f32 %v2912_v6, %v250_v16  ;;  %v2461_v6 = vld [vmem:[%s4008_s1 + $0x260] sm:$0x3]  ;;  %v2467_v16 = vld [vmem:[%s4008_s1 + $0x278] sm:$0xff] }
  0xb0   :  { %v268_v27 = vmax.f32 %v157_v22, %v265_v23  ;;  %v2496_v22 = vld [vmem:[%s4008_s1 + $0x318] sm:$0xff]  ;;  %v2526_v23 = vld [vmem:[%s4008_s1 + $0x3c0] sm:$0xff] }
  0xb9   :  { %v468_v48 = vpop.f32.mrf.mxu3 }
  0xbe   :  { %v358_v9 = vpop.f32.mrf.mxu0 }
  0xbf   :  { %v373_v12 = vadd.f32 %v2934_v13, %v358_v9  ;;  %v2499_v9 = vld [vmem:[%s4008_s1 + $0x330] sm:$0xff] }
  0xc1   :  { %v470_v8 = vpop.f32.mrf.mxu3  ;;  %v377_v18 = vmax.f32 %v267_v14, %v373_v12  ;;  %v2478_v12 = vld [vmem:[%s4008_s1 + $0x2b8] sm:$0xff]  ;;  %v2498_v14 = vld [vmem:[%s4008_s1 + $0x328] sm:$0xff] }
  0xc6   :  { %v360_v21 = vpop.f32.mrf.mxu0 }
  0xc7   :  { %v375_v26 = vadd.f32 %v2994_v33, %v360_v21  ;;  %v2430_v33 = vld [vmem:[%s4008_s1 + $0x1b0] sm:$0xff]  ;;  %v2476_v21 = vld [vmem:[%s4008_s1 + $0x2a8] sm:$0xff] }
  0xc9   :  { %v482_v17 = vpop.f32.mrf.mxu3  ;;  %v378_v30 = vmax.f32 %v268_v27, %v375_v26  ;;  %v2495_v26 = vld [vmem:[%s4008_s1 + $0x310] sm:$0xff]  ;;  %v2525_v27 = vld [vmem:[%s4008_s1 + $0x3b8] sm:$0xff] }
  0xca   :  { %v483_v19 = vadd.f32 %v482_v17, %v468_v48  ;;  %v2488_v48 = vld [vmem:[%s4008_s1 + $0x2f0] sm:$0xff] }
  0xcb   :  { %v2477_v17 = vld [vmem:[%s4008_s1 + $0x2b0] sm:$0xff] }
  0xcc   :  { %v487_v24 = vmax.f32 %v377_v18, %v483_v19  ;;  %v2497_v18 = vld [vmem:[%s4008_s1 + $0x320] sm:$0xff]  ;;  %v2527_v19 = vld [vmem:[%s4008_s1 + $0x3c8] sm:$0xff] }
  0xce   :  { %v501_v25 = vadd.f32 %v494_v20, %v487_v24  ;;  %v2466_v20 = vld [vmem:[%s4008_s1 + $0x270] sm:$0xff]  ;;  %v2465_v24 = vld [vmem:[%s4008_s1 + $0x268] sm:$0xff] }
  0xd0   :  { %v3101_v5 = vmax.f32 %v501_v25, 0.0  ;;  %v2475_v25 = vld [vmem:[%s4008_s1 + $0x2a0] sm:$0xff] }
  0xd1   :  { %v484_v13 = vpop.f32.mrf.mxu3 }
  0xd2   :  { %v485_v31 = vadd.f32 %v484_v13, %v470_v8  ;;  %2363 = vmatmul.msk.f32.vlgmr.msrb.gmra.mxu2 %vm512_vm3, %v3101_v5  ;;  %2373 = vmatmul.msk.f32.vlgmr.msrb.gmra.mxu1 %vm512_vm3, %v3101_v5  ;;  %v2479_v8 = vld [vmem:[%s4008_s1 + $0x2c0] sm:$0xff]  ;;  %v2511_v13 = vld [vmem:[%s4008_s1 + $0x378] sm:$0x3] }
  0xd3   :  { %2383 = vmatmul.msk.f32.vlgmr.msra.gmra.mxu0 %vm512_vm3, %v3101_v5  ;;  %2413 = vmatmul.msk.f32.vlgmr.msra.gmra.mxu3 %vm512_vm3, %v3101_v5 }
  0xd4   :  { %v488_v35 = vmax.f32 %v378_v30, %v485_v31  ;;  %2432 = vmatpush.msk.msrb.mxu2 %vm519_vm2, %v2431_v28  ;;  %2442 = vmatpush.msk.msrb.mxu1 %vm519_vm2, %v2441_v29  ;;  %v2521_v28 = vld [vmem:[%s4008_s1 + $0x3b0] sm:$0x3]  ;;  %v2541_v29 = vld [vmem:[%s4008_s1 + $0x420] sm:$0x3]  ;;  %v2571_v30 = vld [vmem:[%s4008_s1 + $0x4c8] sm:$0x3] }
  0xd5   :  { %2462 = vmatpush.msk.msra.mxu0 %vm519_vm2, %v2461_v6  ;;  %2492 = vmatpush.msk.msra.mxu3 %vm519_vm2, %v2491_v32  ;;  %v2510_v31 = vld [vmem:[%s4008_s1 + $0x370] sm:$0xff]  ;;  %v2520_v6 = vld [vmem:[%s4008_s1 + $0x3a8] sm:$0xff]  ;;  %v2540_v32 = vld [vmem:[%s4008_s1 + $0x418] sm:$0xff] }
  0xd6   :  { %v502_v41 = vadd.f32 %v499_v38, %v488_v35  ;;  %786 = vmatpush.msrb.mxu2 %v2430_v33  ;;  %822 = vmatpush.msrb.mxu1 %v2440_v34  ;;  %v2570_v33 = vld [vmem:[%s4008_s1 + $0x4c0] sm:$0xff]  ;;  %v2509_v34 = vld [vmem:[%s4008_s1 + $0x368] sm:$0xff] }
  0xd7   :  { %894 = vmatpush.msra.mxu0 %v2460_v36  ;;  %1002 = vmatpush.msra.mxu3 %v2490_v37  ;;  %v2519_v35 = vld [vmem:[%s4008_s1 + $0x3a0] sm:$0xff]  ;;  %v2539_v36 = vld [vmem:[%s4008_s1 + $0x410] sm:$0xff]  ;;  %v2569_v37 = vld [vmem:[%s4008_s1 + $0x4b8] sm:$0xff] }
  0xd8   :  { %v3151_v44 = vmax.f32 %v502_v41, 0.0  ;;  %787 = vmatpush.msrb.mxu2 %v2429_v39  ;;  %823 = vmatpush.msrb.mxu1 %v2439_v40  ;;  %v2508_v38 = vld [vmem:[%s4008_s1 + $0x360] sm:$0xff]  ;;  %v2518_v39 = vld [vmem:[%s4008_s1 + $0x398] sm:$0xff]  ;;  %v2538_v40 = vld [vmem:[%s4008_s1 + $0x408] sm:$0xff] }
  0xd9   :  { %895 = vmatpush.msra.mxu0 %v2459_v42  ;;  %1003 = vmatpush.msra.mxu3 %v2489_v43  ;;  %v2568_v41 = vld [vmem:[%s4008_s1 + $0x4b0] sm:$0xff]  ;;  %v2507_v42 = vld [vmem:[%s4008_s1 + $0x358] sm:$0xff] }
  0xda   :  { %2364 = vmatmul.msk.f32.gmra.mxu2 %vm512_vm3, %v3151_v44  ;;  %2374 = vmatmul.msk.f32.gmra.mxu1 %vm512_vm3, %v3151_v44  ;;  %v2517_v43 = vld [vmem:[%s4008_s1 + $0x390] sm:$0xff] }
  0xdb   :  { %2384 = vmatmul.msk.f32.gmra.mxu0 %vm512_vm3, %v3151_v44  ;;  %2414 = vmatmul.msk.f32.gmra.mxu3 %vm512_vm3, %v3151_v44 }
  0xdc   :  { %788 = vmatpush.msrb.mxu2 %v2428_v45  ;;  %824 = vmatpush.msrb.mxu1 %v2438_v46  ;;  %v2537_v45 = vld [vmem:[%s4008_s1 + $0x400] sm:$0xff]  ;;  %v2567_v46 = vld [vmem:[%s4008_s1 + $0x4a8] sm:$0xff] }
  0xdd   :  { %896 = vmatpush.msra.mxu0 %v2458_v47  ;;  %1004 = vmatpush.msra.mxu3 %v2488_v48  ;;  %v2506_v47 = vld [vmem:[%s4008_s1 + $0x350] sm:$0xff]  ;;  %v2516_v48 = vld [vmem:[%s4008_s1 + $0x388] sm:$0xff] }
  0xde   :  { %789 = vmatpush.msrb.mxu2 %v2427_v49  ;;  %825 = vmatpush.msrb.mxu1 %v2437_v50  ;;  %v2536_v49 = vld [vmem:[%s4008_s1 + $0x3f8] sm:$0xff]  ;;  %v2566_v50 = vld [vmem:[%s4008_s1 + $0x4a0] sm:$0xff] }
  0xdf   :  { %897 = vmatpush.msra.mxu0 %v2457_v51  ;;  %1005 = vmatpush.msra.mxu3 %v2487_v52  ;;  %v2505_v51 = vld [vmem:[%s4008_s1 + $0x348] sm:$0xff]  ;;  %v2515_v52 = vld [vmem:[%s4008_s1 + $0x380] sm:$0xff] }
  0xe0   :  { %790 = vmatpush.msrb.mxu2 %v2426_v53  ;;  %826 = vmatpush.msrb.mxu1 %v2436_v54  ;;  %v2535_v53 = vld [vmem:[%s4008_s1 + $0x3f0] sm:$0xff]  ;;  %v2565_v54 = vld [vmem:[%s4008_s1 + $0x498] sm:$0xff] }
  0xe1   :  { %898 = vmatpush.msra.mxu0 %v2456_v55  ;;  %1006 = vmatpush.msra.mxu3 %v2486_v56  ;;  %v2551_v55 = vld [vmem:[%s4008_s1 + $0x458] sm:$0x3]  ;;  %v2561_v56 = vld [vmem:[%s4008_s1 + $0x490] sm:$0x3] }
  0xe2   :  { %2393 = vmatmul.msk.f32.vlgmr.msra.gmra.mxu2 %vm512_vm3, %v3101_v5  ;;  %2403 = vmatmul.msk.f32.vlgmr.msra.gmra.mxu1 %vm512_vm3, %v3101_v5 }
  0xe3   :  { %2423 = vmatmul.msk.f32.vlgmr.msrb.gmra.mxu0 %vm512_vm3, %v3101_v5  ;;  %2453 = vmatmul.msk.f32.vlgmr.msrb.gmra.mxu3 %vm512_vm3, %v3101_v5 }
  0xe4   :  { %791 = vmatpush.msrb.mxu2 %v2425_v57  ;;  %827 = vmatpush.msrb.mxu1 %v2435_v58  ;;  %v2581_v57 = vld [vmem:[%s4008_s1 + $0x500] sm:$0x3]  ;;  %v2550_v58 = vld [vmem:[%s4008_s1 + $0x450] sm:$0xff] }
  0xe5   :  { %899 = vmatpush.msra.mxu0 %v2455_v59  ;;  %1007 = vmatpush.msra.mxu3 %v2485_v60  ;;  %v2560_v59 = vld [vmem:[%s4008_s1 + $0x488] sm:$0xff]  ;;  %v2580_v60 = vld [vmem:[%s4008_s1 + $0x4f8] sm:$0xff] }
  0xe6   :  { %2472 = vmatpush.msk.msra.mxu2 %vm519_vm2, %v2471_v61  ;;  %2482 = vmatpush.msk.msra.mxu1 %vm519_vm2, %v2481_v62  ;;  %v2549_v61 = vld [vmem:[%s4008_s1 + $0x448] sm:$0xff]  ;;  %v2559_v62 = vld [vmem:[%s4008_s1 + $0x480] sm:$0xff] }
  0xe7   :  { %2502 = vmatpush.msk.msrb.mxu0 %vm519_vm2, %v2501_v63  ;;  %2532 = vmatpush.msk.msrb.mxu3 %vm519_vm2, %v2531_v0  ;;  %v2579_v63 = vld [vmem:[%s4008_s1 + $0x4f0] sm:$0xff]  ;;  %v2548_v0 = vld [vmem:[%s4008_s1 + $0x440] sm:$0xff] }
  0xe8   :  { %930 = vmatpush.msra.mxu2 %v2470_v1  ;;  %966 = vmatpush.msra.mxu1 %v2480_v2  ;;  %v2558_v1 = vld [vmem:[%s4008_s1 + $0x478] sm:$0xff]  ;;  %v2578_v2 = vld [vmem:[%s4008_s1 + $0x4e8] sm:$0xff] }
  0xe9   :  { %1038 = vmatpush.msrb.mxu0 %v2500_v3  ;;  %1146 = vmatpush.msrb.mxu3 %v2530_v4  ;;  %v2547_v3 = vld [vmem:[%s4008_s1 + $0x438] sm:$0xff]  ;;  %v2557_v4 = vld [vmem:[%s4008_s1 + $0x470] sm:$0xff] }
  0xea   :  { %2394 = vmatmul.msk.f32.gmra.mxu2 %vm512_vm3, %v3151_v44  ;;  %2404 = vmatmul.msk.f32.gmra.mxu1 %vm512_vm3, %v3151_v44 }
  0xeb   :  { %2424 = vmatmul.msk.f32.gmra.mxu0 %vm512_vm3, %v3151_v44  ;;  %2454 = vmatmul.msk.f32.gmra.mxu3 %vm512_vm3, %v3151_v44 }
  0xec   :  { %931 = vmatpush.msra.mxu2 %v2469_v7  ;;  %967 = vmatpush.msra.mxu1 %v2479_v8  ;;  %v2577_v7 = vld [vmem:[%s4008_s1 + $0x4e0] sm:$0xff]  ;;  %v2546_v8 = vld [vmem:[%s4008_s1 + $0x430] sm:$0xff] }
  0xed   :  { %1039 = vmatpush.msrb.mxu0 %v2499_v9  ;;  %1147 = vmatpush.msrb.mxu3 %v2529_v10  ;;  %v2556_v9 = vld [vmem:[%s4008_s1 + $0x468] sm:$0xff]  ;;  %v2576_v10 = vld [vmem:[%s4008_s1 + $0x4d8] sm:$0xff] }
  0xee   :  { %932 = vmatpush.msra.mxu2 %v2468_v11  ;;  %968 = vmatpush.msra.mxu1 %v2478_v12  ;;  %v2545_v11 = vld [vmem:[%s4008_s1 + $0x428] sm:$0xff]  ;;  %v2555_v12 = vld [vmem:[%s4008_s1 + $0x460] sm:$0xff] }
  0xef   :  { %1040 = vmatpush.msrb.mxu0 %v2498_v14  ;;  %1148 = vmatpush.msrb.mxu3 %v2528_v15  ;;  %v2575_v14 = vld [vmem:[%s4008_s1 + $0x4d0] sm:$0xff]  ;;  %v2591_v15 = vld [vmem:[%s4008_s1 + $0x538] sm:$0x3] }
  0xf0   :  { %933 = vmatpush.msra.mxu2 %v2467_v16  ;;  %969 = vmatpush.msra.mxu1 %v2477_v17  ;;  %v2601_v16 = vld [vmem:[%s4008_s1 + $0x570] sm:$0x3] }
  0xf1   :  { %1041 = vmatpush.msrb.mxu0 %v2497_v18  ;;  %1149 = vmatpush.msrb.mxu3 %v2527_v19  ;;  %v2590_v17 = vld [vmem:[%s4008_s1 + $0x530] sm:$0xff]  ;;  %v2600_v18 = vld [vmem:[%s4008_s1 + $0x568] sm:$0xff] }
  0xf2   :  { %2433 = vmatmul.msk.f32.vlgmr.msrb.gmra.mxu2 %vm512_vm3, %v3101_v5  ;;  %2443 = vmatmul.msk.f32.vlgmr.msrb.gmra.mxu1 %vm512_vm3, %v3101_v5  ;;  %v2589_v19 = vld [vmem:[%s4008_s1 + $0x528] sm:$0xff] }
  0xf3   :  { %2463 = vmatmul.msk.f32.vlgmr.msra.gmra.mxu0 %vm512_vm3, %v3101_v5  ;;  %2493 = vmatmul.msk.f32.vlgmr.msra.gmra.mxu3 %vm512_vm3, %v3101_v5 }
  0xf4   :  { %934 = vmatpush.msra.mxu2 %v2466_v20  ;;  %970 = vmatpush.msra.mxu1 %v2476_v21  ;;  %v2599_v20 = vld [vmem:[%s4008_s1 + $0x560] sm:$0xff] }
  0xf5   :  { %1042 = vmatpush.msrb.mxu0 %v2496_v22  ;;  %1150 = vmatpush.msrb.mxu3 %v2526_v23  ;;  %v2588_v21 = vld [vmem:[%s4008_s1 + $0x520] sm:$0xff]  ;;  %v2598_v22 = vld [vmem:[%s4008_s1 + $0x558] sm:$0xff] }
  0xf6   :  { %935 = vmatpush.msra.mxu2 %v2465_v24  ;;  %971 = vmatpush.msra.mxu1 %v2475_v25  ;;  %v2587_v23 = vld [vmem:[%s4008_s1 + $0x518] sm:$0xff]  ;;  %v2597_v24 = vld [vmem:[%s4008_s1 + $0x550] sm:$0xff] }
  0xf7   :  { %1043 = vmatpush.msrb.mxu0 %v2495_v26  ;;  %1151 = vmatpush.msrb.mxu3 %v2525_v27  ;;  %v2586_v25 = vld [vmem:[%s4008_s1 + $0x510] sm:$0xff]  ;;  %v2596_v26 = vld [vmem:[%s4008_s1 + $0x548] sm:$0xff] }
  0xf8   :  { %2512 = vmatpush.msk.msrb.mxu2 %vm519_vm2, %v2511_v13  ;;  %2522 = vmatpush.msk.msrb.mxu1 %vm519_vm2, %v2521_v28  ;;  %v2585_v27 = vld [vmem:[%s4008_s1 + $0x508] sm:$0xff]  ;;  %v2595_v13 = vld [vmem:[%s4008_s1 + $0x540] sm:$0xff] }
  0xf9   :  { %2542 = vmatpush.msk.msra.mxu0 %vm519_vm2, %v2541_v29  ;;  %2572 = vmatpush.msk.msra.mxu3 %vm519_vm2, %v2571_v30 }
  0xfa   :  { %2434 = vmatmul.msk.f32.gmra.mxu2 %vm512_vm3, %v3151_v44  ;;  %2444 = vmatmul.msk.f32.gmra.mxu1 %vm512_vm3, %v3151_v44 }
  0xfb   :  { %2464 = vmatmul.msk.f32.gmra.mxu0 %vm512_vm3, %v3151_v44  ;;  %2494 = vmatmul.msk.f32.gmra.mxu3 %vm512_vm3, %v3151_v44 }
  0xfc   :  { %1074 = vmatpush.msrb.mxu2 %v2510_v31  ;;  %1110 = vmatpush.msrb.mxu1 %v2520_v6 }
  0xfd   :  { %1182 = vmatpush.msra.mxu0 %v2540_v32  ;;  %1290 = vmatpush.msra.mxu3 %v2570_v33 }
  0xfe   :  { %1075 = vmatpush.msrb.mxu2 %v2509_v34  ;;  %1111 = vmatpush.msrb.mxu1 %v2519_v35 }
  0xff   :  { %1183 = vmatpush.msra.mxu0 %v2539_v36  ;;  %1291 = vmatpush.msra.mxu3 %v2569_v37 }
 0x100   :  { %1076 = vmatpush.msrb.mxu2 %v2508_v38  ;;  %1112 = vmatpush.msrb.mxu1 %v2518_v39 }
 0x101   :  { %1184 = vmatpush.msra.mxu0 %v2538_v40  ;;  %1292 = vmatpush.msra.mxu3 %v2568_v41 }
 0x102   :  { %2473 = vmatmul.msk.f32.vlgmr.msra.gmra.mxu2 %vm512_vm3, %v3101_v5  ;;  %2483 = vmatmul.msk.f32.vlgmr.msra.gmra.mxu1 %vm512_vm3, %v3101_v5 }
 0x103   :  { %2503 = vmatmul.msk.f32.vlgmr.msrb.gmra.mxu0 %vm512_vm3, %v3101_v5  ;;  %2533 = vmatmul.msk.f32.vlgmr.msrb.gmra.mxu3 %vm512_vm3, %v3101_v5 }
 0x104   :  { %1077 = vmatpush.msrb.mxu2 %v2507_v42  ;;  %1113 = vmatpush.msrb.mxu1 %v2517_v43 }
 0x105   :  { %1185 = vmatpush.msra.mxu0 %v2537_v45  ;;  %1293 = vmatpush.msra.mxu3 %v2567_v46 }
 0x106   :  { %1078 = vmatpush.msrb.mxu2 %v2506_v47  ;;  %1114 = vmatpush.msrb.mxu1 %v2516_v48 }
 0x107   :  { %1186 = vmatpush.msra.mxu0 %v2536_v49  ;;  %1294 = vmatpush.msra.mxu3 %v2566_v50 }
 0x108   :  { %1079 = vmatpush.msrb.mxu2 %v2505_v51  ;;  %1115 = vmatpush.msrb.mxu1 %v2515_v52 }
 0x109   :  { %1187 = vmatpush.msra.mxu0 %v2535_v53  ;;  %1295 = vmatpush.msra.mxu3 %v2565_v54 }
 0x10a   :  { %2474 = vmatmul.msk.f32.gmra.mxu2 %vm512_vm3, %v3151_v44  ;;  %2484 = vmatmul.msk.f32.gmra.mxu1 %vm512_vm3, %v3151_v44 }
 0x10b   :  { %2504 = vmatmul.msk.f32.gmra.mxu0 %vm512_vm3, %v3151_v44  ;;  %2534 = vmatmul.msk.f32.gmra.mxu3 %vm512_vm3, %v3151_v44 }
 0x10c   :  { %2552 = vmatpush.msk.msra.mxu2 %vm519_vm2, %v2551_v55  ;;  %2562 = vmatpush.msk.msra.mxu1 %vm519_vm2, %v2561_v56 }
 0x10d   :  { %2582 = vmatpush.msk.msrb.mxu0 %vm519_vm2, %v2581_v57 }
 0x10e   :  { %1218 = vmatpush.msra.mxu2 %v2550_v58  ;;  %1254 = vmatpush.msra.mxu1 %v2560_v59 }
 0x10f   :  { %1326 = vmatpush.msrb.mxu0 %v2580_v60 }
 0x110   :  { %1219 = vmatpush.msra.mxu2 %v2549_v61  ;;  %1255 = vmatpush.msra.mxu1 %v2559_v62 }
 0x111   :  { %1327 = vmatpush.msrb.mxu0 %v2579_v63 }
 0x112   :  { %2513 = vmatmul.msk.f32.vlgmr.msrb.gmra.mxu2 %vm512_vm3, %v3101_v5  ;;  %2523 = vmatmul.msk.f32.vlgmr.msrb.gmra.mxu1 %vm512_vm3, %v3101_v5 }
 0x113   :  { %2543 = vmatmul.msk.f32.vlgmr.msra.gmra.mxu0 %vm512_vm3, %v3101_v5  ;;  %2573 = vmatmul.msk.f32.vlgmr.msra.gmra.mxu3 %vm512_vm3, %v3101_v5 }
 0x114   :  { %1220 = vmatpush.msra.mxu2 %v2548_v0  ;;  %1256 = vmatpush.msra.mxu1 %v2558_v1 }
 0x115   :  { %1328 = vmatpush.msrb.mxu0 %v2578_v2 }
 0x116   :  { %1221 = vmatpush.msra.mxu2 %v2547_v3  ;;  %1257 = vmatpush.msra.mxu1 %v2557_v4 }
 0x117   :  { %1329 = vmatpush.msrb.mxu0 %v2577_v7 }
 0x118   :  { %1222 = vmatpush.msra.mxu2 %v2546_v8  ;;  %1258 = vmatpush.msra.mxu1 %v2556_v9 }
 0x119   :  { %1330 = vmatpush.msrb.mxu0 %v2576_v10 }
 0x11a   :  { %2514 = vmatmul.msk.f32.gmra.mxu2 %vm512_vm3, %v3151_v44  ;;  %2524 = vmatmul.msk.f32.gmra.mxu1 %vm512_vm3, %v3151_v44 }
 0x11b   :  { %2544 = vmatmul.msk.f32.gmra.mxu0 %vm512_vm3, %v3151_v44  ;;  %2574 = vmatmul.msk.f32.gmra.mxu3 %vm512_vm3, %v3151_v44 }
 0x11c   :  { %1223 = vmatpush.msra.mxu2 %v2545_v11  ;;  %1259 = vmatpush.msra.mxu1 %v2555_v12 }
 0x11d   :  { %1331 = vmatpush.msrb.mxu0 %v2575_v14 }
 0x11e   :  { %2592 = vmatpush.msk.msrb.mxu2 %vm519_vm2, %v2591_v15  ;;  %2602 = vmatpush.msk.msrb.mxu1 %vm519_vm2, %v2601_v16 }
 0x120   :  { %1362 = vmatpush.msrb.mxu2 %v2590_v17  ;;  %1398 = vmatpush.msrb.mxu1 %v2600_v18 }
 0x122   :  { %1363 = vmatpush.msrb.mxu2 %v2589_v19  ;;  %2563 = vmatmul.msk.f32.vlgmr.msra.gmra.mxu1 %vm512_vm3, %v3101_v5 }
 0x123   :  { %2553 = vmatmul.msk.f32.vlgmr.msra.gmra.mxu2 %vm512_vm3, %v3101_v5  ;;  %2583 = vmatmul.msk.f32.vlgmr.msrb.gmra.mxu0 %vm512_vm3, %v3101_v5 }
 0x124   :  { %1399 = vmatpush.msrb.mxu1 %v2599_v20  ;;  %1364 = vmatpush.msrb.mxu2 %v2588_v21 }
 0x126   :  { %1400 = vmatpush.msrb.mxu1 %v2598_v22  ;;  %1365 = vmatpush.msrb.mxu2 %v2587_v23  ;;  %v1463_v22 = vld [vmem:[%s4009_s4] sm:$0xff] }
 0x128   :  { %1401 = vmatpush.msrb.mxu1 %v2597_v24  ;;  %1366 = vmatpush.msrb.mxu2 %v2586_v25 }
 0x12a   :  { %1402 = vmatpush.msrb.mxu1 %v2596_v26  ;;  %1367 = vmatpush.msrb.mxu2 %v2585_v27 }
 0x12b   :  { %2554 = vmatmul.msk.f32.gmra.mxu2 %vm512_vm3, %v3151_v44  ;;  %2564 = vmatmul.msk.f32.gmra.mxu1 %vm512_vm3, %v3151_v44 }
 0x12c   :  { %2584 = vmatmul.msk.f32.gmra.mxu0 %vm512_vm3, %v3151_v44  ;;  %1403 = vmatpush.msrb.mxu1 %v2595_v13 }
 0x133   :  { %2593 = vmatmul.msk.f32.vlgmr.msrb.gmra.mxu2 %vm512_vm3, %v3101_v5  ;;  %2603 = vmatmul.msk.f32.vlgmr.msrb.gmra.mxu1 %vm512_vm3, %v3101_v5 }
 0x13b   :  { %2594 = vmatmul.msk.f32.gmra.mxu2 %vm512_vm3, %v3151_v44  ;;  %2604 = vmatmul.msk.f32.gmra.mxu1 %vm512_vm3, %v3151_v44 }
 0x14f   :  { %v577_v28 = vpop.f32.mrf.mxu1 }
 0x150   :  { %583 = vst.msk [vmem:[#allocation2 + $0x10] sm:$0xff] %vm546_vm4, %v577_v28  ;;  %v613_v29 = vpop.f32.mrf.mxu0  ;;  %v1537_v28 = vld [vmem:[%s4006_s5 + $0x70] sm:$0xff] }
 0x151   :  { %619 = vst.msk [vmem:[#allocation2 + $0x20] sm:$0xff] %vm546_vm4, %v613_v29  ;;  %1610 = vperm.xlu1 %2676, %v1537_v28   ;;  %v1499_v28 = vld [vmem:[%s4009_s4 + $0x120] sm:$0xff] }
 0x155   :  { %v540_v30 = vpop.f32.mrf.mxu2 }
 0x156   :  { %547 = vst.msk [vmem:[#allocation2] sm:$0xff] %vm546_vm4, %v540_v30  ;;  %v721_v31 = vpop.f32.mrf.mxu3  ;;  %v1467_v30 = vld [vmem:[%s4009_s4 + $0x20] sm:$0xff] }
 0x157   :  { %727 = vst.msk [vmem:[#allocation2 + $0x50] sm:$0xff] %vm546_vm4, %v721_v31  ;;  %v580_v5 = vpop.f32.mrf.mxu1  ;;  %v1415_v19 = vld [vmem:[#allocation2 + $0x10] sm:$0xff] }
 0x158   :  { %584 = vst.msk [vmem:[#allocation2 + $0x18] sm:$0xff] %vm546_vm4, %v580_v5  ;;  %v616_v6 = vpop.f32.mrf.mxu0  ;;  %v1417_v14 = vld [vmem:[#allocation2 + $0x20] sm:$0xff] }
 0x159   :  { %620 = vst.msk [vmem:[#allocation2 + $0x28] sm:$0xff] %vm546_vm4, %v616_v6 }
 0x15d   :  { %v543_v44 = vpop.f32.mrf.mxu2  ;;  %v1413_v23 = vld [vmem:[#allocation2] sm:$0xff] }
 0x15e   :  { %548 = vst.msk [vmem:[#allocation2 + $0x8] sm:$0xff] %vm546_vm4, %v543_v44  ;;  %v724_v32 = vpop.f32.mrf.mxu3  ;;  %v1423_v0 = vld [vmem:[#allocation2 + $0x50] sm:$0xff] }
 0x15f   :  { %728 = vst.msk [vmem:[#allocation2 + $0x58] sm:$0xff] %vm546_vm4, %v724_v32  ;;  %v685_v33 = vpop.f32.mrf.mxu1  ;;  %v1416_v16 = vld [vmem:[#allocation2 + $0x18] sm:$0xff] }
 0x160   :  { %691 = vst.msk [vmem:[#allocation2 + $0x40] sm:$0xff] %vm546_vm4, %v685_v33  ;;  %v757_v34 = vpop.f32.mrf.mxu0  ;;  %v1418_v12 = vld [vmem:[#allocation2 + $0x28] sm:$0xff] }
 0x161   :  { %763 = vst.msk [vmem:[#allocation2 + $0x60] sm:$0xff] %vm546_vm4, %v757_v34  ;;  %v1536_v33 = vld [vmem:[%s4006_s5 + $0x68] sm:$0xff] }
 0x162   :  { %1605 = vperm.xlu1 %2676, %v1536_v33   ;;  %v1486_v33 = vld [vmem:[%s4009_s4 + $0xb8] sm:$0xff] }
 0x165   :  { %v649_v35 = vpop.f32.mrf.mxu2  ;;  %v1414_v21 = vld [vmem:[#allocation2 + $0x8] sm:$0xff] }
 0x166   :  { %655 = vst.msk [vmem:[#allocation2 + $0x30] sm:$0xff] %vm546_vm4, %v649_v35  ;;  %v865_v36 = vpop.f32.mrf.mxu3  ;;  %v1424_v61 = vld [vmem:[#allocation2 + $0x58] sm:$0xff]  ;;  %v1471_v35 = vld [vmem:[%s4009_s4 + $0x40] sm:$0xff] }
 0x167   :  { %871 = vst.msk [vmem:[#allocation2 + $0x90] sm:$0xff] %vm546_vm4, %v865_v36  ;;  %v688_v37 = vpop.f32.mrf.mxu1  ;;  %v1421_v3 = vld [vmem:[#allocation2 + $0x40] sm:$0xff] }
 0x168   :  { %692 = vst.msk [vmem:[#allocation2 + $0x48] sm:$0xff] %vm546_vm4, %v688_v37  ;;  %v760_v38 = vpop.f32.mrf.mxu0  ;;  %v1425_v59 = vld [vmem:[#allocation2 + $0x60] sm:$0xff] }
 0x169   :  { %764 = vst.msk [vmem:[#allocation2 + $0x68] sm:$0xff] %vm546_vm4, %v760_v38 }
 0x16d   :  { %v652_v39 = vpop.f32.mrf.mxu2  ;;  %v1419_v10 = vld [vmem:[#allocation2 + $0x30] sm:$0xff] }
 0x16e   :  { %656 = vst.msk [vmem:[#allocation2 + $0x38] sm:$0xff] %vm546_vm4, %v652_v39  ;;  %v868_v40 = vpop.f32.mrf.mxu3 }
 0x16f   :  { %872 = vst.msk [vmem:[#allocation2 + $0x98] sm:$0xff] %vm546_vm4, %v868_v40  ;;  %v829_v41 = vpop.f32.mrf.mxu1  ;;  %v1422_v2 = vld [vmem:[#allocation2 + $0x48] sm:$0xff] }
 0x170   :  { %835 = vst.msk [vmem:[#allocation2 + $0x80] sm:$0xff] %vm546_vm4, %v829_v41  ;;  %v901_v42 = vpop.f32.mrf.mxu0  ;;  %v1426_v58 = vld [vmem:[#allocation2 + $0x68] sm:$0xff] }
 0x171   :  { %907 = vst.msk [vmem:[#allocation2 + $0xa0] sm:$0xff] %vm546_vm4, %v901_v42  ;;  %v1532_v41 = vld [vmem:[%s4006_s5 + $0x48] sm:$0xff] }
 0x172   :  { %1585 = vperm.xlu1 %2676, %v1532_v41   ;;  %v1500_v41 = vld [vmem:[%s4009_s4 + $0x128] sm:$0xff] }
 0x175   :  { %v793_v43 = vpop.f32.mrf.mxu2  ;;  %v1420_v7 = vld [vmem:[#allocation2 + $0x38] sm:$0xff] }
 0x176   :  { %799 = vst.msk [vmem:[#allocation2 + $0x70] sm:$0xff] %vm546_vm4, %v793_v43  ;;  %v1009_v45 = vpop.f32.mrf.mxu3  ;;  %v1475_v43 = vld [vmem:[%s4009_s4 + $0x60] sm:$0xff] }
 0x177   :  { %1015 = vst.msk [vmem:[#allocation2 + $0xd0] sm:$0xff] %vm546_vm4, %v1009_v45  ;;  %v832_v46 = vpop.f32.mrf.mxu1 }
 0x178   :  { %836 = vst.msk [vmem:[#allocation2 + $0x88] sm:$0xff] %vm546_vm4, %v832_v46  ;;  %v904_v47 = vpop.f32.mrf.mxu0  ;;  %v1433_v45 = vld [vmem:[#allocation2 + $0xa0] sm:$0xff] }
 0x179   :  { %908 = vst.msk [vmem:[#allocation2 + $0xa8] sm:$0xff] %vm546_vm4, %v904_v47  ;;  %v1432_v47 = vld [vmem:[#allocation2 + $0x98] sm:$0xff] }
 0x17d   :  { %v796_v48 = vpop.f32.mrf.mxu2  ;;  %v1427_v56 = vld [vmem:[#allocation2 + $0x70] sm:$0xff] }
 0x17e   :  { %800 = vst.msk [vmem:[#allocation2 + $0x78] sm:$0xff] %vm546_vm4, %v796_v48  ;;  %v1012_v49 = vpop.f32.mrf.mxu3  ;;  %v1439_v32 = vld [vmem:[#allocation2 + $0xd0] sm:$0xff] }
 0x17f   :  { %1016 = vst.msk [vmem:[#allocation2 + $0xd8] sm:$0xff] %vm546_vm4, %v1012_v49  ;;  %v973_v50 = vpop.f32.mrf.mxu1  ;;  %v1431_v48 = vld [vmem:[#allocation2 + $0x90] sm:$0xff] }
 0x180   :  { %979 = vst.msk [vmem:[#allocation2 + $0xc0] sm:$0xff] %vm546_vm4, %v973_v50  ;;  %v1045_v51 = vpop.f32.mrf.mxu0  ;;  %v1434_v42 = vld [vmem:[#allocation2 + $0xa8] sm:$0xff]  ;;  %v1529_v50 = vld [vmem:[%s4006_s5 + $0x30] sm:$0xff] }
 0x181   :  { %1051 = vst.msk [vmem:[#allocation2 + $0xe0] sm:$0xff] %vm546_vm4, %v1045_v51  ;;  %v1430_v51 = vld [vmem:[#allocation2 + $0x88] sm:$0xff]  ;;  %1570 = vperm.xlu1 %2676, %v1529_v50  }
 0x185   :  { %v937_v52 = vpop.f32.mrf.mxu2  ;;  %v1428_v53 = vld [vmem:[#allocation2 + $0x78] sm:$0xff] }
 0x186   :  { %943 = vst.msk [vmem:[#allocation2 + $0xb0] sm:$0xff] %vm546_vm4, %v937_v52  ;;  %v1153_v54 = vpop.f32.mrf.mxu3  ;;  %1659 = vmatpush.msrb.mxu3 %v1428_v53  ;;  %v1440_v6 = vld [vmem:[#allocation2 + $0xd8] sm:$0xff]  ;;  %v1479_v53 = vld [vmem:[%s4009_s4 + $0x80] sm:$0xff] }
 0x187   :  { %1159 = vst.msk [vmem:[#allocation2 + $0x110] sm:$0xff] %vm546_vm4, %v1153_v54  ;;  %v976_v55 = vpop.f32.mrf.mxu1  ;;  %v1437_v36 = vld [vmem:[#allocation2 + $0xc0] sm:$0xff]  ;;  %v1464_v54 = vld [vmem:[%s4009_s4 + $0x8] sm:$0xff] }
 0x188   :  { %980 = vst.msk [vmem:[#allocation2 + $0xc8] sm:$0xff] %vm546_vm4, %v976_v55  ;;  %v1048_v57 = vpop.f32.mrf.mxu0  ;;  %1660 = vmatpush.msrb.mxu3 %v1427_v56  ;;  %v1441_v31 = vld [vmem:[#allocation2 + $0xe0] sm:$0xff] }
 0x189   :  { %1052 = vst.msk [vmem:[#allocation2 + $0xe8] sm:$0xff] %vm546_vm4, %v1048_v57  ;;  %v1429_v55 = vld [vmem:[#allocation2 + $0x80] sm:$0xff] }
 0x18a   :  { %1661 = vmatpush.msrb.mxu3 %v1426_v58 }
 0x18c   :  { %1662 = vmatpush.msrb.mxu3 %v1425_v59  ;;  %v1526_v59 = vld [vmem:[%s4006_s5 + $0x18] sm:$0xff] }
 0x18d   :  { %v940_v60 = vpop.f32.mrf.mxu2  ;;  %v1435_v40 = vld [vmem:[#allocation2 + $0xb0] sm:$0xff]  ;;  %1555 = vperm.xlu1 %2676, %v1526_v59   ;;  %v3830_v59 = vpop.permute.xlu0 %1590 }
 0x18e   :  { %944 = vst.msk [vmem:[#allocation2 + $0xb8] sm:$0xff] %vm546_vm4, %v940_v60  ;;  %v1156_v62 = vpop.f32.mrf.mxu3  ;;  %1663 = vmatpush.msrb.mxu3 %v1424_v61  ;;  %v1483_v60 = vld [vmem:[%s4009_s4 + $0xa0] sm:$0xff]  ;;  %v1468_v61 = vld [vmem:[%s4009_s4 + $0x28] sm:$0xff] }
 0x18f   :  { %1160 = vst.msk [vmem:[#allocation2 + $0x118] sm:$0xff] %vm546_vm4, %v1156_v62  ;;  %v1117_v63 = vpop.f32.mrf.mxu1  ;;  %v1438_v34 = vld [vmem:[#allocation2 + $0xc8] sm:$0xff] }
 0x190   :  { %1123 = vst.msk [vmem:[#allocation2 + $0x100] sm:$0xff] %vm546_vm4, %v1117_v63  ;;  %v1189_v1 = vpop.f32.mrf.mxu0  ;;  %1664 = vmatpush.msrb.mxu3 %v1423_v0  ;;  %v1442_v29 = vld [vmem:[#allocation2 + $0xe8] sm:$0xff]  ;;  %v1466_v0 = vld [vmem:[%s4009_s4 + $0x18] sm:$0xff] }
 0x191   :  { %1195 = vst.msk [vmem:[#allocation2 + $0x120] sm:$0xff] %vm546_vm4, %v1189_v1 }
 0x192   :  { %1665 = vmatpush.msrb.mxu3 %v1422_v2  ;;  %v1523_v2 = vld [vmem:[%s4006_s5] sm:$0xff] }
 0x194   :  { %1666 = vmatpush.msrb.mxu3 %v1421_v3 }
 0x195   :  { %v1081_v4 = vpop.f32.mrf.mxu2  ;;  %v1436_v38 = vld [vmem:[#allocation2 + $0xb8] sm:$0xff]  ;;  %1540 = vperm.xlu1 %2676, %v1523_v2   ;;  %v1941_v2 = vld [vmem:[%s4007_s7 + $0x40] sm:$0xff] }
 0x196   :  { %1087 = vst.msk [vmem:[#allocation2 + $0xf0] sm:$0xff] %vm546_vm4, %v1081_v4  ;;  %v1297_v8 = vpop.f32.mrf.mxu3  ;;  %1667 = vmatpush.msrb.mxu3 %v1420_v7  ;;  %v1487_v4 = vld [vmem:[%s4009_s4 + $0xc0] sm:$0xff]  ;;  %v1472_v7 = vld [vmem:[%s4009_s4 + $0x48] sm:$0xff] }
 0x197   :  { %1303 = vst.msk [vmem:[#allocation2 + $0x150] sm:$0xff] %vm546_vm4, %v1297_v8  ;;  %v1120_v9 = vpop.f32.mrf.mxu1 }
 0x198   :  { %1124 = vst.msk [vmem:[#allocation2 + $0x108] sm:$0xff] %vm546_vm4, %v1120_v9  ;;  %v1192_v11 = vpop.f32.mrf.mxu0  ;;  %1668 = vmatpush.msrb.mxu3 %v1419_v10  ;;  %v1470_v10 = vld [vmem:[%s4009_s4 + $0x38] sm:$0xff] }
 0x199   :  { %1196 = vst.msk [vmem:[#allocation2 + $0x128] sm:$0xff] %vm546_vm4, %v1192_v11  ;;  %v1535_v11 = vld [vmem:[%s4006_s5 + $0x60] sm:$0xff] }
 0x19a   :  { %1669 = vmatpush.msrb.mxu3 %v1418_v12  ;;  %1600 = vperm.xlu2 %2677, %v1535_v11   ;;  %v1938_v11 = vld [vmem:[%s4007_s7 + $0x28] sm:$0xff] }
 0x19c   :  { %1670 = vmatpush.msrb.mxu3 %v1417_v14 }
 0x19d   :  { %v1084_v15 = vpop.f32.mrf.mxu2  ;;  %v1443_v27 = vld [vmem:[#allocation2 + $0xf0] sm:$0xff]  ;;  %1986 = vperm.xlu1 %2676, %v1941_v2  }
 0x19e   :  { %1088 = vst.msk [vmem:[#allocation2 + $0xf8] sm:$0xff] %vm546_vm4, %v1084_v15  ;;  %v1300_v17 = vpop.f32.mrf.mxu3  ;;  %1671 = vmatpush.msrb.mxu3 %v1416_v16  ;;  %v1455_v1 = vld [vmem:[#allocation2 + $0x150] sm:$0xff]  ;;  %v1491_v15 = vld [vmem:[%s4009_s4 + $0xe0] sm:$0xff]  ;;  %v1476_v16 = vld [vmem:[%s4009_s4 + $0x68] sm:$0xff] }
 0x19f   :  { %1304 = vst.msk [vmem:[#allocation2 + $0x158] sm:$0xff] %vm546_vm4, %v1300_v17  ;;  %v1261_v18 = vpop.f32.mrf.mxu1  ;;  %v1449_v17 = vld [vmem:[#allocation2 + $0x120] sm:$0xff] }
 0x1a0   :  { %1267 = vst.msk [vmem:[#allocation2 + $0x140] sm:$0xff] %vm546_vm4, %v1261_v18  ;;  %v1333_v20 = vpop.f32.mrf.mxu0  ;;  %1672 = vmatpush.msrb.mxu3 %v1415_v19  ;;  %v1450_v14 = vld [vmem:[#allocation2 + $0x128] sm:$0xff]  ;;  %v1448_v18 = vld [vmem:[#allocation2 + $0x118] sm:$0xff] }
 0x1a1   :  { %1339 = vst.msk [vmem:[#allocation2 + $0x160] sm:$0xff] %vm546_vm4, %v1333_v20  ;;  %v1474_v19 = vld [vmem:[%s4009_s4 + $0x58] sm:$0xff] }
 0x1a2   :  { %1673 = vmatpush.msrb.mxu3 %v1414_v21  ;;  %v1534_v20 = vld [vmem:[%s4006_s5 + $0x58] sm:$0xff]  ;;  %v1447_v21 = vld [vmem:[#allocation2 + $0x110] sm:$0xff] }
 0x1a3   :  { %1595 = vperm.xlu2 %2677, %v1534_v20  }
 0x1a4   :  { %1674 = vmatpush.msrb.mxu3 %v1413_v23  ;;  %v1495_v23 = vld [vmem:[%s4009_s4 + $0x100] sm:$0xff] }
 0x1a5   :  { %1675 = vmatmul.f32.vlgmr.msrb.gmra.mxu3 %v1463_v22  ;;  %v1444_v25 = vld [vmem:[#allocation2 + $0xf8] sm:$0xff]  ;;  %v1446_v22 = vld [vmem:[#allocation2 + $0x108] sm:$0xff]  ;;  %1971 = vperm.xlu1 %2676, %v1938_v11  }
 0x1a6   :  { %v1225_v24 = vpop.f32.mrf.mxu2  ;;  %1721 = vmatpush.msra.mxu0 %v1444_v25  ;;  %v1456_v63 = vld [vmem:[#allocation2 + $0x158] sm:$0xff]  ;;  %v1445_v25 = vld [vmem:[#allocation2 + $0x100] sm:$0xff] }
 0x1a7   :  { %1231 = vst.msk [vmem:[#allocation2 + $0x130] sm:$0xff] %vm546_vm4, %v1225_v24  ;;  %v1453_v8 = vld [vmem:[#allocation2 + $0x140] sm:$0xff]  ;;  %v1480_v24 = vld [vmem:[%s4009_s4 + $0x88] sm:$0xff] }
 0x1a8   :  { %v1264_v26 = vpop.f32.mrf.mxu1  ;;  %1722 = vmatpush.msra.mxu0 %v1443_v27  ;;  %v1457_v62 = vld [vmem:[#allocation2 + $0x160] sm:$0xff]  ;;  %v1478_v27 = vld [vmem:[%s4009_s4 + $0x78] sm:$0xff] }
 0x1a9   :  { %1268 = vst.msk [vmem:[#allocation2 + $0x148] sm:$0xff] %vm546_vm4, %v1264_v26  ;;  %v1336_v13 = vpop.f32.mrf.mxu0  ;;  %v1465_v26 = vld [vmem:[%s4009_s4 + $0x10] sm:$0xff] }
 0x1aa   :  { %1340 = vst.msk [vmem:[#allocation2 + $0x168] sm:$0xff] %vm546_vm4, %v1336_v13  ;;  %1723 = vmatpush.msra.mxu0 %v1442_v29  ;;  %v1531_v13 = vld [vmem:[%s4006_s5 + $0x40] sm:$0xff]  ;;  %v1484_v29 = vld [vmem:[%s4009_s4 + $0xa8] sm:$0xff] }
 0x1ab   :  { %1580 = vperm.xlu2 %2677, %v1531_v13  }
 0x1ac   :  { %1724 = vmatpush.msra.mxu0 %v1441_v31  ;;  %v1482_v31 = vld [vmem:[%s4009_s4 + $0x98] sm:$0xff] }
 0x1ad   :  { %1678 = vmatmul.f32.gmra.mxu3 %v1467_v30  ;;  %v1469_v30 = vld [vmem:[%s4009_s4 + $0x30] sm:$0xff] }
 0x1ae   :  { %v1228_v5 = vpop.f32.mrf.mxu2  ;;  %1725 = vmatpush.msra.mxu0 %v1440_v6  ;;  %v1451_v12 = vld [vmem:[#allocation2 + $0x130] sm:$0xff]  ;;  %v1503_v6 = vld [vmem:[%s4009_s4 + $0x140] sm:$0xff] }
 0x1af   :  { %1232 = vst.msk [vmem:[#allocation2 + $0x138] sm:$0xff] %vm546_vm4, %v1228_v5  ;;  %v1528_v5 = vld [vmem:[%s4006_s5 + $0x28] sm:$0xff] }
 0x1b0   :  { %v1405_v44 = vpop.f32.mrf.mxu1  ;;  %1726 = vmatpush.msra.mxu0 %v1439_v32  ;;  %v1454_v3 = vld [vmem:[#allocation2 + $0x148] sm:$0xff]  ;;  %v1473_v32 = vld [vmem:[%s4009_s4 + $0x50] sm:$0xff] }
 0x1b1   :  { %1411 = vst.msk [vmem:[#allocation2 + $0x180] sm:$0xff] %vm546_vm4, %v1405_v44  ;;  %v1458_v58 = vld [vmem:[#allocation2 + $0x168] sm:$0xff] }
 0x1b2   :  { %1727 = vmatpush.msra.mxu0 %v1438_v34  ;;  %v1488_v44 = vld [vmem:[%s4009_s4 + $0xc8] sm:$0xff]  ;;  %v1525_v34 = vld [vmem:[%s4006_s5 + $0x10] sm:$0xff] }
 0x1b3   :  { %1565 = vperm.xlu2 %2677, %v1528_v5   ;;  %v1940_v5 = vld [vmem:[%s4007_s7 + $0x38] sm:$0xff] }
 0x1b4   :  { %1728 = vmatpush.msra.mxu0 %v1437_v36  ;;  %v1477_v36 = vld [vmem:[%s4009_s4 + $0x70] sm:$0xff] }
 0x1b5   :  { %1681 = vmatmul.f32.gmra.mxu3 %v1471_v35  ;;  %v1492_v35 = vld [vmem:[%s4009_s4 + $0xe8] sm:$0xff] }
 0x1b6   :  { %v1369_v37 = vpop.f32.mrf.mxu2  ;;  %1729 = vmatpush.msra.mxu0 %v1436_v38  ;;  %v1452_v9 = vld [vmem:[#allocation2 + $0x138] sm:$0xff]  ;;  %v1496_v38 = vld [vmem:[%s4009_s4 + $0x108] sm:$0xff] }
 0x1b7   :  { %1375 = vst.msk [vmem:[#allocation2 + $0x170] sm:$0xff] %vm546_vm4, %v1369_v37  ;;  %v1490_v37 = vld [vmem:[%s4009_s4 + $0xd8] sm:$0xff] }
 0x1b8   :  { %v1408_v39 = vpop.f32.mrf.mxu1  ;;  %1730 = vmatpush.msra.mxu0 %v1435_v40  ;;  %v3656_v52 = vld [vmem:[#allocation2 + $0x180] sm:$0xff]  ;;  %v1494_v40 = vld [vmem:[%s4009_s4 + $0xf8] sm:$0xff] }
 0x1b9   :  { %1412 = vst.msk [vmem:[#allocation2 + $0x188] sm:$0xff] %vm546_vm4, %v1408_v39  ;;  %v1481_v39 = vld [vmem:[%s4009_s4 + $0x90] sm:$0xff] }
 0x1ba   :  { %1731 = vmatpush.msra.mxu0 %v1434_v42  ;;  %v1485_v42 = vld [vmem:[%s4009_s4 + $0xb0] sm:$0xff] }
 0x1bb   :  { %1550 = vperm.xlu2 %2677, %v1525_v34  }
 0x1bc   :  { %1732 = vmatpush.msra.mxu0 %v1433_v45  ;;  %v1504_v45 = vld [vmem:[%s4009_s4 + $0x148] sm:$0xff] }
 0x1bd   :  { %1684 = vmatmul.f32.gmra.mxu3 %v1475_v43  ;;  %v1498_v43 = vld [vmem:[%s4009_s4 + $0x118] sm:$0xff] }
 0x1be   :  { %v1372_v46 = vpop.f32.mrf.mxu2  ;;  %1733 = vmatpush.msra.mxu0 %v1432_v47  ;;  %v1459_v57 = vld [vmem:[#allocation2 + $0x170] sm:$0xff]  ;;  %v1502_v47 = vld [vmem:[%s4009_s4 + $0x138] sm:$0xff] }
 0x1bf   :  { %1376 = vst.msk [vmem:[#allocation2 + $0x178] sm:$0xff] %vm546_vm4, %v1372_v46  ;;  %v1489_v46 = vld [vmem:[%s4009_s4 + $0xd0] sm:$0xff] }
 0x1c0   :  { %v3650_v49 = vld [vmem:[#allocation2 + $0x188] sm:$0xff]  ;;  %1734 = vmatpush.msra.mxu0 %v1431_v48  ;;  %v1507_v48 = vld [vmem:[%s4009_s4 + $0x160] sm:$0xff] }
 0x1c1   :  { %1859 = vmatpush.msra.mxu1 %v3650_v49 }
 0x1c2   :  { %1735 = vmatpush.msra.mxu0 %v1430_v51  ;;  %v1506_v51 = vld [vmem:[%s4009_s4 + $0x158] sm:$0xff] }
 0x1c3   :  { %1860 = vmatpush.msra.mxu1 %v3656_v52  ;;  %v3803_v50 = vpop.permute.xlu1 %1610 }
 0x1c4   :  { %1736 = vmatpush.msra.mxu0 %v1429_v55  ;;  %2605 = vmatmul.msk.f32.vlgmr.msra.gmra.mxu1 %vm1613_vm5, %v1466_v0  ;;  %v1516_v0 = vld [vmem:[%s4009_s4 + $0x1a8] sm:$0xff] }
 0x1c5   :  { %1687 = vmatmul.f32.gmra.mxu3 %v1479_v53  ;;  %1737 = vmatmul.f32.vlgmr.msra.gmra.mxu0 %v1464_v54  ;;  %v1508_v53 = vld [vmem:[%s4009_s4 + $0x168] sm:$0xff]  ;;  %v1497_v54 = vld [vmem:[%s4009_s4 + $0x110] sm:$0xff] }
 0x1c6   :  { %v1460_v56 = vld [vmem:[#allocation2 + $0x178] sm:$0xff] }
 0x1c7   :  { %1783 = vmatpush.msra.mxu2 %v1460_v56  ;;  %v1510_v56 = vld [vmem:[%s4009_s4 + $0x178] sm:$0xff] }
 0x1c9   :  { %1784 = vmatpush.msra.mxu2 %v1459_v57  ;;  %v1515_v57 = vld [vmem:[%s4009_s4 + $0x1a0] sm:$0xff] }
 0x1cb   :  { %1785 = vmatpush.msra.mxu2 %v1458_v58  ;;  %v1512_v58 = vld [vmem:[%s4009_s4 + $0x188] sm:$0xff] }
 0x1cc   :  { %2606 = vmatmul.msk.f32.gmra.mxu1 %vm1613_vm5, %v1470_v10 }
 0x1cd   :  { %1786 = vmatpush.msra.mxu2 %v1457_v62  ;;  %1690 = vmatmul.f32.gmra.mxu3 %v1483_v60  ;;  %v1501_v60 = vld [vmem:[%s4009_s4 + $0x130] sm:$0xff] }
 0x1ce   :  { %1740 = vmatmul.f32.gmra.mxu0 %v1468_v61 }
 0x1cf   :  { %1787 = vmatpush.msra.mxu2 %v1456_v63  ;;  %v1519_v63 = vld [vmem:[%s4009_s4 + $0x1c0] sm:$0xff] }
 0x1d1   :  { %1788 = vmatpush.msra.mxu2 %v1455_v1 }
 0x1d3   :  { %1789 = vmatpush.msra.mxu2 %v1454_v3  ;;  %v1505_v3 = vld [vmem:[%s4009_s4 + $0x150] sm:$0xff] }
 0x1d4   :  { %2607 = vmatmul.msk.f32.gmra.mxu1 %vm1613_vm5, %v1474_v19  ;;  %v3818_v55 = vpop.permute.xlu1 %1605  ;;  %v1935_v19 = vld [vmem:[%s4007_s7 + $0x10] sm:$0xff] }
 0x1d5   :  { %1790 = vmatpush.msra.mxu2 %v1453_v8  ;;  %1693 = vmatmul.f32.gmra.mxu3 %v1487_v4 }
 0x1d6   :  { %1743 = vmatmul.f32.gmra.mxu0 %v1472_v7  ;;  %v3853_v7 = vpop.permute.xlu0 %1575  ;;  %1956 = vperm.xlu1 %2676, %v1935_v19  }
 0x1d7   :  { %1791 = vmatpush.msra.mxu2 %v1452_v9  ;;  %v1520_v9 = vld [vmem:[%s4009_s4 + $0x1c8] sm:$0xff] }
 0x1d9   :  { %1792 = vmatpush.msra.mxu2 %v1451_v12  ;;  %v1509_v12 = vld [vmem:[%s4009_s4 + $0x170] sm:$0xff] }
 0x1db   :  { %1793 = vmatpush.msra.mxu2 %v1450_v14 }
 0x1dc   :  { %2608 = vmatmul.msk.f32.gmra.mxu1 %vm1613_vm5, %v1478_v27 }
 0x1dd   :  { %1794 = vmatpush.msra.mxu2 %v1449_v17  ;;  %1696 = vmatmul.f32.gmra.mxu3 %v1491_v15 }
 0x1de   :  { %1746 = vmatmul.f32.gmra.mxu0 %v1476_v16  ;;  %v1561_v15 = vpop.permute.xlu0 %1560 }
 0x1df   :  { %1795 = vmatpush.msra.mxu2 %v1448_v18  ;;  %v1513_v18 = vld [vmem:[%s4009_s4 + $0x190] sm:$0xff] }
 0x1e1   :  { %1796 = vmatpush.msra.mxu2 %v1447_v21 }
 0x1e3   :  { %1797 = vmatpush.msra.mxu2 %v1446_v22 }
 0x1e4   :  { %2609 = vmatmul.msk.f32.gmra.mxu1 %vm1613_vm5, %v1482_v31  ;;  %v3835_v61 = vpop.permute.xlu1 %1585 }
 0x1e5   :  { %1798 = vmatpush.msra.mxu2 %v1445_v25  ;;  %1699 = vmatmul.f32.gmra.mxu3 %v1495_v23  ;;  %v1943_v23 = vld [vmem:[%s4007_s7 + $0x50] sm:$0xf] }
 0x1e6   :  { %1749 = vmatmul.f32.gmra.mxu0 %v1480_v24  ;;  %1799 = vmatmul.f32.vlgmr.msra.gmra.mxu2 %v1465_v26  ;;  %v1546_v24 = vpop.permute.xlu0 %1545 }
 0x1e7   :  { %2672 = vmatpush.msrb.mxu2 %v3650_v49  ;;  %v1493_v49 = vld [vmem:[%s4009_s4 + $0xf0] sm:$0xff]  ;;  %1996 = vperm.xlu2 %2677, %v1943_v23  }
 0x1e9   :  { %2673 = vmatpush.msrb.mxu2 %v3656_v52  ;;  %v1511_v52 = vld [vmem:[%s4009_s4 + $0x180] sm:$0xff] }
 0x1ec   :  { %2610 = vmatmul.msk.f32.gmra.mxu1 %vm1613_vm5, %v1486_v33  ;;  %v1937_v33 = vld [vmem:[%s4007_s7 + $0x20] sm:$0xff] }
 0x1ed   :  { %1702 = vmatmul.f32.gmra.mxu3 %v1499_v28  ;;  %v1517_v28 = vld [vmem:[%s4009_s4 + $0x1b0] sm:$0xff] }
 0x1ee   :  { %1752 = vmatmul.f32.gmra.mxu0 %v1484_v29  ;;  %1802 = vmatmul.f32.gmra.mxu2 %v1469_v30  ;;  %v2096_v29 = vld [vmem:[%s4010_s9] sm:$0xff] }
 0x1ef   :  { %2100 = vperm.xlu1 %2676, %v2096_v29   ;;  %1981 = vperm.xlu2 %2677, %v1940_v5  }
 0x1f3   :  { %v3851_v4 = vpop.permute.xlu1 %1570 }
 0x1f4   :  { %2611 = vmatmul.msk.f32.gmra.mxu1 %vm1613_vm5, %v1490_v37  ;;  %v3843_v1 = vpop.permute.xlu2 %1600 }
 0x1f5   :  { %1705 = vmatmul.f32.gmra.mxu3 %v1503_v6 }
 0x1f6   :  { %1755 = vmatmul.f32.gmra.mxu0 %v1488_v44  ;;  %1805 = vmatmul.f32.gmra.mxu2 %v1473_v32  ;;  %v1521_v44 = vld [vmem:[%s4009_s4 + $0x1d0] sm:$0xff] }
 0x1f7   :  { %1966 = vperm.xlu2 %2677, %v1937_v33  }
 0x1fc   :  { %2612 = vmatmul.msk.f32.gmra.mxu1 %vm1613_vm5, %v1494_v40  ;;  %v1934_v40 = vld [vmem:[%s4007_s7 + $0x8] sm:$0xff] }
 0x1fd   :  { %1708 = vmatmul.f32.gmra.mxu3 %v1507_v48  ;;  %v3858_v10 = vpop.permute.xlu2 %1595  ;;  %v1518_v48 = vld [vmem:[%s4009_s4 + $0x1b8] sm:$0xff] }
 0x1fe   :  { %1758 = vmatmul.f32.gmra.mxu0 %v1492_v35  ;;  %1808 = vmatmul.f32.gmra.mxu2 %v1477_v36 }
 0x1ff   :  { %v1556_v14 = vpop.permute.xlu1 %1555  ;;  %1951 = vperm.xlu2 %2677, %v1934_v40  }
 0x204   :  { %2613 = vmatmul.msk.f32.gmra.mxu1 %vm1613_vm5, %v1498_v43 }
 0x205   :  { %1711 = vmatmul.f32.gmra.mxu3 %v1511_v52  ;;  %v3872_v20 = vpop.permute.xlu2 %1580 }
 0x206   :  { %1761 = vmatmul.f32.gmra.mxu0 %v1496_v38  ;;  %1811 = vmatmul.f32.gmra.mxu2 %v1481_v39  ;;  %v1514_v39 = vld [vmem:[%s4009_s4 + $0x198] sm:$0xff] }
 0x207   :  { %v1541_v21 = vpop.permute.xlu1 %1540 }
 0x20c   :  { %2614 = vmatmul.msk.f32.gmra.mxu1 %vm1613_vm5, %v1502_v47 }
 0x20d   :  { %1714 = vmatmul.f32.gmra.mxu3 %v1515_v57  ;;  %v1566_v31 = vpop.permute.xlu2 %1565 }
 0x20e   :  { %1764 = vmatmul.f32.gmra.mxu0 %v1500_v41  ;;  %1814 = vmatmul.f32.gmra.mxu2 %v1485_v42 }
 0x214   :  { %2615 = vmatmul.msk.f32.gmra.mxu1 %vm1613_vm5, %v1506_v51 }
 0x215   :  { %1717 = vmatmul.f32.gmra.mxu3 %v1519_v63  ;;  %v1551_v32 = vpop.permute.xlu2 %1550 }
 0x216   :  { %1767 = vmatmul.f32.gmra.mxu0 %v1504_v45  ;;  %1817 = vmatmul.f32.gmra.mxu2 %v1489_v46 }
 0x21c   :  { %2616 = vmatmul.msk.f32.gmra.mxu1 %vm1613_vm5, %v1510_v56  ;;  %v1522_v56 = vld [vmem:[%s4009_s4 + $0x1d8] sm:$0xff] }
 0x21e   :  { %1820 = vmatmul.f32.gmra.mxu2 %v1493_v49  ;;  %1770 = vmatmul.f32.gmra.mxu0 %v1508_v53  ;;  %v2097_v49 = vld [vmem:[%s4010_s9 + $0x8] sm:$0x3] }
 0x21f   :  { %2105 = vperm.xlu2 %2677, %v2097_v49  }
 0x226   :  { %1823 = vmatmul.f32.gmra.mxu2 %v1497_v54  ;;  %1773 = vmatmul.f32.gmra.mxu0 %v1512_v58 }
 0x228   :  { %v1676_v62 = vpop.f32.mrf.mxu3 }
 0x229   :  { %v1677_v22 = vadd.f32 %v1676_v62, %v1541_v21 }
 0x22e   :  { %1826 = vmatmul.f32.gmra.mxu2 %v1501_v60  ;;  %1776 = vmatmul.f32.gmra.mxu0 %v1516_v0 }
 0x230   :  { %v1679_v8 = vpop.f32.mrf.mxu3 }
 0x231   :  { %v1680_v25 = vadd.f32 %v1679_v8, %v1546_v24 }
 0x236   :  { %1829 = vmatmul.f32.gmra.mxu2 %v1505_v3  ;;  %1779 = vmatmul.f32.gmra.mxu0 %v1520_v9 }
 0x238   :  { %v1682_v17 = vpop.f32.mrf.mxu3 }
 0x239   :  { %v1683_v34 = vadd.f32 %v1682_v17, %v1551_v32 }
 0x23e   :  { %1832 = vmatmul.f32.gmra.mxu2 %v1509_v12 }
 0x240   :  { %v1685_v30 = vpop.f32.mrf.mxu3 }
 0x241   :  { %v1686_v38 = vadd.f32 %v1685_v30, %v1556_v14  ;;  %v1862_v43 = vpop.f32.mrf.mxu1 }
 0x242   :  { %v1738_v16 = vpop.f32.mrf.mxu0 }
 0x243   :  { %v1739_v26 = vadd.f32 %v1738_v16, %v1677_v22 }
 0x246   :  { %1835 = vmatmul.f32.gmra.mxu2 %v1513_v18 }
 0x248   :  { %v1688_v35 = vpop.f32.mrf.mxu3 }
 0x249   :  { %v1689_v42 = vadd.f32 %v1688_v35, %v1561_v15  ;;  %v1865_v57 = vpop.f32.mrf.mxu1 }
 0x24b   :  { %v1741_v27 = vpop.f32.mrf.mxu0 }
 0x24c   :  { %v1742_v13 = vadd.f32 %v1741_v27, %v1680_v25 }
 0x24e   :  { %1838 = vmatmul.f32.gmra.mxu2 %v1517_v28 }
 0x250   :  { %v1691_v45 = vpop.f32.mrf.mxu3 }
 0x251   :  { %v1692_v54 = vadd.f32 %v1691_v45, %v1566_v31  ;;  %v1868_v11 = vpop.f32.mrf.mxu1 }
 0x253   :  { %v1744_v6 = vpop.f32.mrf.mxu0 }
 0x254   :  { %v1745_v36 = vadd.f32 %v1744_v6, %v1683_v34 }
 0x256   :  { %1841 = vmatmul.f32.gmra.mxu2 %v1521_v44 }
 0x258   :  { %v1694_v58 = vpop.f32.mrf.mxu3 }
 0x259   :  { %v1695_v63 = vadd.f32 %v1694_v58, %v3851_v4  ;;  %v1871_v21 = vpop.f32.mrf.mxu1 }
 0x25b   :  { %v1747_v37 = vpop.f32.mrf.mxu0 }
 0x25c   :  { %v1748_v41 = vadd.f32 %v1747_v37, %v1686_v38 }
 0x25e   :  { %2617 = vmatmul.msk.f32.vlgmr.msrb.gmra.mxu2 %vm1613_vm5, %v1514_v39 }
 0x260   :  { %v1697_v12 = vpop.f32.mrf.mxu3 }
 0x261   :  { %v1698_v14 = vadd.f32 %v1697_v12, %v3853_v7  ;;  %v1874_v25 = vpop.f32.mrf.mxu1 }
 0x263   :  { %v1750_v46 = vpop.f32.mrf.mxu0 }
 0x264   :  { %v1751_v47 = vadd.f32 %v1750_v46, %v1689_v42 }
 0x266   :  { %2618 = vmatmul.msk.f32.gmra.mxu2 %vm1613_vm5, %v1518_v48 }
 0x268   :  { %v1700_v6 = vpop.f32.mrf.mxu3 }
 0x269   :  { %v1800_v51 = vpop.f32.mrf.mxu2  ;;  %v3928_v34 = vpop.f32.mrf.mxu1 }
 0x26a   :  { %v1801_v52 = vadd.f32 %v1800_v51, %v1739_v26 }
 0x26b   :  { %v1753_v53 = vpop.f32.mrf.mxu0 }
 0x26c   :  { %v3909_v60 = vadd.f32 %v1862_v43, %v1801_v52  ;;  %v1754_v62 = vadd.f32 %v1753_v53, %v1692_v54 }
 0x26e   :  { %2619 = vmatmul.msk.f32.gmra.mxu2 %vm1613_vm5, %v1522_v56 }
 0x270   :  { %v1703_v33 = vpop.f32.mrf.mxu3 }
 0x271   :  { %v1803_v0 = vpop.f32.mrf.mxu2  ;;  %v1880_v38 = vpop.f32.mrf.mxu1 }
 0x272   :  { %v1804_v2 = vadd.f32 %v1803_v0, %v1742_v13 }
 0x273   :  { %v1756_v3 = vpop.f32.mrf.mxu0 }
 0x274   :  { %v1757_v8 = vadd.f32 %v1756_v3, %v1695_v63  ;;  %v3913_v9 = vadd.f32 %v1865_v57, %v1804_v2 }
 0x278   :  { %v1706_v37 = vpop.f32.mrf.mxu3 }
 0x279   :  { %v1806_v15 = vpop.f32.mrf.mxu2  ;;  %v1883_v43 = vpop.f32.mrf.mxu1 }
 0x27a   :  { %v1807_v16 = vadd.f32 %v1806_v15, %v1745_v36 }
 0x27b   :  { %v1759_v17 = vpop.f32.mrf.mxu0 }
 0x27c   :  { %v1760_v18 = vadd.f32 %v1759_v17, %v1698_v14  ;;  %v3916_v19 = vadd.f32 %v1868_v11, %v1807_v16  ;;  %v1704_v14 = vadd.f32 %v1703_v33, %v3835_v61  ;;  %v1707_v17 = vadd.f32 %v1706_v37, %v3830_v59 }
 0x281   :  { %v1809_v22 = vpop.f32.mrf.mxu2  ;;  %v1886_v48 = vpop.f32.mrf.mxu1 }
 0x282   :  { %v1810_v23 = vadd.f32 %v1809_v22, %v1748_v41  ;;  %v1709_v41 = vpop.f32.mrf.mxu3 }
 0x283   :  { %v1762_v44 = vpop.f32.mrf.mxu0  ;;  %v1710_v3 = vadd.f32 %v1709_v41, %v3858_v10 }
 0x284   :  { %v3918_v4 = vadd.f32 %v1871_v21, %v1810_v23 }
 0x289   :  { %v1812_v24 = vpop.f32.mrf.mxu2  ;;  %v1889_v53 = vpop.f32.mrf.mxu1 }
 0x28a   :  { %v1813_v26 = vadd.f32 %v1812_v24, %v1751_v47  ;;  %v1712_v46 = vpop.f32.mrf.mxu3 }
 0x28b   :  { %v1765_v35 = vpop.f32.mrf.mxu0 }
 0x28c   :  { %v3920_v27 = vadd.f32 %v1874_v25, %v1813_v26  ;;  %v1766_v22 = vadd.f32 %v1765_v35, %v1704_v14 }
 0x291   :  { %v1815_v13 = vpop.f32.mrf.mxu2  ;;  %v1892_v58 = vpop.f32.mrf.mxu1 }
 0x292   :  { %v3922_v28 = vadd.f32 %v1815_v13, %v1754_v62  ;;  %v1715_v52 = vpop.f32.mrf.mxu3 }
 0x293   :  { %v1768_v40 = vpop.f32.mrf.mxu0  ;;  %v1716_v62 = vadd.f32 %v1715_v52, %v3818_v55  ;;  %v1930_v52 = vld [vmem:[%s4011_s6 + $0x40] sm:$0xff] }
 0x299   :  { %v1818_v7 = vpop.f32.mrf.mxu2 }
 0x29a   :  { %v3924_v29 = vadd.f32 %v1818_v7, %v1757_v8  ;;  %v1718_v57 = vpop.f32.mrf.mxu3  ;;  %v1713_v8 = vadd.f32 %v1712_v46, %v3843_v1  ;;  %v1895_v1 = vpop.f32.mrf.mxu1 }
 0x29b   :  { %v1771_v45 = vpop.f32.mrf.mxu0  ;;  %v1719_v63 = vadd.f32 %v1718_v57, %v3803_v50  ;;  %v1769_v50 = vadd.f32 %v1768_v40, %v1707_v17 }
 0x29c   :  { %v1772_v15 = vadd.f32 %v1771_v45, %v1710_v3 }
 0x2a1   :  { %v1821_v30 = vpop.f32.mrf.mxu2 }
 0x2a2   :  { %v3926_v31 = vadd.f32 %v1821_v30, %v1760_v18  ;;  %v1701_v18 = vadd.f32 %v1700_v6, %v3872_v20 }
 0x2a3   :  { %v1774_v49 = vpop.f32.mrf.mxu0 }
 0x2a4   :  { %v1775_v16 = vadd.f32 %v1774_v49, %v1713_v8  ;;  %v1763_v13 = vadd.f32 %v1762_v44, %v1701_v18 }
 0x2a9   :  { %v1824_v5 = vpop.f32.mrf.mxu2 }
 0x2aa   :  { %v1825_v59 = vadd.f32 %v1824_v5, %v1763_v13  ;;  %v1878_v5 = vadd.f32 %v3928_v34, %v3922_v28  ;;  %v1907_v28 = vmax.f32 %v3909_v60, 0.0  ;;  %v1922_v34 = vld [vmem:[%s4011_s6] sm:$0xff]  ;;  %v1925_v60 = vld [vmem:[%s4011_s6 + $0x18] sm:$0xff] }
 0x2ab   :  { %v1777_v54 = vpop.f32.mrf.mxu0 }
 0x2ac   :  { %v1778_v11 = vadd.f32 %v1777_v54, %v1716_v62  ;;  %v1912_v49 = vmax.f32 %v1878_v5, 0.0  ;;  %v1932_v54 = vld [vmem:[%s4011_s6 + $0x50] sm:$0xf]  ;;  %v2094_v5 = vld [vmem:[%s4012_s8] sm:$0xff] }
 0x2b1   :  { %v1827_v32 = vpop.f32.mrf.mxu2 }
 0x2b2   :  { %v1828_v33 = vadd.f32 %v1827_v32, %v1766_v22 }
 0x2b3   :  { %v1780_v0 = vpop.f32.mrf.mxu0 }
 0x2b4   :  { %v1781_v12 = vadd.f32 %v1780_v0, %v1719_v63  ;;  %v1890_v35 = vadd.f32 %v1889_v53, %v1828_v33  ;;  %v1931_v53 = vld [vmem:[%s4011_s6 + $0x48] sm:$0xff] }
 0x2b6   :  { %v1916_v44 = vmax.f32 %v1890_v35, 0.0 }
 0x2b9   :  { %v1830_v36 = vpop.f32.mrf.mxu2 }
 0x2ba   :  { %v1831_v7 = vadd.f32 %v1830_v36, %v1769_v50  ;;  %v1881_v36 = vadd.f32 %v1880_v38, %v3924_v29  ;;  %v1908_v29 = vmax.f32 %v3913_v9, 0.0  ;;  %v1924_v9 = vld [vmem:[%s4011_s6 + $0x10] sm:$0xff] }
 0x2bb   :  { %v1928_v38 = vld [vmem:[%s4011_s6 + $0x30] sm:$0xff] }
 0x2bc   :  { %v1893_v20 = vadd.f32 %v1892_v58, %v1831_v7 }
 0x2be   :  { %v1917_v40 = vmax.f32 %v1893_v20, 0.0 }
 0x2c1   :  { %v1833_v39 = vpop.f32.mrf.mxu2 }
 0x2c2   :  { %v1834_v24 = vadd.f32 %v1833_v39, %v1772_v15  ;;  %v1887_v39 = vadd.f32 %v1886_v48, %v1825_v59  ;;  %v1911_v48 = vmax.f32 %v3920_v27, 0.0  ;;  %v1927_v27 = vld [vmem:[%s4011_s6 + $0x28] sm:$0xff]  ;;  %v1987_v15 = vpop.permute.xlu1 %1986 }
 0x2c4   :  { %v1896_v41 = vadd.f32 %v1895_v1, %v1834_v24  ;;  %v1915_v32 = vmax.f32 %v1887_v39, 0.0 }
 0x2c6   :  { %v1918_v37 = vmax.f32 %v1896_v41, 0.0 }
 0x2c9   :  { %v1836_v42 = vpop.f32.mrf.mxu2 }
 0x2ca   :  { %v1837_v25 = vadd.f32 %v1836_v42, %v1775_v16  ;;  %v1884_v42 = vadd.f32 %v1883_v43, %v3926_v31  ;;  %v1910_v31 = vmax.f32 %v3918_v4, 0.0  ;;  %v1909_v43 = vmax.f32 %v3916_v19, 0.0  ;;  %v1923_v4 = vld [vmem:[%s4011_s6 + $0x8] sm:$0xff]  ;;  %v1926_v19 = vld [vmem:[%s4011_s6 + $0x20] sm:$0xff] }
 0x2cc   :  { %v1914_v46 = vmax.f32 %v1884_v42, 0.0 }
 0x2d1   :  { %v1839_v47 = vpop.f32.mrf.mxu2 }
 0x2d2   :  { %v1840_v21 = vadd.f32 %v1839_v47, %v1778_v11  ;;  %v1913_v47 = vmax.f32 %v1881_v36, 0.0  ;;  %v1997_v11 = vpop.permute.xlu2 %1996 }
 0x2d9   :  { %v1842_v51 = vpop.f32.mrf.mxu2 }
 0x2da   :  { %v1843_v55 = vadd.f32 %v1842_v51, %v1781_v12  ;;  %v1929_v51 = vld [vmem:[%s4011_s6 + $0x38] sm:$0xff]  ;;  %v1992_v12 = vpop.permute.xlu0 %1991  ;;  %v1982_v16 = vpop.permute.xlu2 %1981 }
 0x2e1   :  { %v1898_v56 = vpop.f32.mrf.mxu2 }
 0x2e2   :  { %v1899_v30 = vadd.f32 %v1898_v56, %v1837_v25  ;;  %v1977_v17 = vpop.permute.xlu0 %1976 }
 0x2e4   :  { %v1919_v6 = vmax.f32 %v1899_v30, 0.0 }
 0x2e9   :  { %v1901_v2 = vpop.f32.mrf.mxu2 }
 0x2ea   :  { %v1902_v10 = vadd.f32 %v1901_v2, %v1840_v21  ;;  %v1962_v13 = vpop.permute.xlu0 %1961 }
 0x2ec   :  { %v1920_v45 = vmax.f32 %v1902_v10, 0.0  ;;  %v1967_v10 = vpop.permute.xlu2 %1966 }
 0x2f1   :  { %v1904_v23 = vpop.f32.mrf.mxu2 }
 0x2f2   :  { %v1905_v26 = vadd.f32 %v1904_v23, %v1843_v55  ;;  %v1972_v23 = vpop.permute.xlu1 %1971 }
 0x2f4   :  { %v1921_v61 = vmax.f32 %v1905_v26, 0.0  ;;  %v1952_v35 = vpop.permute.xlu2 %1951 }
 0x2f6   :  { %2034 = vmatpush.msrb.mxu1 %v1921_v61 }
 0x2f8   :  { %2035 = vmatpush.msrb.mxu1 %v1920_v45 }
 0x2fa   :  { %2036 = vmatpush.msrb.mxu1 %v1919_v6  ;;  %v1957_v59 = vpop.permute.xlu1 %1956 }
 0x2fc   :  { %2037 = vmatpush.msrb.mxu1 %v1918_v37 }
 0x2fe   :  { %2038 = vmatpush.msrb.mxu1 %v1917_v40  ;;  %v1947_v40 = vpop.permute.xlu0 %1946 }
 0x300   :  { %2039 = vmatpush.msrb.mxu1 %v1916_v44 }
 0x302   :  { %2040 = vmatpush.msrb.mxu1 %v1915_v32 }
 0x304   :  { %2041 = vmatpush.msrb.mxu1 %v1914_v46  ;;  %v2095_v46 = vld [vmem:[%s4012_s8 + $0x8] sm:$0x3] }
 0x306   :  { %2042 = vmatpush.msrb.mxu1 %v1913_v47  ;;  %v2101_v47 = vpop.permute.xlu1 %2100 }
 0x308   :  { %2043 = vmatpush.msrb.mxu1 %v1912_v49 }
 0x30a   :  { %2044 = vmatpush.msrb.mxu1 %v1911_v48 }
 0x30c   :  { %2045 = vmatpush.msrb.mxu1 %v1910_v31  ;;  %v2106_v31 = vpop.permute.xlu2 %2105 }
 0x30e   :  { %2046 = vmatpush.msrb.mxu1 %v1909_v43 }
 0x310   :  { %2047 = vmatpush.msrb.mxu1 %v1908_v29 }
 0x312   :  { %2048 = vmatpush.msrb.mxu1 %v1907_v28 }
 0x313   :  { %2620 = vmatmul.msk.f32.vlgmr.msrb.gmra.mxu1 %vm1999_vm6, %v1922_v34 }
 0x31b   :  { %2621 = vmatmul.msk.f32.gmra.mxu1 %vm1999_vm6, %v1923_v4 }
 0x323   :  { %2622 = vmatmul.msk.f32.gmra.mxu1 %vm1999_vm6, %v1924_v9 }
 0x32b   :  { %2623 = vmatmul.msk.f32.gmra.mxu1 %vm1999_vm6, %v1925_v60 }
 0x333   :  { %2624 = vmatmul.msk.f32.gmra.mxu1 %vm1999_vm6, %v1926_v19 }
 0x33b   :  { %2625 = vmatmul.msk.f32.gmra.mxu1 %vm1999_vm6, %v1927_v27 }
 0x343   :  { %2626 = vmatmul.msk.f32.gmra.mxu1 %vm1999_vm6, %v1928_v38 }
 0x34b   :  { %2627 = vmatmul.msk.f32.gmra.mxu1 %vm1999_vm6, %v1929_v51 }
 0x353   :  { %2628 = vmatmul.msk.f32.gmra.mxu1 %vm1999_vm6, %v1930_v52 }
 0x35b   :  { %2629 = vmatmul.msk.f32.gmra.mxu1 %vm1999_vm6, %v1931_v53 }
 0x363   :  { %2630 = vmatmul.msk.f32.gmra.mxu1 %vm1999_vm6, %v1932_v54 }
 0x390   :  { %v2050_v56 = vpop.f32.mrf.mxu1 }
 0x391   :  { %v2051_v42 = vadd.f32 %v2050_v56, %v1947_v40 }
 0x393   :  { %v2083_v32 = vmax.f32 %v2051_v42, 0.0 }
 0x398   :  { %v2053_v57 = vpop.f32.mrf.mxu1 }
 0x399   :  { %v2054_v37 = vadd.f32 %v2053_v57, %v1952_v35 }
 0x39b   :  { %v2084_v36 = vmax.f32 %v2054_v37, 0.0 }
 0x3a0   :  { %v2056_v58 = vpop.f32.mrf.mxu1 }
 0x3a1   :  { %v2057_v20 = vadd.f32 %v2056_v58, %v1957_v59 }
 0x3a3   :  { %v2085_v44 = vmax.f32 %v2057_v20, 0.0 }
 0x3a8   :  { %v2059_v62 = vpop.f32.mrf.mxu1 }
 0x3a9   :  { %v2060_v41 = vadd.f32 %v2059_v62, %v1962_v13 }
 0x3ab   :  { %v2086_v39 = vmax.f32 %v2060_v41, 0.0 }
 0x3b0   :  { %v2062_v63 = vpop.f32.mrf.mxu1 }
 0x3b1   :  { %v2063_v61 = vadd.f32 %v2062_v63, %v1967_v10 }
 0x3b3   :  { %v2087_v6 = vmax.f32 %v2063_v61, 0.0 }
 0x3b8   :  { %v2065_v0 = vpop.f32.mrf.mxu1 }
 0x3b9   :  { %v2066_v7 = vadd.f32 %v2065_v0, %v1972_v23 }
 0x3bb   :  { %v2088_v45 = vmax.f32 %v2066_v7, 0.0 }
 0x3c0   :  { %v2068_v2 = vpop.f32.mrf.mxu1 }
 0x3c1   :  { %v2069_v26 = vadd.f32 %v2068_v2, %v1977_v17 }
 0x3c3   :  { %v2089_v33 = vmax.f32 %v2069_v26, 0.0 }
 0x3c8   :  { %v2071_v3 = vpop.f32.mrf.mxu1 }
 0x3c9   :  { %v2072_v24 = vadd.f32 %v2071_v3, %v1982_v16 }
 0x3cb   :  { %v2090_v30 = vmax.f32 %v2072_v24, 0.0 }
 0x3d0   :  { %v2074_v8 = vpop.f32.mrf.mxu1 }
 0x3d1   :  { %v2075_v22 = vadd.f32 %v2074_v8, %v1987_v15 }
 0x3d3   :  { %v2091_v1 = vmax.f32 %v2075_v22, 0.0 }
 0x3d8   :  { %v2077_v14 = vpop.f32.mrf.mxu1 }
 0x3d9   :  { %v2078_v21 = vadd.f32 %v2077_v14, %v1992_v12 }
 0x3db   :  { %v2092_v25 = vmax.f32 %v2078_v21, 0.0 }
 0x3e0   :  { %v2080_v18 = vpop.f32.mrf.mxu1 }
 0x3e1   :  { %v2081_v55 = vadd.f32 %v2080_v18, %v1997_v11 }
 0x3e3   :  { %v2093_v50 = vmax.f32 %v2081_v55, 0.0 }
 0x3e5   :  { %2631 = vmatpush.msk.msra.mxu3 %vm2115_vm7, %v2093_v50 }
 0x3e7   :  { %2125 = vmatpush.msra.mxu3 %v2092_v25 }
 0x3e9   :  { %2126 = vmatpush.msra.mxu3 %v2091_v1 }
 0x3eb   :  { %2127 = vmatpush.msra.mxu3 %v2090_v30 }
 0x3ed   :  { %2128 = vmatpush.msra.mxu3 %v2089_v33 }
 0x3ef   :  { %2129 = vmatpush.msra.mxu3 %v2088_v45 }
 0x3f1   :  { %2130 = vmatpush.msra.mxu3 %v2087_v6 }
 0x3f3   :  { %2131 = vmatpush.msra.mxu3 %v2086_v39 }
 0x3f5   :  { %2132 = vmatpush.msra.mxu3 %v2085_v44 }
 0x3f7   :  { %2133 = vmatpush.msra.mxu3 %v2084_v36 }
 0x3f9   :  { %2134 = vmatpush.msra.mxu3 %v2083_v32 }
 0x3fa   :  { %2632 = vmatmul.msk.f32.vlgmr.msra.gmra.mxu3 %vm2108_vm8, %v2094_v5 }
 0x402   :  { %2633 = vmatmul.msk.f32.gmra.mxu3 %vm2108_vm8, %v2095_v46 }
 0x47d   :  { %v2136_v49 = vpop.f32.mrf.mxu3 }
 0x47e   :  { %v2137_v48 = vadd.f32 %v2136_v49, %v2101_v47 }
 0x480   :  { %2142 = vst.msk [vmem:[%s4013_s10] sm:$0xff] %vm546_vm4, %v2137_v48 }
 0x485   :  { %v2139_v43 = vpop.f32.mrf.mxu3 }
 0x486   :  { %v2140_v29 = vadd.f32 %v2139_v43, %v2106_v31 }
 0x488   :  { %2144 = vst.msk [vmem:[%s4013_s10 + $0x8] sm:$0x3] %vm2143_vm9, %v2140_v29 }

</bundles_post_ra>
